<compile_context>
chip_gen: v7x
topology: tpu7x:2x2x1
jax: 0.10.0
libtpu: 0.0.40
codegen_flags: <defaults>
</compile_context>

<pallas_src>
import functools

import jax
import jax.numpy as jnp
from jax import lax
from jax.experimental import pallas as pl
from jax.experimental.pallas import tpu as pltpu

F32 = jnp.float32
BF16 = jnp.bfloat16

UPAD = 128  # padded column width for up_w / hyper_w2 / iou_w2 blocks (lane tile)


# ----------------------------- chip-aware config ----------------------------

def _device_kind():
    try:
        return jax.devices()[0].device_kind.lower()
    except Exception:
        return ""


_KIND = _device_kind()
if ("v7" in _KIND) or ("7x" in _KIND):
    # 2 TensorCores / 64 MiB VMEM: keep batch-parallel grid, modest VMEM limit.
    _LINEAR_VMEM = 48 * 1024 * 1024
    _LINEAR_MAX_TILE = 1024
    _BATCH_PARALLEL = True
elif ("v5" in _KIND) or ("v6" in _KIND):
    # 1 TensorCore / 128 MiB VMEM: fold batch, let the mem-bound linear go big.
    _LINEAR_VMEM = 96 * 1024 * 1024
    _LINEAR_MAX_TILE = 2048
    _BATCH_PARALLEL = False
else:
    _LINEAR_VMEM = 32 * 1024 * 1024
    _LINEAR_MAX_TILE = 1024
    _BATCH_PARALLEL = False

_DECODER_VMEM = 32 * 1024 * 1024


def _pick_tile(m, max_tile=1024):
    """Largest power-of-two tile (<=max_tile, >=8) dividing m, else full m."""
    t = max_tile
    while t >= 8:
        if m % t == 0:
            return t
        t //= 2
    return m


def _cparams(n_parallel, vmem_bytes):
    return pltpu.CompilerParams(
        dimension_semantics=("parallel",) * n_parallel,
        vmem_limit_bytes=vmem_bytes)


# ----------------------------- generic linear -------------------------------

def _linear_kernel(x_ref, w_ref, b_ref, o_ref, *, relu):
    y = jnp.dot(x_ref[...], w_ref[...], preferred_element_type=jnp.float32)
    y = y + b_ref[...]
    if relu:
        y = jnp.maximum(y, 0.0)
    o_ref[...] = y.astype(o_ref.dtype)


def pallas_linear(x, w, b, relu=False, out_dtype=BF16,
                  max_tile=_LINEAR_MAX_TILE, vmem=_LINEAR_VMEM):
    """y = act(x @ w + b); M-tiled, bf16 operands, f32 accumulate, bf16 out.

    Weights / bias use constant index_maps so they stay VMEM-resident while
    the M tiles stream through ('parallel' axis for multi-TC chips).  The
    contraction dim is NOT zero-padded (short contractions are masked by the
    compiler; padding only adds HBM traffic on this mem-bound kernel).
    """
    M, K = x.shape
    Kw, N = w.shape
    assert K == Kw
    tm = _pick_tile(M, max_tile)
    return pl.pallas_call(
        functools.partial(_linear_kernel, relu=relu),
        out_shape=jax.ShapeDtypeStruct((M, N), out_dtype),
        grid=(M // tm,),
        in_specs=[
            pl.BlockSpec((tm, K), lambda i: (i, 0)),
            pl.BlockSpec((K, N), lambda i: (0, 0)),
            pl.BlockSpec((1, N), lambda i: (0, 0)),
        ],
        out_specs=pl.BlockSpec((tm, N), lambda i: (i, 0)),
        compiler_params=_cparams(1, vmem),
    )(x.astype(BF16), w.astype(BF16), b.reshape(1, N).astype(F32))


# ----------------------------- fused mask decoder ----------------------------

def _decoder_kernel(tok_ref, img_ref, pe_ref, nomask_ref,
                    wa_ref, ba_ref, wh1_ref, bh1_ref, wh2_ref, bh2_ref,
                    wc2_ref, bc2_ref,
                    mask_ref, iou_ref, cls_ref, *, scale):
    """Fused mask-decoder stand-in for a block of `Bb` batch elements.

    Packed-weight column layout (all 128-aligned slices -> cheap views):
      wa  [E, 4E+128] : wq | wk | wv | up_w(pad 128) | wo          (+ ba biases)
      wh1 [E, 3E]     : hyper_w1 | iou_w1 | feat_w1                (+ bh1)
      wh2 [E, 640]    : hyper_w2(pad) | iou_w2(pad) | feat_w2 | cls_w1  (+ bh2)
      wc2 [128, NL]   : cls_w2                                      (+ bc2)
    """
    f32 = jnp.float32
    Bb, T, E = tok_ref.shape
    S = img_ref.shape[1]
    NM = iou_ref.shape[2]
    Np1 = cls_ref.shape[1]
    U2 = UPAD
    CH = wc2_ref.shape[0]

    # image_pe @ wk is batch independent: compute once per grid step so the
    # K / V / up projections can share the same LHS (src) below.
    pe_k = jnp.dot(pe_ref[...], wa_ref[:, E:2 * E],
                   preferred_element_type=f32)                       # [S, E]

    for bi in range(Bb):                    # static unroll over the batch block
        tok = tok_ref[bi]                                            # [T, E] bf16
        src = (img_ref[bi].astype(f32) + nomask_ref[...]).astype(BF16)   # [S, E]

        # --- token -> image cross-attention (single fused head) -------------
        q = jnp.dot(tok, wa_ref[:, 0:E], preferred_element_type=f32) + ba_ref[:, 0:E]
        # fused K | V | upscale projection: one [S,E] @ [E, 2E+128] MXU pass
        kvu = (jnp.dot(src, wa_ref[:, E:3 * E + U2], preferred_element_type=f32)
               + ba_ref[:, E:3 * E + U2])
        k = kvu[:, 0:E] + pe_k                                       # [S, E]
        v = kvu[:, E:2 * E]                                          # [S, E]
        up = kvu[:, 2 * E:2 * E + U2]                                # [S, 128], cols>=U are 0

        s = lax.dot_general(q.astype(BF16), k.astype(BF16),
                            dimension_numbers=(((1,), (1,)), ((), ())),
                            preferred_element_type=f32) * scale      # [T, S]
        m = jnp.max(s, axis=-1, keepdims=True)
        p = jnp.exp(s - m)
        p = p / jnp.sum(p, axis=-1, keepdims=True)     # exact softmax (fine-tuning)
        attn = jnp.dot(p.astype(BF16), v.astype(BF16),
                       preferred_element_type=f32)                   # [T, E]
        attn = (jnp.dot(attn.astype(BF16), wa_ref[:, 3 * E + U2:4 * E + U2],
                        preferred_element_type=f32)
                + ba_ref[:, 3 * E + U2:4 * E + U2])
        tok_out = tok.astype(f32) + attn                             # [T, E]

        # --- hypernetwork MLP on mask token 0 -> lane-dense mask logits ------
        mask_tok = tok_out[1:2, :].astype(BF16)                      # [1, E]
        h = jnp.dot(mask_tok, wh1_ref[:, 0:E], preferred_element_type=f32) + bh1_ref[:, 0:E]
        h = jnp.maximum(h, 0.0)
        hyper = (jnp.dot(h.astype(BF16), wh2_ref[:, 0:U2], preferred_element_type=f32)
                 + bh2_ref[:, 0:U2])                                  # [1, 128]
        mask_row = lax.dot_general(hyper.astype(BF16), up.astype(BF16),
                                   dimension_numbers=(((1,), (1,)), ((), ())),
                                   preferred_element_type=f32)        # [1, S]
        mask_ref[bi] = mask_row.astype(mask_ref.dtype)

        # --- IoU head (Linear -> ReLU -> Linear) on the IoU token ------------
        iou_tok = tok_out[0:1, :].astype(BF16)                       # [1, E]
        hi = jnp.dot(iou_tok, wh1_ref[:, E:2 * E], preferred_element_type=f32) + bh1_ref[:, E:2 * E]
        hi = jnp.maximum(hi, 0.0)
        iou = (jnp.dot(hi.astype(BF16), wh2_ref[:, U2:2 * U2], preferred_element_type=f32)
               + bh2_ref[:, U2:2 * U2])                               # [1, 128]
        iou_ref[bi] = iou[:, 0:NM].astype(iou_ref.dtype)

        # --- hypernetwork-feature MLP on RAW sparse embeddings + classifier --
        sp = tok[T - Np1:, :]                        # [Np1, E] raw prompt embeddings
        f = jnp.dot(sp, wh1_ref[:, 2 * E:3 * E], preferred_element_type=f32) + bh1_ref[:, 2 * E:3 * E]
        f = jnp.maximum(f, 0.0)
        f = (jnp.dot(f.astype(BF16), wh2_ref[:, 2 * U2:2 * U2 + E], preferred_element_type=f32)
             + bh2_ref[:, 2 * U2:2 * U2 + E])
        c = (jnp.dot(f.astype(BF16), wh2_ref[:, 2 * U2 + E:2 * U2 + E + CH],
                     preferred_element_type=f32)
             + bh2_ref[:, 2 * U2 + E:2 * U2 + E + CH])
        c = jnp.maximum(c, 0.0)
        cls = (jnp.dot(c.astype(BF16), wc2_ref[...], preferred_element_type=f32)
               + bc2_ref[...])                                        # [Np1, NL]
        cls_ref[bi] = cls.astype(cls_ref.dtype)


def pallas_sam_decoder(tokens, img_emb, image_pe, no_mask_embed, p, *, batch_block):
    """Fused mask decoder + feat-MLP + classifier in one pallas_call.

    batch_block = 1 with grid=(B,) on multi-TC chips (v7x), batch_block = B
    with grid=(1,) on single-TC chips (v5e/v6e) to pay per-step overhead once.
    """
    B, T, E = tokens.shape
    S = img_emb.shape[1]
    U = p["up_w"].shape[1]
    NM = p["iou_w2"].shape[1]
    NL = p["cls_w2"].shape[1]
    CH = p["cls_w1"].shape[1]
    Np1 = T - 1 - p["mask_tokens"].shape[0]
    U2 = UPAD
    scale = 1.0 / float(E) ** 0.5
    Bb = batch_block
    assert B % Bb == 0

    padc = lambda w: jnp.pad(w, ((0, 0), (0, U2 - w.shape[1])))
    pad1 = lambda b: jnp.pad(b, (0, U2 - b.shape[0]))

    # packed decoder weights (column slices inside the kernel are 128-aligned)
    w_attn = jnp.concatenate(
        [p["wq"], p["wk"], p["wv"], padc(p["up_w"]), p["wo"]], axis=1).astype(BF16)
    b_attn = jnp.concatenate(
        [p["bq"], p["bk"], p["bv"], pad1(p["up_b"]), p["bo"]]).reshape(1, -1).astype(F32)
    w_h1 = jnp.concatenate(
        [p["hyper_w1"], p["iou_w1"], p["feat_w1"]], axis=1).astype(BF16)
    b_h1 = jnp.concatenate(
        [p["hyper_b1"], p["iou_b1"], p["feat_b1"]]).reshape(1, -1).astype(F32)
    w_h2 = jnp.concatenate(
        [padc(p["hyper_w2"]), padc(p["iou_w2"]), p["feat_w2"], p["cls_w1"]],
        axis=1).astype(BF16)
    b_h2 = jnp.concatenate(
        [pad1(p["hyper_b2"]), pad1(p["iou_b2"]), p["feat_b2"], p["cls_b1"]],
    ).reshape(1, -1).astype(F32)

    const = lambda b: (0, 0)
    in_specs = [
        pl.BlockSpec((Bb, T, E), lambda b: (b, 0, 0)),   # tokens
        pl.BlockSpec((Bb, S, E), lambda b: (b, 0, 0)),   # image embeddings
        pl.BlockSpec((S, E), const),                     # dense positional encoding
        pl.BlockSpec((1, E), const),                     # no-mask dense embedding
        pl.BlockSpec(w_attn.shape, const), pl.BlockSpec(b_attn.shape, const),
        pl.BlockSpec(w_h1.shape, const), pl.BlockSpec(b_h1.shape, const),
        pl.BlockSpec(w_h2.shape, const), pl.BlockSpec(b_h2.shape, const),
        pl.BlockSpec((CH, NL), const), pl.BlockSpec((1, NL), const),
    ]
    out_shapes = (jax.ShapeDtypeStruct((B, 1, S), F32),      # lane-dense mask rows
                  jax.ShapeDtypeStruct((B, 1, NM), F32),
                  jax.ShapeDtypeStruct((B, Np1, NL), F32))
    out_specs = [pl.BlockSpec((Bb, 1, S), lambda b: (b, 0, 0)),
                 pl.BlockSpec((Bb, 1, NM), lambda b: (b, 0, 0)),
                 pl.BlockSpec((Bb, Np1, NL), lambda b: (b, 0, 0))]

    return pl.pallas_call(
        functools.partial(_decoder_kernel, scale=scale),
        out_shape=out_shapes,
        grid=(B // Bb,),
        in_specs=in_specs,
        out_specs=out_specs,
        compiler_params=_cparams(1, _DECODER_VMEM),
    )(tokens.astype(BF16), img_emb.astype(BF16), image_pe.astype(BF16),
      no_mask_embed.reshape(1, E).astype(F32),
      w_attn, b_attn, w_h1, b_h1, w_h2, b_h2,
      p["cls_w2"].astype(BF16), p["cls_b2"].reshape(1, NL).astype(F32))


# ----------------------------- parameters -----------------------------------

def init_params(key, num_labels=4, patch=4, in_ch=3, embed=256, up_dim=32,
                num_mask_tokens=4):
    ks = jax.random.split(key, 20)
    w = lambda k, shape, s=0.02: jax.random.normal(k, shape, F32) * s
    z = lambda n: jnp.zeros((n,), F32)
    return dict(
        # image encoder (frozen): ViT patch-embed stand-in
        patch_w=w(ks[0], (in_ch * patch * patch, embed)), patch_b=z(embed),
        # prompt encoder
        pe_gauss=w(ks[1], (2, embed // 2), 1.0),
        label_embed=w(ks[2], (3, embed)),          # index = point label + 1, {-1,0,1}
        no_mask_embed=w(ks[3], (embed,)),
        # mask decoder
        iou_token=w(ks[4], (1, embed)),
        mask_tokens=w(ks[5], (num_mask_tokens, embed)),
        wq=w(ks[6], (embed, embed)), bq=z(embed),
        wk=w(ks[7], (embed, embed)), bk=z(embed),
        wv=w(ks[8], (embed, embed)), bv=z(embed),
        wo=w(ks[9], (embed, embed)), bo=z(embed),
        up_w=w(ks[10], (embed, up_dim)), up_b=z(up_dim),
        hyper_w1=w(ks[11], (embed, embed)), hyper_b1=z(embed),
        hyper_w2=w(ks[12], (embed, up_dim)), hyper_b2=z(up_dim),
        iou_w1=w(ks[13], (embed, embed)), iou_b1=z(embed),
        iou_w2=w(ks[14], (embed, num_mask_tokens)), iou_b2=z(num_mask_tokens),
        # "output_hypernetworks_mlps" applied to sparse embeddings (kept 256-wide
        # so the classifier's Linear(256,128) input contract holds)
        feat_w1=w(ks[15], (embed, embed)), feat_b1=z(embed),
        feat_w2=w(ks[16], (embed, embed)), feat_b2=z(embed),
        # classifier: Linear(256,128) -> ReLU -> Linear(128, num_labels)
        cls_w1=w(ks[17], (embed, 128)), cls_b1=z(128),
        cls_w2=w(ks[18], (128, num_labels)), cls_b2=z(num_labels),
    )


# ----------------------------- forward ---------------------------------------

def sam_fine_tuner_forward(params, images, point_coords, point_labels,
                           masks=None, patch=4):
    B, C, H, W = images.shape
    Hp, Wp = H // patch, W // patch
    S = Hp * Wp
    embed = params["patch_w"].shape[1]

    # ---- image encoder (torch.no_grad(), frozen): patchify + linear embed ----
    x = images.reshape(B, C, Hp, patch, Wp, patch)
    x = jnp.transpose(x, (0, 2, 4, 1, 3, 5)).reshape(B * S, C * patch * patch)
    img_emb = pallas_linear(x, params["patch_w"], params["patch_b"],
                            out_dtype=BF16)                           # [B*S, 256] bf16
    img_emb = jax.lax.stop_gradient(img_emb).reshape(B, S, embed)
    # TODO(synk): real SAM image encoder is a full ViT-H + conv neck; reduced to patch-embed matmul.

    # ---- prompt encoder ----
    def pos_enc(coords01):                       # random-Fourier positional encoding
        c = 2.0 * coords01 - 1.0
        proj = (2.0 * jnp.pi) * (c @ params["pe_gauss"])
        return jnp.concatenate([jnp.sin(proj), jnp.cos(proj)], axis=-1)

    # pad with a "not a point" prompt (boxes=None path of the SAM prompt encoder)
    coords = jnp.concatenate([point_coords.astype(F32),
                              jnp.zeros((B, 1, 2), F32)], axis=1)             # [B, N+1, 2]
    labels = jnp.concatenate([point_labels.astype(jnp.int32),
                              -jnp.ones((B, 1), jnp.int32)], axis=1)          # [B, N+1]
    pe_pts = pos_enc(coords / jnp.array([W, H], F32))
    pe_pts = jnp.where((labels == -1)[..., None], 0.0, pe_pts)
    sparse_embeddings = pe_pts + params["label_embed"][labels + 1]            # [B, N+1, 256]
    # TODO(synk): masks= input path (mask-downscaling conv stack) of the prompt encoder not implemented.

    ys = (jnp.arange(Hp, dtype=F32) + 0.5) / Hp
    xs = (jnp.arange(Wp, dtype=F32) + 0.5) / Wp
    grid = jnp.stack(jnp.meshgrid(xs, ys, indexing="xy"), axis=-1).reshape(S, 2)
    image_pe = pos_enc(grid)                                                  # get_dense_pe(), [S, 256]

    # ---- fused mask decoder + hypernetwork-feature MLP + classifier ----
    num_mask_tokens = params["mask_tokens"].shape[0]
    tokens = jnp.concatenate([
        jnp.broadcast_to(params["iou_token"], (B, 1, embed)),
        jnp.broadcast_to(params["mask_tokens"], (B, num_mask_tokens, embed)),
        sparse_embeddings], axis=1)                                           # [B, T, 256]

    batch_block = 1 if _BATCH_PARALLEL else B
    mask_rows, iou_all, class_predictions = pallas_sam_decoder(
        tokens, img_emb, image_pe, params["no_mask_embed"], params,
        batch_block=batch_block)
    # TODO(synk): full TwoWayTransformer (2 layers, both attention directions, MLPs, LayerNorms)
    # and the transposed-conv output upscaling are reduced to this fused block.

    mask_predictions = mask_rows.reshape(B, 1, Hp, Wp)                        # NCHW
    iou_predictions = iou_all.reshape(B, -1)[:, 0:1]                          # [B, 1]
    return mask_predictions, iou_predictions, class_predictions


# ----------------------------- main ------------------------------------------

if __name__ == "__main__":
    key = jax.random.PRNGKey(0)
    pkey, ikey, ckey, lkey = jax.random.split(key, 4)

    num_labels = 4
    params = init_params(pkey, num_labels=num_labels)

    B, C, H, W = 2, 3, 32, 32
    N_points = 2
    images = jax.random.normal(ikey, (B, C, H, W), F32)
    point_coords = jax.random.uniform(ckey, (B, N_points, 2), F32,
                                      minval=0.0, maxval=float(H))
    point_labels = jax.random.bernoulli(lkey, 0.5, (B, N_points)).astype(jnp.int32)

    fwd = jax.jit(sam_fine_tuner_forward)
    mask_pred, iou_pred, class_pred = fwd(params, images, point_coords, point_labels)
    jax.block_until_ready((mask_pred, iou_pred, class_pred))

    assert mask_pred.shape == (B, 1, H // 4, W // 4)
    assert iou_pred.shape == (B, 1)
    assert class_pred.shape == (B, N_points + 1, num_labels)
    print("KERNEL_OK")
</pallas_src>

<mosaic_0001>
module attributes {stable_mosaic.version = 11 : i64} {
  func.func @_linear_kernel(%arg0: i32, %arg1: memref<128x48xbf16, #tpu.memory_space<vmem>>, %arg2: memref<48x256xbf16, #tpu.memory_space<vmem>>, %arg3: memref<1x256xf32, #tpu.memory_space<vmem>>, %arg4: memref<128x256xbf16, #tpu.memory_space<vmem>>) attributes {dimension_semantics = [#tpu.dimension_semantics<parallel>], iteration_bounds = array<i64: 1>, scalar_prefetch = 0 : i64, scratch_operands = 0 : i64, tpu.core_type = #tpu.core_type<tc>, window_params = [{transform_indices = @transform_0, window_bounds = array<i64: 128, 48>}, {pipeline_mode = #tpu.pipeline_mode<synchronous>, transform_indices = @transform_1, window_bounds = array<i64: 48, 256>}, {pipeline_mode = #tpu.pipeline_mode<synchronous>, transform_indices = @transform_2, window_bounds = array<i64: 1, 256>}, {transform_indices = @transform_3, window_bounds = array<i64: 128, 256>}]} {
    %c0 = arith.constant 0 : index
    %c0_0 = arith.constant 0 : index
    %0 = vector.load %arg1[%c0, %c0_0] : memref<128x48xbf16, #tpu.memory_space<vmem>>, vector<128x48xbf16>
    %c0_1 = arith.constant 0 : index
    %c0_2 = arith.constant 0 : index
    %1 = vector.load %arg2[%c0_1, %c0_2] : memref<48x256xbf16, #tpu.memory_space<vmem>>, vector<48x256xbf16>
    %cst = arith.constant dense<0.000000e+00> : vector<128x256xf32>
    %2 = tpu.matmul %0, %1, %cst {dimension_numbers = #tpu.dot_dimension_numbers<[1], [0], [0], [1], [0, 0, 1, 1], [], []>} : vector<128x48xbf16>, vector<48x256xbf16>, vector<128x256xf32> -> vector<128x256xf32>
    %c0_3 = arith.constant 0 : index
    %c0_4 = arith.constant 0 : index
    %3 = vector.load %arg3[%c0_3, %c0_4] : memref<1x256xf32, #tpu.memory_space<vmem>>, vector<1x256xf32>
    %4 = vector.broadcast %3 : vector<1x256xf32> to vector<128x256xf32>
    %5 = arith.addf %2, %4 : vector<128x256xf32>
    %6 = arith.truncf %5 : vector<128x256xf32> to vector<128x256xbf16>
    %c0_5 = arith.constant 0 : index
    %c0_6 = arith.constant 0 : index
    %7 = vector.load %arg4[%c0_5, %c0_6] : memref<128x256xbf16, #tpu.memory_space<vmem>>, vector<128x256xbf16>
    tpu.vector_store %arg4[%c0_5, %c0_6], %6 {strides = array<i32>} : memref<128x256xbf16, #tpu.memory_space<vmem>>, vector<128x256xbf16>,
    return
  }
  func.func @transform_0(%arg0: i32) -> (i32, i32) {
    %c0_i32 = arith.constant 0 : i32
    %c0_i32_0 = arith.constant 0 : i32
    return %arg0, %c0_i32 : i32, i32
  }
  func.func @transform_1(%arg0: i32) -> (i32, i32) {
    %c0_i32 = arith.constant 0 : i32
    %c0_i32_0 = arith.constant 0 : i32
    %c0_i32_1 = arith.constant 0 : i32
    return %c0_i32, %c0_i32_0 : i32, i32
  }
  func.func @transform_2(%arg0: i32) -> (i32, i32) {
    %c0_i32 = arith.constant 0 : i32
    %c0_i32_0 = arith.constant 0 : i32
    %c0_i32_1 = arith.constant 0 : i32
    return %c0_i32, %c0_i32_0 : i32, i32
  }
  func.func @transform_3(%arg0: i32) -> (i32, i32) {
    %c0_i32 = arith.constant 0 : i32
    %c0_i32_0 = arith.constant 0 : i32
    return %arg0, %c0_i32 : i32, i32
  }
}

module attributes {stable_mosaic.version = 11 : i64} {
  func.func @_decoder_kernel(%arg0: i32, %arg1: memref<2x8x256xbf16, #tpu.memory_space<vmem>>, %arg2: memref<2x64x256xbf16, #tpu.memory_space<vmem>>, %arg3: memref<64x256xbf16, #tpu.memory_space<vmem>>, %arg4: memref<1x256xf32, #tpu.memory_space<vmem>>, %arg5: memref<256x1152xbf16, #tpu.memory_space<vmem>>, %arg6: memref<1x1152xf32, #tpu.memory_space<vmem>>, %arg7: memref<256x768xbf16, #tpu.memory_space<vmem>>, %arg8: memref<1x768xf32, #tpu.memory_space<vmem>>, %arg9: memref<256x640xbf16, #tpu.memory_space<vmem>>, %arg10: memref<1x640xf32, #tpu.memory_space<vmem>>, %arg11: memref<128x4xbf16, #tpu.memory_space<vmem>>, %arg12: memref<1x4xf32, #tpu.memory_space<vmem>>, %arg13: memref<2x1x64xf32, #tpu.memory_space<vmem>>, %arg14: memref<2x1x4xf32, #tpu.memory_space<vmem>>, %arg15: memref<2x3x4xf32, #tpu.memory_space<vmem>>) attributes {dimension_semantics = [#tpu.dimension_semantics<parallel>], iteration_bounds = array<i64: 1>, scalar_prefetch = 0 : i64, scratch_operands = 0 : i64, tpu.core_type = #tpu.core_type<tc>, window_params = [{transform_indices = @transform_0, window_bounds = array<i64: 2, 8, 256>}, {transform_indices = @transform_1, window_bounds = array<i64: 2, 64, 256>}, {pipeline_mode = #tpu.pipeline_mode<synchronous>, transform_indices = @transform_2, window_bounds = array<i64: 64, 256>}, {pipeline_mode = #tpu.pipeline_mode<synchronous>, transform_indices = @transform_3, window_bounds = array<i64: 1, 256>}, {pipeline_mode = #tpu.pipeline_mode<synchronous>, transform_indices = @transform_4, window_bounds = array<i64: 256, 1152>}, {pipeline_mode = #tpu.pipeline_mode<synchronous>, transform_indices = @transform_5, window_bounds = array<i64: 1, 1152>}, {pipeline_mode = #tpu.pipeline_mode<synchronous>, transform_indices = @transform_6, window_bounds = array<i64: 256, 768>}, {pipeline_mode = #tpu.pipeline_mode<synchronous>, transform_indices = @transform_7, window_bounds = array<i64: 1, 768>}, {pipeline_mode = #tpu.pipeline_mode<synchronous>, transform_indices = @transform_8, window_bounds = array<i64: 256, 640>}, {pipeline_mode = #tpu.pipeline_mode<synchronous>, transform_indices = @transform_9, window_bounds = array<i64: 1, 640>}, {pipeline_mode = #tpu.pipeline_mode<synchronous>, transform_indices = @transform_10, window_bounds = array<i64: 128, 4>}, {pipeline_mode = #tpu.pipeline_mode<synchronous>, transform_indices = @transform_11, window_bounds = array<i64: 1, 4>}, {transform_indices = @transform_12, window_bounds = array<i64: 2, 1, 64>}, {transform_indices = @transform_13, window_bounds = array<i64: 2, 1, 4>}, {transform_indices = @transform_14, window_bounds = array<i64: 2, 3, 4>}]} {
    %c0 = arith.constant 0 : index
    %c0_0 = arith.constant 0 : index
    %0 = vector.load %arg3[%c0, %c0_0] : memref<64x256xbf16, #tpu.memory_space<vmem>>, vector<64x256xbf16>
    %c0_1 = arith.constant 0 : index
    %c256 = arith.constant 256 : index
    %1 = vector.load %arg5[%c0_1, %c256] : memref<256x1152xbf16, #tpu.memory_space<vmem>>, vector<256x256xbf16>
    %cst = arith.constant dense<0.000000e+00> : vector<64x256xf32>
    %2 = tpu.matmul %0, %1, %cst {dimension_numbers = #tpu.dot_dimension_numbers<[1], [0], [0], [1], [0, 0, 1, 1], [], []>} : vector<64x256xbf16>, vector<256x256xbf16>, vector<64x256xf32> -> vector<64x256xf32>
    %c0_2 = arith.constant 0 : index
    %c0_3 = arith.constant 0 : index
    %c0_4 = arith.constant 0 : index
    %3 = vector.load %arg1[%c0_2, %c0_3, %c0_4] : memref<2x8x256xbf16, #tpu.memory_space<vmem>>, vector<1x8x256xbf16>
    %4 = vector.shape_cast %3 : vector<1x8x256xbf16> to vector<8x256xbf16>
    %c0_5 = arith.constant 0 : index
    %c0_6 = arith.constant 0 : index
    %c0_7 = arith.constant 0 : index
    %5 = vector.load %arg2[%c0_5, %c0_6, %c0_7] : memref<2x64x256xbf16, #tpu.memory_space<vmem>>, vector<1x64x256xbf16>
    %6 = vector.shape_cast %5 : vector<1x64x256xbf16> to vector<64x256xbf16>
    %7 = arith.extf %6 : vector<64x256xbf16> to vector<64x256xf32>
    %c0_8 = arith.constant 0 : index
    %c0_9 = arith.constant 0 : index
    %8 = vector.load %arg4[%c0_8, %c0_9] : memref<1x256xf32, #tpu.memory_space<vmem>>, vector<1x256xf32>
    %9 = vector.broadcast %8 : vector<1x256xf32> to vector<64x256xf32>
    %10 = arith.addf %7, %9 : vector<64x256xf32>
    %11 = arith.truncf %10 : vector<64x256xf32> to vector<64x256xbf16>
    %c0_10 = arith.constant 0 : index
    %c0_11 = arith.constant 0 : index
    %12 = vector.load %arg5[%c0_10, %c0_11] : memref<256x1152xbf16, #tpu.memory_space<vmem>>, vector<256x256xbf16>
    %cst_12 = arith.constant dense<0.000000e+00> : vector<8x256xf32>
    %13 = tpu.matmul %4, %12, %cst_12 {dimension_numbers = #tpu.dot_dimension_numbers<[1], [0], [0], [1], [0, 0, 1, 1], [], []>} : vector<8x256xbf16>, vector<256x256xbf16>, vector<8x256xf32> -> vector<8x256xf32>
    %c0_13 = arith.constant 0 : index
    %c0_14 = arith.constant 0 : index
    %14 = vector.load %arg6[%c0_13, %c0_14] : memref<1x1152xf32, #tpu.memory_space<vmem>>, vector<1x256xf32>
    %15 = vector.broadcast %14 : vector<1x256xf32> to vector<8x256xf32>
    %16 = arith.addf %13, %15 : vector<8x256xf32>
    %c0_15 = arith.constant 0 : index
    %c256_16 = arith.constant 256 : index
    %17 = vector.load %arg5[%c0_15, %c256_16] : memref<256x1152xbf16, #tpu.memory_space<vmem>>, vector<256x640xbf16>
    %cst_17 = arith.constant dense<0.000000e+00> : vector<64x640xf32>
    %18 = tpu.matmul %11, %17, %cst_17 {dimension_numbers = #tpu.dot_dimension_numbers<[1], [0], [0], [1], [0, 0, 1, 1], [], []>} : vector<64x256xbf16>, vector<256x640xbf16>, vector<64x640xf32> -> vector<64x640xf32>
    %c0_18 = arith.constant 0 : index
    %c256_19 = arith.constant 256 : index
    %19 = vector.load %arg6[%c0_18, %c256_19] : memref<1x1152xf32, #tpu.memory_space<vmem>>, vector<1x640xf32>
    %20 = vector.broadcast %19 : vector<1x640xf32> to vector<64x640xf32>
    %21 = arith.addf %18, %20 : vector<64x640xf32>
    %22 = vector.extract_strided_slice %21 {offsets = [0, 0], sizes = [64, 256], strides = [1, 1]} : vector<64x640xf32> to vector<64x256xf32>
    %23 = arith.addf %22, %2 : vector<64x256xf32>
    %24 = vector.extract_strided_slice %21 {offsets = [0, 256], sizes = [64, 256], strides = [1, 1]} : vector<64x640xf32> to vector<64x256xf32>
    %25 = vector.extract_strided_slice %21 {offsets = [0, 512], sizes = [64, 128], strides = [1, 1]} : vector<64x640xf32> to vector<64x128xf32>
    %26 = arith.truncf %16 : vector<8x256xf32> to vector<8x256xbf16>
    %27 = arith.truncf %23 : vector<64x256xf32> to vector<64x256xbf16>
    %cst_20 = arith.constant dense<0.000000e+00> : vector<8x64xf32>
    %28 = tpu.matmul %26, %27, %cst_20 {dimension_numbers = #tpu.dot_dimension_numbers<[1], [1], [0], [0], [0, 0, 1, 0], [], []>} : vector<8x256xbf16>, vector<64x256xbf16>, vector<8x64xf32> -> vector<8x64xf32>
    %cst_21 = arith.constant 6.250000e-02 : f32
    %29 = vector.broadcast %cst_21 : f32 to vector<8x64xf32>
    %30 = arith.mulf %28, %29 : vector<8x64xf32>
    %cst_22 = arith.constant dense<0xFF800000> : vector<8xf32>
    %31 = vector.multi_reduction <maximumf>, %30, %cst_22 [1] : vector<8x64xf32> to vector<8xf32>
    %32 = vector.shape_cast %31 : vector<8xf32> to vector<8x1xf32>
    %33 = vector.broadcast %32 : vector<8x1xf32> to vector<8x64xf32>
    %34 = arith.subf %30, %33 : vector<8x64xf32>
    %35 = math.exp %34 : vector<8x64xf32>
    %cst_23 = arith.constant dense<0.000000e+00> : vector<8xf32>
    %36 = vector.multi_reduction <add>, %35, %cst_23 [1] : vector<8x64xf32> to vector<8xf32>
    %37 = vector.shape_cast %36 : vector<8xf32> to vector<8x1xf32>
    %38 = vector.broadcast %37 : vector<8x1xf32> to vector<8x64xf32>
    %39 = arith.divf %35, %38 : vector<8x64xf32>
    %40 = arith.truncf %39 : vector<8x64xf32> to vector<8x64xbf16>
    %41 = arith.truncf %24 : vector<64x256xf32> to vector<64x256xbf16>
    %cst_24 = arith.constant dense<0.000000e+00> : vector<8x256xf32>
    %42 = tpu.matmul %40, %41, %cst_24 {dimension_numbers = #tpu.dot_dimension_numbers<[1], [0], [0], [1], [0, 0, 1, 1], [], []>} : vector<8x64xbf16>, vector<64x256xbf16>, vector<8x256xf32> -> vector<8x256xf32>
    %43 = arith.truncf %42 : vector<8x256xf32> to vector<8x256xbf16>
    %c0_25 = arith.constant 0 : index
    %c896 = arith.constant 896 : index
    %44 = vector.load %arg5[%c0_25, %c896] : memref<256x1152xbf16, #tpu.memory_space<vmem>>, vector<256x256xbf16>
    %cst_26 = arith.constant dense<0.000000e+00> : vector<8x256xf32>
    %45 = tpu.matmul %43, %44, %cst_26 {dimension_numbers = #tpu.dot_dimension_numbers<[1], [0], [0], [1], [0, 0, 1, 1], [], []>} : vector<8x256xbf16>, vector<256x256xbf16>, vector<8x256xf32> -> vector<8x256xf32>
    %c0_27 = arith.constant 0 : index
    %c896_28 = arith.constant 896 : index
    %46 = vector.load %arg6[%c0_27, %c896_28] : memref<1x1152xf32, #tpu.memory_space<vmem>>, vector<1x256xf32>
    %47 = vector.broadcast %46 : vector<1x256xf32> to vector<8x256xf32>
    %48 = arith.addf %45, %47 : vector<8x256xf32>
    %49 = arith.extf %4 : vector<8x256xbf16> to vector<8x256xf32>
    %50 = arith.addf %49, %48 : vector<8x256xf32>
    %51 = vector.extract_strided_slice %50 {offsets = [1, 0], sizes = [1, 256], strides = [1, 1]} : vector<8x256xf32> to vector<1x256xf32>
    %52 = arith.truncf %51 : vector<1x256xf32> to vector<1x256xbf16>
    %c0_29 = arith.constant 0 : index
    %c0_30 = arith.constant 0 : index
    %53 = vector.load %arg7[%c0_29, %c0_30] : memref<256x768xbf16, #tpu.memory_space<vmem>>, vector<256x256xbf16>
    %cst_31 = arith.constant dense<0.000000e+00> : vector<1x256xf32>
    %54 = tpu.matmul %52, %53, %cst_31 {dimension_numbers = #tpu.dot_dimension_numbers<[1], [0], [0], [1], [0, 0, 1, 1], [], []>} : vector<1x256xbf16>, vector<256x256xbf16>, vector<1x256xf32> -> vector<1x256xf32>
    %c0_32 = arith.constant 0 : index
    %c0_33 = arith.constant 0 : index
    %55 = vector.load %arg8[%c0_32, %c0_33] : memref<1x768xf32, #tpu.memory_space<vmem>>, vector<1x256xf32>
    %56 = arith.addf %54, %55 : vector<1x256xf32>
    %cst_34 = arith.constant 0.000000e+00 : f32
    %57 = vector.broadcast %cst_34 : f32 to vector<1x256xf32>
    %58 = arith.maximumf %56, %57 : vector<1x256xf32>
    %59 = arith.truncf %58 : vector<1x256xf32> to vector<1x256xbf16>
    %c0_35 = arith.constant 0 : index
    %c0_36 = arith.constant 0 : index
    %60 = vector.load %arg9[%c0_35, %c0_36] : memref<256x640xbf16, #tpu.memory_space<vmem>>, vector<256x128xbf16>
    %cst_37 = arith.constant dense<0.000000e+00> : vector<1x128xf32>
    %61 = tpu.matmul %59, %60, %cst_37 {dimension_numbers = #tpu.dot_dimension_numbers<[1], [0], [0], [1], [0, 0, 1, 1], [], []>} : vector<1x256xbf16>, vector<256x128xbf16>, vector<1x128xf32> -> vector<1x128xf32>
    %c0_38 = arith.constant 0 : index
    %c0_39 = arith.constant 0 : index
    %62 = vector.load %arg10[%c0_38, %c0_39] : memref<1x640xf32, #tpu.memory_space<vmem>>, vector<1x128xf32>
    %63 = arith.addf %61, %62 : vector<1x128xf32>
    %64 = arith.truncf %63 : vector<1x128xf32> to vector<1x128xbf16>
    %65 = arith.truncf %25 : vector<64x128xf32> to vector<64x128xbf16>
    %cst_40 = arith.constant dense<0.000000e+00> : vector<1x64xf32>
    %66 = tpu.matmul %64, %65, %cst_40 {dimension_numbers = #tpu.dot_dimension_numbers<[1], [1], [0], [0], [0, 0, 1, 0], [], []>} : vector<1x128xbf16>, vector<64x128xbf16>, vector<1x64xf32> -> vector<1x64xf32>
    %c0_41 = arith.constant 0 : index
    %c0_42 = arith.constant 0 : index
    %c0_43 = arith.constant 0 : index
    %67 = vector.load %arg13[%c0_41, %c0_42, %c0_43] : memref<2x1x64xf32, #tpu.memory_space<vmem>>, vector<1x1x64xf32>
    %68 = vector.shape_cast %67 : vector<1x1x64xf32> to vector<1x64xf32>
    %69 = vector.shape_cast %66 : vector<1x64xf32> to vector<1x1x64xf32>
    tpu.vector_store %arg13[%c0_41, %c0_42, %c0_43], %69 {strides = array<i32>} : memref<2x1x64xf32, #tpu.memory_space<vmem>>, vector<1x1x64xf32>,
    %70 = vector.extract_strided_slice %50 {offsets = [0, 0], sizes = [1, 256], strides = [1, 1]} : vector<8x256xf32> to vector<1x256xf32>
    %71 = arith.truncf %70 : vector<1x256xf32> to vector<1x256xbf16>
    %c0_44 = arith.constant 0 : index
    %c256_45 = arith.constant 256 : index
    %72 = vector.load %arg7[%c0_44, %c256_45] : memref<256x768xbf16, #tpu.memory_space<vmem>>, vector<256x256xbf16>
    %cst_46 = arith.constant dense<0.000000e+00> : vector<1x256xf32>
    %73 = tpu.matmul %71, %72, %cst_46 {dimension_numbers = #tpu.dot_dimension_numbers<[1], [0], [0], [1], [0, 0, 1, 1], [], []>} : vector<1x256xbf16>, vector<256x256xbf16>, vector<1x256xf32> -> vector<1x256xf32>
    %c0_47 = arith.constant 0 : index
    %c256_48 = arith.constant 256 : index
    %74 = vector.load %arg8[%c0_47, %c256_48] : memref<1x768xf32, #tpu.memory_space<vmem>>, vector<1x256xf32>
    %75 = arith.addf %73, %74 : vector<1x256xf32>
    %cst_49 = arith.constant 0.000000e+00 : f32
    %76 = vector.broadcast %cst_49 : f32 to vector<1x256xf32>
    %77 = arith.maximumf %75, %76 : vector<1x256xf32>
    %78 = arith.truncf %77 : vector<1x256xf32> to vector<1x256xbf16>
    %c0_50 = arith.constant 0 : index
    %c128 = arith.constant 128 : index
    %79 = vector.load %arg9[%c0_50, %c128] : memref<256x640xbf16, #tpu.memory_space<vmem>>, vector<256x128xbf16>
    %cst_51 = arith.constant dense<0.000000e+00> : vector<1x128xf32>
    %80 = tpu.matmul %78, %79, %cst_51 {dimension_numbers = #tpu.dot_dimension_numbers<[1], [0], [0], [1], [0, 0, 1, 1], [], []>} : vector<1x256xbf16>, vector<256x128xbf16>, vector<1x128xf32> -> vector<1x128xf32>
    %c0_52 = arith.constant 0 : index
    %c128_53 = arith.constant 128 : index
    %81 = vector.load %arg10[%c0_52, %c128_53] : memref<1x640xf32, #tpu.memory_space<vmem>>, vector<1x128xf32>
    %82 = arith.addf %80, %81 : vector<1x128xf32>
    %83 = vector.extract_strided_slice %82 {offsets = [0, 0], sizes = [1, 4], strides = [1, 1]} : vector<1x128xf32> to vector<1x4xf32>
    %c0_54 = arith.constant 0 : index
    %c0_55 = arith.constant 0 : index
    %c0_56 = arith.constant 0 : index
    %84 = vector.load %arg14[%c0_54, %c0_55, %c0_56] : memref<2x1x4xf32, #tpu.memory_space<vmem>>, vector<1x1x4xf32>
    %85 = vector.shape_cast %84 : vector<1x1x4xf32> to vector<1x4xf32>
    %86 = vector.shape_cast %83 : vector<1x4xf32> to vector<1x1x4xf32>
    tpu.vector_store %arg14[%c0_54, %c0_55, %c0_56], %86 {strides = array<i32>} : memref<2x1x4xf32, #tpu.memory_space<vmem>>, vector<1x1x4xf32>,
    %87 = vector.extract_strided_slice %4 {offsets = [5, 0], sizes = [3, 256], strides = [1, 1]} : vector<8x256xbf16> to vector<3x256xbf16>
    %c0_57 = arith.constant 0 : index
    %c512 = arith.constant 512 : index
    %88 = vector.load %arg7[%c0_57, %c512] : memref<256x768xbf16, #tpu.memory_space<vmem>>, vector<256x256xbf16>
    %cst_58 = arith.constant dense<0.000000e+00> : vector<3x256xf32>
    %89 = tpu.matmul %87, %88, %cst_58 {dimension_numbers = #tpu.dot_dimension_numbers<[1], [0], [0], [1], [0, 0, 1, 1], [], []>} : vector<3x256xbf16>, vector<256x256xbf16>, vector<3x256xf32> -> vector<3x256xf32>
    %c0_59 = arith.constant 0 : index
    %c512_60 = arith.constant 512 : index
    %90 = vector.load %arg8[%c0_59, %c512_60] : memref<1x768xf32, #tpu.memory_space<vmem>>, vector<1x256xf32>
    %91 = vector.broadcast %90 : vector<1x256xf32> to vector<3x256xf32>
    %92 = arith.addf %89, %91 : vector<3x256xf32>
    %cst_61 = arith.constant 0.000000e+00 : f32
    %93 = vector.broadcast %cst_61 : f32 to vector<3x256xf32>
    %94 = arith.maximumf %92, %93 : vector<3x256xf32>
    %95 = arith.truncf %94 : vector<3x256xf32> to vector<3x256xbf16>
    %c0_62 = arith.constant 0 : index
    %c256_63 = arith.constant 256 : index
    %96 = vector.load %arg9[%c0_62, %c256_63] : memref<256x640xbf16, #tpu.memory_space<vmem>>, vector<256x256xbf16>
    %cst_64 = arith.constant dense<0.000000e+00> : vector<3x256xf32>
    %97 = tpu.matmul %95, %96, %cst_64 {dimension_numbers = #tpu.dot_dimension_numbers<[1], [0], [0], [1], [0, 0, 1, 1], [], []>} : vector<3x256xbf16>, vector<256x256xbf16>, vector<3x256xf32> -> vector<3x256xf32>
    %c0_65 = arith.constant 0 : index
    %c256_66 = arith.constant 256 : index
    %98 = vector.load %arg10[%c0_65, %c256_66] : memref<1x640xf32, #tpu.memory_space<vmem>>, vector<1x256xf32>
    %99 = vector.broadcast %98 : vector<1x256xf32> to vector<3x256xf32>
    %100 = arith.addf %97, %99 : vector<3x256xf32>
    %101 = arith.truncf %100 : vector<3x256xf32> to vector<3x256xbf16>
    %c0_67 = arith.constant 0 : index
    %c512_68 = arith.constant 512 : index
    %102 = vector.load %arg9[%c0_67, %c512_68] : memref<256x640xbf16, #tpu.memory_space<vmem>>, vector<256x128xbf16>
    %cst_69 = arith.constant dense<0.000000e+00> : vector<3x128xf32>
    %103 = tpu.matmul %101, %102, %cst_69 {dimension_numbers = #tpu.dot_dimension_numbers<[1], [0], [0], [1], [0, 0, 1, 1], [], []>} : vector<3x256xbf16>, vector<256x128xbf16>, vector<3x128xf32> -> vector<3x128xf32>
    %c0_70 = arith.constant 0 : index
    %c512_71 = arith.constant 512 : index
    %104 = vector.load %arg10[%c0_70, %c512_71] : memref<1x640xf32, #tpu.memory_space<vmem>>, vector<1x128xf32>
    %105 = vector.broadcast %104 : vector<1x128xf32> to vector<3x128xf32>
    %106 = arith.addf %103, %105 : vector<3x128xf32>
    %cst_72 = arith.constant 0.000000e+00 : f32
    %107 = vector.broadcast %cst_72 : f32 to vector<3x128xf32>
    %108 = arith.maximumf %106, %107 : vector<3x128xf32>
    %109 = arith.truncf %108 : vector<3x128xf32> to vector<3x128xbf16>
    %c0_73 = arith.constant 0 : index
    %c0_74 = arith.constant 0 : index
    %110 = vector.load %arg11[%c0_73, %c0_74] : memref<128x4xbf16, #tpu.memory_space<vmem>>, vector<128x4xbf16>
    %cst_75 = arith.constant dense<0.000000e+00> : vector<3x4xf32>
    %111 = tpu.matmul %109, %110, %cst_75 {dimension_numbers = #tpu.dot_dimension_numbers<[1], [0], [0], [1], [0, 0, 1, 1], [], []>} : vector<3x128xbf16>, vector<128x4xbf16>, vector<3x4xf32> -> vector<3x4xf32>
    %c0_76 = arith.constant 0 : index
    %c0_77 = arith.constant 0 : index
    %112 = vector.load %arg12[%c0_76, %c0_77] : memref<1x4xf32, #tpu.memory_space<vmem>>, vector<1x4xf32>
    %113 = vector.broadcast %112 : vector<1x4xf32> to vector<3x4xf32>
    %114 = arith.addf %111, %113 : vector<3x4xf32>
    %c0_78 = arith.constant 0 : index
    %c0_79 = arith.constant 0 : index
    %c0_80 = arith.constant 0 : index
    %115 = vector.load %arg15[%c0_78, %c0_79, %c0_80] : memref<2x3x4xf32, #tpu.memory_space<vmem>>, vector<1x3x4xf32>
    %116 = vector.shape_cast %115 : vector<1x3x4xf32> to vector<3x4xf32>
    %117 = vector.shape_cast %114 : vector<3x4xf32> to vector<1x3x4xf32>
    tpu.vector_store %arg15[%c0_78, %c0_79, %c0_80], %117 {strides = array<i32>} : memref<2x3x4xf32, #tpu.memory_space<vmem>>, vector<1x3x4xf32>,
    %c1 = arith.constant 1 : index
    %c0_81 = arith.constant 0 : index
    %c0_82 = arith.constant 0 : index
    %118 = vector.load %arg1[%c1, %c0_81, %c0_82] : memref<2x8x256xbf16, #tpu.memory_space<vmem>>, vector<1x8x256xbf16>
    %119 = vector.shape_cast %118 : vector<1x8x256xbf16> to vector<8x256xbf16>
    %c1_83 = arith.constant 1 : index
    %c0_84 = arith.constant 0 : index
    %c0_85 = arith.constant 0 : index
    %120 = vector.load %arg2[%c1_83, %c0_84, %c0_85] : memref<2x64x256xbf16, #tpu.memory_space<vmem>>, vector<1x64x256xbf16>
    %121 = vector.shape_cast %120 : vector<1x64x256xbf16> to vector<64x256xbf16>
    %122 = arith.extf %121 : vector<64x256xbf16> to vector<64x256xf32>
    %c0_86 = arith.constant 0 : index
    %c0_87 = arith.constant 0 : index
    %123 = vector.load %arg4[%c0_86, %c0_87] : memref<1x256xf32, #tpu.memory_space<vmem>>, vector<1x256xf32>
    %124 = vector.broadcast %123 : vector<1x256xf32> to vector<64x256xf32>
    %125 = arith.addf %122, %124 : vector<64x256xf32>
    %126 = arith.truncf %125 : vector<64x256xf32> to vector<64x256xbf16>
    %c0_88 = arith.constant 0 : index
    %c0_89 = arith.constant 0 : index
    %127 = vector.load %arg5[%c0_88, %c0_89] : memref<256x1152xbf16, #tpu.memory_space<vmem>>, vector<256x256xbf16>
    %cst_90 = arith.constant dense<0.000000e+00> : vector<8x256xf32>
    %128 = tpu.matmul %119, %127, %cst_90 {dimension_numbers = #tpu.dot_dimension_numbers<[1], [0], [0], [1], [0, 0, 1, 1], [], []>} : vector<8x256xbf16>, vector<256x256xbf16>, vector<8x256xf32> -> vector<8x256xf32>
    %c0_91 = arith.constant 0 : index
    %c0_92 = arith.constant 0 : index
    %129 = vector.load %arg6[%c0_91, %c0_92] : memref<1x1152xf32, #tpu.memory_space<vmem>>, vector<1x256xf32>
    %130 = vector.broadcast %129 : vector<1x256xf32> to vector<8x256xf32>
    %131 = arith.addf %128, %130 : vector<8x256xf32>
    %c0_93 = arith.constant 0 : index
    %c256_94 = arith.constant 256 : index
    %132 = vector.load %arg5[%c0_93, %c256_94] : memref<256x1152xbf16, #tpu.memory_space<vmem>>, vector<256x640xbf16>
    %cst_95 = arith.constant dense<0.000000e+00> : vector<64x640xf32>
    %133 = tpu.matmul %126, %132, %cst_95 {dimension_numbers = #tpu.dot_dimension_numbers<[1], [0], [0], [1], [0, 0, 1, 1], [], []>} : vector<64x256xbf16>, vector<256x640xbf16>, vector<64x640xf32> -> vector<64x640xf32>
    %c0_96 = arith.constant 0 : index
    %c256_97 = arith.constant 256 : index
    %134 = vector.load %arg6[%c0_96, %c256_97] : memref<1x1152xf32, #tpu.memory_space<vmem>>, vector<1x640xf32>
    %135 = vector.broadcast %134 : vector<1x640xf32> to vector<64x640xf32>
    %136 = arith.addf %133, %135 : vector<64x640xf32>
    %137 = vector.extract_strided_slice %136 {offsets = [0, 0], sizes = [64, 256], strides = [1, 1]} : vector<64x640xf32> to vector<64x256xf32>
    %138 = arith.addf %137, %2 : vector<64x256xf32>
    %139 = vector.extract_strided_slice %136 {offsets = [0, 256], sizes = [64, 256], strides = [1, 1]} : vector<64x640xf32> to vector<64x256xf32>
    %140 = vector.extract_strided_slice %136 {offsets = [0, 512], sizes = [64, 128], strides = [1, 1]} : vector<64x640xf32> to vector<64x128xf32>
    %141 = arith.truncf %131 : vector<8x256xf32> to vector<8x256xbf16>
    %142 = arith.truncf %138 : vector<64x256xf32> to vector<64x256xbf16>
    %cst_98 = arith.constant dense<0.000000e+00> : vector<8x64xf32>
    %143 = tpu.matmul %141, %142, %cst_98 {dimension_numbers = #tpu.dot_dimension_numbers<[1], [1], [0], [0], [0, 0, 1, 0], [], []>} : vector<8x256xbf16>, vector<64x256xbf16>, vector<8x64xf32> -> vector<8x64xf32>
    %cst_99 = arith.constant 6.250000e-02 : f32
    %144 = vector.broadcast %cst_99 : f32 to vector<8x64xf32>
    %145 = arith.mulf %143, %144 : vector<8x64xf32>
    %cst_100 = arith.constant dense<0xFF800000> : vector<8xf32>
    %146 = vector.multi_reduction <maximumf>, %145, %cst_100 [1] : vector<8x64xf32> to vector<8xf32>
    %147 = vector.shape_cast %146 : vector<8xf32> to vector<8x1xf32>
    %148 = vector.broadcast %147 : vector<8x1xf32> to vector<8x64xf32>
    %149 = arith.subf %145, %148 : vector<8x64xf32>
    %150 = math.exp %149 : vector<8x64xf32>
    %cst_101 = arith.constant dense<0.000000e+00> : vector<8xf32>
    %151 = vector.multi_reduction <add>, %150, %cst_101 [1] : vector<8x64xf32> to vector<8xf32>
    %152 = vector.shape_cast %151 : vector<8xf32> to vector<8x1xf32>
    %153 = vector.broadcast %152 : vector<8x1xf32> to vector<8x64xf32>
    %154 = arith.divf %150, %153 : vector<8x64xf32>
    %155 = arith.truncf %154 : vector<8x64xf32> to vector<8x64xbf16>
    %156 = arith.truncf %139 : vector<64x256xf32> to vector<64x256xbf16>
    %cst_102 = arith.constant dense<0.000000e+00> : vector<8x256xf32>
    %157 = tpu.matmul %155, %156, %cst_102 {dimension_numbers = #tpu.dot_dimension_numbers<[1], [0], [0], [1], [0, 0, 1, 1], [], []>} : vector<8x64xbf16>, vector<64x256xbf16>, vector<8x256xf32> -> vector<8x256xf32>
    %158 = arith.truncf %157 : vector<8x256xf32> to vector<8x256xbf16>
    %c0_103 = arith.constant 0 : index
    %c896_104 = arith.constant 896 : index
    %159 = vector.load %arg5[%c0_103, %c896_104] : memref<256x1152xbf16, #tpu.memory_space<vmem>>, vector<256x256xbf16>
    %cst_105 = arith.constant dense<0.000000e+00> : vector<8x256xf32>
    %160 = tpu.matmul %158, %159, %cst_105 {dimension_numbers = #tpu.dot_dimension_numbers<[1], [0], [0], [1], [0, 0, 1, 1], [], []>} : vector<8x256xbf16>, vector<256x256xbf16>, vector<8x256xf32> -> vector<8x256xf32>
    %c0_106 = arith.constant 0 : index
    %c896_107 = arith.constant 896 : index
    %161 = vector.load %arg6[%c0_106, %c896_107] : memref<1x1152xf32, #tpu.memory_space<vmem>>, vector<1x256xf32>
    %162 = vector.broadcast %161 : vector<1x256xf32> to vector<8x256xf32>
    %163 = arith.addf %160, %162 : vector<8x256xf32>
    %164 = arith.extf %119 : vector<8x256xbf16> to vector<8x256xf32>
    %165 = arith.addf %164, %163 : vector<8x256xf32>
    %166 = vector.extract_strided_slice %165 {offsets = [1, 0], sizes = [1, 256], strides = [1, 1]} : vector<8x256xf32> to vector<1x256xf32>
    %167 = arith.truncf %166 : vector<1x256xf32> to vector<1x256xbf16>
    %c0_108 = arith.constant 0 : index
    %c0_109 = arith.constant 0 : index
    %168 = vector.load %arg7[%c0_108, %c0_109] : memref<256x768xbf16, #tpu.memory_space<vmem>>, vector<256x256xbf16>
    %cst_110 = arith.constant dense<0.000000e+00> : vector<1x256xf32>
    %169 = tpu.matmul %167, %168, %cst_110 {dimension_numbers = #tpu.dot_dimension_numbers<[1], [0], [0], [1], [0, 0, 1, 1], [], []>} : vector<1x256xbf16>, vector<256x256xbf16>, vector<1x256xf32> -> vector<1x256xf32>
    %c0_111 = arith.constant 0 : index
    %c0_112 = arith.constant 0 : index
    %170 = vector.load %arg8[%c0_111, %c0_112] : memref<1x768xf32, #tpu.memory_space<vmem>>, vector<1x256xf32>
    %171 = arith.addf %169, %170 : vector<1x256xf32>
    %cst_113 = arith.constant 0.000000e+00 : f32
    %172 = vector.broadcast %cst_113 : f32 to vector<1x256xf32>
    %173 = arith.maximumf %171, %172 : vector<1x256xf32>
    %174 = arith.truncf %173 : vector<1x256xf32> to vector<1x256xbf16>
    %c0_114 = arith.constant 0 : index
    %c0_115 = arith.constant 0 : index
    %175 = vector.load %arg9[%c0_114, %c0_115] : memref<256x640xbf16, #tpu.memory_space<vmem>>, vector<256x128xbf16>
    %cst_116 = arith.constant dense<0.000000e+00> : vector<1x128xf32>
    %176 = tpu.matmul %174, %175, %cst_116 {dimension_numbers = #tpu.dot_dimension_numbers<[1], [0], [0], [1], [0, 0, 1, 1], [], []>} : vector<1x256xbf16>, vector<256x128xbf16>, vector<1x128xf32> -> vector<1x128xf32>
    %c0_117 = arith.constant 0 : index
    %c0_118 = arith.constant 0 : index
    %177 = vector.load %arg10[%c0_117, %c0_118] : memref<1x640xf32, #tpu.memory_space<vmem>>, vector<1x128xf32>
    %178 = arith.addf %176, %177 : vector<1x128xf32>
    %179 = arith.truncf %178 : vector<1x128xf32> to vector<1x128xbf16>
    %180 = arith.truncf %140 : vector<64x128xf32> to vector<64x128xbf16>
    %cst_119 = arith.constant dense<0.000000e+00> : vector<1x64xf32>
    %181 = tpu.matmul %179, %180, %cst_119 {dimension_numbers = #tpu.dot_dimension_numbers<[1], [1], [0], [0], [0, 0, 1, 0], [], []>} : vector<1x128xbf16>, vector<64x128xbf16>, vector<1x64xf32> -> vector<1x64xf32>
    %c1_120 = arith.constant 1 : index
    %c0_121 = arith.constant 0 : index
    %c0_122 = arith.constant 0 : index
    %182 = vector.load %arg13[%c1_120, %c0_121, %c0_122] : memref<2x1x64xf32, #tpu.memory_space<vmem>>, vector<1x1x64xf32>
    %183 = vector.shape_cast %182 : vector<1x1x64xf32> to vector<1x64xf32>
    %184 = vector.shape_cast %181 : vector<1x64xf32> to vector<1x1x64xf32>
    tpu.vector_store %arg13[%c1_120, %c0_121, %c0_122], %184 {strides = array<i32>} : memref<2x1x64xf32, #tpu.memory_space<vmem>>, vector<1x1x64xf32>,
    %185 = vector.extract_strided_slice %165 {offsets = [0, 0], sizes = [1, 256], strides = [1, 1]} : vector<8x256xf32> to vector<1x256xf32>
    %186 = arith.truncf %185 : vector<1x256xf32> to vector<1x256xbf16>
    %c0_123 = arith.constant 0 : index
    %c256_124 = arith.constant 256 : index
    %187 = vector.load %arg7[%c0_123, %c256_124] : memref<256x768xbf16, #tpu.memory_space<vmem>>, vector<256x256xbf16>
    %cst_125 = arith.constant dense<0.000000e+00> : vector<1x256xf32>
    %188 = tpu.matmul %186, %187, %cst_125 {dimension_numbers = #tpu.dot_dimension_numbers<[1], [0], [0], [1], [0, 0, 1, 1], [], []>} : vector<1x256xbf16>, vector<256x256xbf16>, vector<1x256xf32> -> vector<1x256xf32>
    %c0_126 = arith.constant 0 : index
    %c256_127 = arith.constant 256 : index
    %189 = vector.load %arg8[%c0_126, %c256_127] : memref<1x768xf32, #tpu.memory_space<vmem>>, vector<1x256xf32>
    %190 = arith.addf %188, %189 : vector<1x256xf32>
    %cst_128 = arith.constant 0.000000e+00 : f32
    %191 = vector.broadcast %cst_128 : f32 to vector<1x256xf32>
    %192 = arith.maximumf %190, %191 : vector<1x256xf32>
    %193 = arith.truncf %192 : vector<1x256xf32> to vector<1x256xbf16>
    %c0_129 = arith.constant 0 : index
    %c128_130 = arith.constant 128 : index
    %194 = vector.load %arg9[%c0_129, %c128_130] : memref<256x640xbf16, #tpu.memory_space<vmem>>, vector<256x128xbf16>
    %cst_131 = arith.constant dense<0.000000e+00> : vector<1x128xf32>
    %195 = tpu.matmul %193, %194, %cst_131 {dimension_numbers = #tpu.dot_dimension_numbers<[1], [0], [0], [1], [0, 0, 1, 1], [], []>} : vector<1x256xbf16>, vector<256x128xbf16>, vector<1x128xf32> -> vector<1x128xf32>
    %c0_132 = arith.constant 0 : index
    %c128_133 = arith.constant 128 : index
    %196 = vector.load %arg10[%c0_132, %c128_133] : memref<1x640xf32, #tpu.memory_space<vmem>>, vector<1x128xf32>
    %197 = arith.addf %195, %196 : vector<1x128xf32>
    %198 = vector.extract_strided_slice %197 {offsets = [0, 0], sizes = [1, 4], strides = [1, 1]} : vector<1x128xf32> to vector<1x4xf32>
    %c1_134 = arith.constant 1 : index
    %c0_135 = arith.constant 0 : index
    %c0_136 = arith.constant 0 : index
    %199 = vector.load %arg14[%c1_134, %c0_135, %c0_136] : memref<2x1x4xf32, #tpu.memory_space<vmem>>, vector<1x1x4xf32>
    %200 = vector.shape_cast %199 : vector<1x1x4xf32> to vector<1x4xf32>
    %201 = vector.shape_cast %198 : vector<1x4xf32> to vector<1x1x4xf32>
    tpu.vector_store %arg14[%c1_134, %c0_135, %c0_136], %201 {strides = array<i32>} : memref<2x1x4xf32, #tpu.memory_space<vmem>>, vector<1x1x4xf32>,
    %202 = vector.extract_strided_slice %119 {offsets = [5, 0], sizes = [3, 256], strides = [1, 1]} : vector<8x256xbf16> to vector<3x256xbf16>
    %c0_137 = arith.constant 0 : index
    %c512_138 = arith.constant 512 : index
    %203 = vector.load %arg7[%c0_137, %c512_138] : memref<256x768xbf16, #tpu.memory_space<vmem>>, vector<256x256xbf16>
    %cst_139 = arith.constant dense<0.000000e+00> : vector<3x256xf32>
    %204 = tpu.matmul %202, %203, %cst_139 {dimension_numbers = #tpu.dot_dimension_numbers<[1], [0], [0], [1], [0, 0, 1, 1], [], []>} : vector<3x256xbf16>, vector<256x256xbf16>, vector<3x256xf32> -> vector<3x256xf32>
    %c0_140 = arith.constant 0 : index
    %c512_141 = arith.constant 512 : index
    %205 = vector.load %arg8[%c0_140, %c512_141] : memref<1x768xf32, #tpu.memory_space<vmem>>, vector<1x256xf32>
    %206 = vector.broadcast %205 : vector<1x256xf32> to vector<3x256xf32>
    %207 = arith.addf %204, %206 : vector<3x256xf32>
    %cst_142 = arith.constant 0.000000e+00 : f32
    %208 = vector.broadcast %cst_142 : f32 to vector<3x256xf32>
    %209 = arith.maximumf %207, %208 : vector<3x256xf32>
    %210 = arith.truncf %209 : vector<3x256xf32> to vector<3x256xbf16>
    %c0_143 = arith.constant 0 : index
    %c256_144 = arith.constant 256 : index
    %211 = vector.load %arg9[%c0_143, %c256_144] : memref<256x640xbf16, #tpu.memory_space<vmem>>, vector<256x256xbf16>
    %cst_145 = arith.constant dense<0.000000e+00> : vector<3x256xf32>
    %212 = tpu.matmul %210, %211, %cst_145 {dimension_numbers = #tpu.dot_dimension_numbers<[1], [0], [0], [1], [0, 0, 1, 1], [], []>} : vector<3x256xbf16>, vector<256x256xbf16>, vector<3x256xf32> -> vector<3x256xf32>
    %c0_146 = arith.constant 0 : index
    %c256_147 = arith.constant 256 : index
    %213 = vector.load %arg10[%c0_146, %c256_147] : memref<1x640xf32, #tpu.memory_space<vmem>>, vector<1x256xf32>
    %214 = vector.broadcast %213 : vector<1x256xf32> to vector<3x256xf32>
    %215 = arith.addf %212, %214 : vector<3x256xf32>
    %216 = arith.truncf %215 : vector<3x256xf32> to vector<3x256xbf16>
    %c0_148 = arith.constant 0 : index
    %c512_149 = arith.constant 512 : index
    %217 = vector.load %arg9[%c0_148, %c512_149] : memref<256x640xbf16, #tpu.memory_space<vmem>>, vector<256x128xbf16>
    %cst_150 = arith.constant dense<0.000000e+00> : vector<3x128xf32>
    %218 = tpu.matmul %216, %217, %cst_150 {dimension_numbers = #tpu.dot_dimension_numbers<[1], [0], [0], [1], [0, 0, 1, 1], [], []>} : vector<3x256xbf16>, vector<256x128xbf16>, vector<3x128xf32> -> vector<3x128xf32>
    %c0_151 = arith.constant 0 : index
    %c512_152 = arith.constant 512 : index
    %219 = vector.load %arg10[%c0_151, %c512_152] : memref<1x640xf32, #tpu.memory_space<vmem>>, vector<1x128xf32>
    %220 = vector.broadcast %219 : vector<1x128xf32> to vector<3x128xf32>
    %221 = arith.addf %218, %220 : vector<3x128xf32>
    %cst_153 = arith.constant 0.000000e+00 : f32
    %222 = vector.broadcast %cst_153 : f32 to vector<3x128xf32>
    %223 = arith.maximumf %221, %222 : vector<3x128xf32>
    %224 = arith.truncf %223 : vector<3x128xf32> to vector<3x128xbf16>
    %c0_154 = arith.constant 0 : index
    %c0_155 = arith.constant 0 : index
    %225 = vector.load %arg11[%c0_154, %c0_155] : memref<128x4xbf16, #tpu.memory_space<vmem>>, vector<128x4xbf16>
    %cst_156 = arith.constant dense<0.000000e+00> : vector<3x4xf32>
    %226 = tpu.matmul %224, %225, %cst_156 {dimension_numbers = #tpu.dot_dimension_numbers<[1], [0], [0], [1], [0, 0, 1, 1], [], []>} : vector<3x128xbf16>, vector<128x4xbf16>, vector<3x4xf32> -> vector<3x4xf32>
    %c0_157 = arith.constant 0 : index
    %c0_158 = arith.constant 0 : index
    %227 = vector.load %arg12[%c0_157, %c0_158] : memref<1x4xf32, #tpu.memory_space<vmem>>, vector<1x4xf32>
    %228 = vector.broadcast %227 : vector<1x4xf32> to vector<3x4xf32>
    %229 = arith.addf %226, %228 : vector<3x4xf32>
    %c1_159 = arith.constant 1 : index
    %c0_160 = arith.constant 0 : index
    %c0_161 = arith.constant 0 : index
    %230 = vector.load %arg15[%c1_159, %c0_160, %c0_161] : memref<2x3x4xf32, #tpu.memory_space<vmem>>, vector<1x3x4xf32>
    %231 = vector.shape_cast %230 : vector<1x3x4xf32> to vector<3x4xf32>
    %232 = vector.shape_cast %229 : vector<3x4xf32> to vector<1x3x4xf32>
    tpu.vector_store %arg15[%c1_159, %c0_160, %c0_161], %232 {strides = array<i32>} : memref<2x3x4xf32, #tpu.memory_space<vmem>>, vector<1x3x4xf32>,
    return
  }
  func.func @transform_0(%arg0: i32) -> (i32, i32, i32) {
    %c0_i32 = arith.constant 0 : i32
    %c0_i32_0 = arith.constant 0 : i32
    %c0_i32_1 = arith.constant 0 : i32
    return %arg0, %c0_i32, %c0_i32_0 : i32, i32, i32
  }
  func.func @transform_1(%arg0: i32) -> (i32, i32, i32) {
    %c0_i32 = arith.constant 0 : i32
    %c0_i32_0 = arith.constant 0 : i32
    %c0_i32_1 = arith.constant 0 : i32
    return %arg0, %c0_i32, %c0_i32_0 : i32, i32, i32
  }
  func.func @transform_2(%arg0: i32) -> (i32, i32) {
    %c0_i32 = arith.constant 0 : i32
    %c0_i32_0 = arith.constant 0 : i32
    %c0_i32_1 = arith.constant 0 : i32
    return %c0_i32, %c0_i32_0 : i32, i32
  }
  func.func @transform_3(%arg0: i32) -> (i32, i32) {
    %c0_i32 = arith.constant 0 : i32
    %c0_i32_0 = arith.constant 0 : i32
    %c0_i32_1 = arith.constant 0 : i32
    return %c0_i32, %c0_i32_0 : i32, i32
  }
  func.func @transform_4(%arg0: i32) -> (i32, i32) {
    %c0_i32 = arith.constant 0 : i32
    %c0_i32_0 = arith.constant 0 : i32
    %c0_i32_1 = arith.constant 0 : i32
    return %c0_i32, %c0_i32_0 : i32, i32
  }
  func.func @transform_5(%arg0: i32) -> (i32, i32) {
    %c0_i32 = arith.constant 0 : i32
    %c0_i32_0 = arith.constant 0 : i32
    %c0_i32_1 = arith.constant 0 : i32
    return %c0_i32, %c0_i32_0 : i32, i32
  }
  func.func @transform_6(%arg0: i32) -> (i32, i32) {
    %c0_i32 = arith.constant 0 : i32
    %c0_i32_0 = arith.constant 0 : i32
    %c0_i32_1 = arith.constant 0 : i32
    return %c0_i32, %c0_i32_0 : i32, i32
  }
  func.func @transform_7(%arg0: i32) -> (i32, i32) {
    %c0_i32 = arith.constant 0 : i32
    %c0_i32_0 = arith.constant 0 : i32
    %c0_i32_1 = arith.constant 0 : i32
    return %c0_i32, %c0_i32_0 : i32, i32
  }
  func.func @transform_8(%arg0: i32) -> (i32, i32) {
    %c0_i32 = arith.constant 0 : i32
    %c0_i32_0 = arith.constant 0 : i32
    %c0_i32_1 = arith.constant 0 : i32
    return %c0_i32, %c0_i32_0 : i32, i32
  }
  func.func @transform_9(%arg0: i32) -> (i32, i32) {
    %c0_i32 = arith.constant 0 : i32
    %c0_i32_0 = arith.constant 0 : i32
    %c0_i32_1 = arith.constant 0 : i32
    return %c0_i32, %c0_i32_0 : i32, i32
  }
  func.func @transform_10(%arg0: i32) -> (i32, i32) {
    %c0_i32 = arith.constant 0 : i32
    %c0_i32_0 = arith.constant 0 : i32
    %c0_i32_1 = arith.constant 0 : i32
    return %c0_i32, %c0_i32_0 : i32, i32
  }
  func.func @transform_11(%arg0: i32) -> (i32, i32) {
    %c0_i32 = arith.constant 0 : i32
    %c0_i32_0 = arith.constant 0 : i32
    %c0_i32_1 = arith.constant 0 : i32
    return %c0_i32, %c0_i32_0 : i32, i32
  }
  func.func @transform_12(%arg0: i32) -> (i32, i32, i32) {
    %c0_i32 = arith.constant 0 : i32
    %c0_i32_0 = arith.constant 0 : i32
    %c0_i32_1 = arith.constant 0 : i32
    return %arg0, %c0_i32, %c0_i32_0 : i32, i32, i32
  }
  func.func @transform_13(%arg0: i32) -> (i32, i32, i32) {
    %c0_i32 = arith.constant 0 : i32
    %c0_i32_0 = arith.constant 0 : i32
    %c0_i32_1 = arith.constant 0 : i32
    return %arg0, %c0_i32, %c0_i32_0 : i32, i32, i32
  }
  func.func @transform_14(%arg0: i32) -> (i32, i32, i32) {
    %c0_i32 = arith.constant 0 : i32
    %c0_i32_0 = arith.constant 0 : i32
    %c0_i32_1 = arith.constant 0 : i32
    return %arg0, %c0_i32, %c0_i32_0 : i32, i32, i32
  }
}

</mosaic_0001>

<bundles_post_ra>
// kernel: sam_fine_tuner_forward.2
= control target key start
LH: loop header
LB: loop body
LE: loop exit
PB: predicated region body
PF: predicated region fallthrough
CT: control target
= control target key end

     0   :  { %v451_v1 = vmov 0   ;;  %vm119_vm0 = vcmask 392192   ;;  %v39_v15 = vlaneseq  ;;  %s609_s1 = inlined_call_operand.vmem [shape: bf16[48,256], index: 1, kind: input, shape index: {}]   ;;  %s610_s0 = inlined_call_operand.vmem [shape: bf16[128,48], index: 0, kind: input, shape index: {}]   ;;  %s611_s2 = inlined_call_operand.vmem [shape: f32[1,256], index: 2, kind: input, shape index: {}]   ;;  %s612_s3 = inlined_call_operand.vmem [shape: bf16[128,256], index: 3, kind: output, shape index: {}]  }
   0x1   :  { %v434_v0 = vld [vmem:[%s609_s1 + $0x4] ss:$8 sps:$4 sm:$0xff]   ;;  %176 = vmatprep.mubr.bf16.mxu0 %v451_v1  ;;  %216 = vmatprep.mubr.bf16.mxu1 %v451_v1  ;;  %v436_v2 = vld [vmem:[%s609_s1] ss:$8 sps:$4 sm:$0xff]   ;;  %v437_v3 = vld [vmem:[%s609_s1 + $0x14] ss:$8 sps:$4 sm:$0xff]  }
   0x2   :  { %144 = vmatprep.subr.bf16.mxu0 %v434_v0  ;;  %427 = vmatprep.subr.bf16.mxu1 %v434_v0  ;;  %v439_v4 = vld [vmem:[%s609_s1 + $0x10] ss:$8 sps:$4 sm:$0xff]   ;;  %v440_v5 = vld [vmem:[%s609_s1 + $0x24] ss:$8 sps:$4 sm:$0xff]   ;;  %v442_v6 = vld [vmem:[%s609_s1 + $0x20] ss:$8 sps:$4 sm:$0xff]  }
   0x3   :  { %145 = vmatpush1.bf16.msra.mxu0 %v436_v2  ;;  %430 = vmatpush1.bf16.msra.mxu1 %v436_v2  ;;  %v443_v7 = vld [vmem:[%s610_s0] sm:$0xff]   ;;  %v445_v9 = vld [vmem:[%s610_s0 + $0x8] sm:$0xff]   ;;  %v447_v11 = vld [vmem:[%s610_s0 + $0x10] sm:$0xff]   ;;  %v40_v16 = vshrl.u32 %v39_v15, 7 }
   0x4   :  { %146 = vmatprep.subr.bf16.mxu0 %v437_v3  ;;  %428 = vmatprep.subr.bf16.mxu1 %v437_v3  ;;  %v444_v8 = vld [vmem:[%s610_s0 + $0x20] sm:$0xff]   ;;  %v446_v10 = vld [vmem:[%s610_s0 + $0x28] sm:$0xff]   ;;  %v448_v12 = vld [vmem:[%s610_s0 + $0x30] sm:$0xff]  }
   0x5   :  { %v449_v13 = vld [vmem:[%s610_s0 + $0x18] sm:$0xff]   ;;  %v41_v17 = vsub.s32 0, %v40_v16  ;;  %v37_v18 = vld [vmem:[%s611_s2] sm:$0x3]  ;;  %v45_v19 = vsub.s32 1, %v40_v16 }
   0x6   :  { %v450_v14 = vld [vmem:[%s610_s0 + $0x38] sm:$0xff]  }
   0x7   :  { %147 = vmatpush1.bf16.msra.mxu0 %v439_v4  ;;  %431 = vmatpush1.bf16.msra.mxu1 %v439_v4  ;;  %v525_v20 = vrot.slane %v37_v18, %v41_v17  ;;  %v527_v21 = vrot.slane %v37_v18, %v45_v19 }
   0x8   :  { %148 = vmatprep.subr.bf16.mxu0 %v440_v5  ;;  %429 = vmatprep.subr.bf16.mxu1 %v440_v5 }
   0xb   :  { %149 = vmatpush1.bf16.msra.mxu0 %v442_v6  ;;  %432 = vmatpush1.bf16.msra.mxu1 %v442_v6 }
   0xe   :  { %387 = vmatmul.mubr.msk.bf16.vlgmr.msra.gmra.mrb[0].mxu0 %vm119_vm0, %v443_v7  ;;  %391 = vmatmul.mubr.msk.bf16.vlgmr.msra.gmra.mrb[0].mxu1 %vm119_vm0, %v444_v8 }
   0xf   :  { %186 = vmatprep.mubr.bf16.mxu0 %v451_v1  ;;  %226 = vmatprep.mubr.bf16.mxu1 %v451_v1 }
  0x16   :  { %388 = vmatmul.mubr.msk.bf16.gmra.mrb[4].mxu0 %vm119_vm0, %v445_v9  ;;  %392 = vmatmul.mubr.msk.bf16.gmra.mrb[4].mxu1 %vm119_vm0, %v446_v10 }
  0x17   :  { %196 = vmatprep.mubr.bf16.mxu0 %v451_v1  ;;  %236 = vmatprep.mubr.bf16.mxu1 %v451_v1 }
  0x1e   :  { %389 = vmatmul.mubr.msk.bf16.gmra.mrb[8].mxu0 %vm119_vm0, %v447_v11  ;;  %393 = vmatmul.mubr.msk.bf16.gmra.mrb[8].mxu1 %vm119_vm0, %v448_v12 }
  0x1f   :  { %206 = vmatprep.mubr.bf16.mxu0 %v451_v1  ;;  %246 = vmatprep.mubr.bf16.mxu1 %v451_v1 }
  0x26   :  { %390 = vmatmul.mubr.msk.bf16.gmra.mrb[12].mxu0 %vm119_vm0, %v449_v13  ;;  %394 = vmatmul.mubr.msk.bf16.gmra.mrb[12].mxu1 %vm119_vm0, %v450_v14 }
  0xe1   :  { %v178_v22 = vpop.f32.mrb[0].mxu0  ;;  %v218_v23 = vpop.f32.mrb[0].mxu1 }
  0xe2   :  { %v179_v24 = vadd.f32 %v178_v22, %v525_v20  ;;  %v219_v25 = vadd.f32 %v218_v23, %v525_v20  ;;  %v180_v26 = vpop.f32.mrb[1].mxu0  ;;  %v220_v27 = vpop.f32.mrb[1].mxu1 }
  0xe3   :  { %v181_v28 = vadd.f32 %v180_v26, %v527_v21  ;;  %v221_v29 = vadd.f32 %v220_v27, %v527_v21  ;;  %v182_v30 = vpop.f32.mrb[2].mxu0  ;;  %v222_v31 = vpop.f32.mrb[2].mxu1 }
  0xe4   :  { %v183_v32 = vadd.f32 %v182_v30, %v525_v20  ;;  %v223_v33 = vadd.f32 %v222_v31, %v525_v20  ;;  %v184_v34 = vpop.f32.mrb[3].mxu0  ;;  %v224_v35 = vpop.f32.mrb[3].mxu1 }
  0xe5   :  { %v411_v36 = vpack.c.bf16 %v181_v28, %v179_v24  ;;  %v419_v37 = vpack.c.bf16 %v221_v29, %v219_v25  ;;  %v185_v38 = vadd.f32 %v184_v34, %v527_v21  ;;  %v225_v39 = vadd.f32 %v224_v35, %v527_v21 }
  0xe7   :  { %353 = vst [vmem:[%s612_s3] sm:$0xff] %v411_v36  ;;  %361 = vst [vmem:[%s612_s3 + $0x40] sm:$0xff] %v419_v37  ;;  %v412_v40 = vpack.c.bf16 %v185_v38, %v183_v32  ;;  %v420_v41 = vpack.c.bf16 %v225_v39, %v223_v33 }
  0xe9   :  { %354 = vst [vmem:[%s612_s3 + $0x8] sm:$0xff] %v412_v40  ;;  %362 = vst [vmem:[%s612_s3 + $0x48] sm:$0xff] %v420_v41  ;;  %v188_v42 = vpop.f32.mrb[4].mxu0  ;;  %v228_v43 = vpop.f32.mrb[4].mxu1 }
  0xea   :  { %v189_v44 = vadd.f32 %v188_v42, %v525_v20  ;;  %v229_v45 = vadd.f32 %v228_v43, %v525_v20  ;;  %v190_v46 = vpop.f32.mrb[5].mxu0  ;;  %v230_v47 = vpop.f32.mrb[5].mxu1 }
  0xeb   :  { %v191_v48 = vadd.f32 %v190_v46, %v527_v21  ;;  %v231_v49 = vadd.f32 %v230_v47, %v527_v21  ;;  %v192_v50 = vpop.f32.mrb[6].mxu0  ;;  %v232_v51 = vpop.f32.mrb[6].mxu1 }
  0xec   :  { %v193_v52 = vadd.f32 %v192_v50, %v525_v20  ;;  %v233_v53 = vadd.f32 %v232_v51, %v525_v20  ;;  %v194_v54 = vpop.f32.mrb[7].mxu0  ;;  %v234_v55 = vpop.f32.mrb[7].mxu1 }
  0xed   :  { %v413_v56 = vpack.c.bf16 %v191_v48, %v189_v44  ;;  %v421_v57 = vpack.c.bf16 %v231_v49, %v229_v45  ;;  %v195_v58 = vadd.f32 %v194_v54, %v527_v21  ;;  %v235_v59 = vadd.f32 %v234_v55, %v527_v21 }
  0xef   :  { %355 = vst [vmem:[%s612_s3 + $0x10] sm:$0xff] %v413_v56  ;;  %363 = vst [vmem:[%s612_s3 + $0x50] sm:$0xff] %v421_v57  ;;  %v414_v60 = vpack.c.bf16 %v195_v58, %v193_v52  ;;  %v422_v61 = vpack.c.bf16 %v235_v59, %v233_v53 }
  0xf1   :  { %356 = vst [vmem:[%s612_s3 + $0x18] sm:$0xff] %v414_v60  ;;  %364 = vst [vmem:[%s612_s3 + $0x58] sm:$0xff] %v422_v61  ;;  %v198_v62 = vpop.f32.mrb[8].mxu0  ;;  %v238_v63 = vpop.f32.mrb[8].mxu1 }
  0xf2   :  { %v199_v0 = vadd.f32 %v198_v62, %v525_v20  ;;  %v239_v1 = vadd.f32 %v238_v63, %v525_v20  ;;  %v200_v2 = vpop.f32.mrb[9].mxu0  ;;  %v240_v3 = vpop.f32.mrb[9].mxu1 }
  0xf3   :  { %v201_v4 = vadd.f32 %v200_v2, %v527_v21  ;;  %v241_v5 = vadd.f32 %v240_v3, %v527_v21  ;;  %v202_v6 = vpop.f32.mrb[10].mxu0  ;;  %v242_v7 = vpop.f32.mrb[10].mxu1 }
  0xf4   :  { %v203_v8 = vadd.f32 %v202_v6, %v525_v20  ;;  %v243_v9 = vadd.f32 %v242_v7, %v525_v20  ;;  %v204_v10 = vpop.f32.mrb[11].mxu0  ;;  %v244_v11 = vpop.f32.mrb[11].mxu1 }
  0xf5   :  { %v415_v12 = vpack.c.bf16 %v201_v4, %v199_v0  ;;  %v423_v13 = vpack.c.bf16 %v241_v5, %v239_v1  ;;  %v205_v14 = vadd.f32 %v204_v10, %v527_v21  ;;  %v245_v15 = vadd.f32 %v244_v11, %v527_v21 }
  0xf7   :  { %357 = vst [vmem:[%s612_s3 + $0x20] sm:$0xff] %v415_v12  ;;  %365 = vst [vmem:[%s612_s3 + $0x60] sm:$0xff] %v423_v13  ;;  %v416_v16 = vpack.c.bf16 %v205_v14, %v203_v8  ;;  %v424_v17 = vpack.c.bf16 %v245_v15, %v243_v9 }
  0xf9   :  { %358 = vst [vmem:[%s612_s3 + $0x28] sm:$0xff] %v416_v16  ;;  %366 = vst [vmem:[%s612_s3 + $0x68] sm:$0xff] %v424_v17  ;;  %v208_v18 = vpop.f32.mrb[12].mxu0  ;;  %v248_v19 = vpop.f32.mrb[12].mxu1 }
  0xfa   :  { %v209_v22 = vadd.f32 %v208_v18, %v525_v20  ;;  %v249_v23 = vadd.f32 %v248_v19, %v525_v20  ;;  %v210_v24 = vpop.f32.mrb[13].mxu0  ;;  %v250_v25 = vpop.f32.mrb[13].mxu1 }
  0xfb   :  { %v211_v26 = vadd.f32 %v210_v24, %v527_v21  ;;  %v251_v27 = vadd.f32 %v250_v25, %v527_v21  ;;  %v212_v28 = vpop.f32.mrb[14].mxu0  ;;  %v252_v29 = vpop.f32.mrb[14].mxu1 }
  0xfc   :  { %v213_v30 = vadd.f32 %v212_v28, %v525_v20  ;;  %v253_v31 = vadd.f32 %v252_v29, %v525_v20  ;;  %v214_v32 = vpop.f32.mrb[15].mxu0  ;;  %v254_v33 = vpop.f32.mrb[15].mxu1 }
  0xfd   :  { %v417_v34 = vpack.c.bf16 %v211_v26, %v209_v22  ;;  %v425_v35 = vpack.c.bf16 %v251_v27, %v249_v23  ;;  %v215_v36 = vadd.f32 %v214_v32, %v527_v21  ;;  %v255_v37 = vadd.f32 %v254_v33, %v527_v21 }
  0xff   :  { %359 = vst [vmem:[%s612_s3 + $0x30] sm:$0xff] %v417_v34  ;;  %367 = vst [vmem:[%s612_s3 + $0x70] sm:$0xff] %v425_v35  ;;  %v418_v38 = vpack.c.bf16 %v215_v36, %v213_v30  ;;  %v426_v39 = vpack.c.bf16 %v255_v37, %v253_v31 }
 0x101   :  { %360 = vst [vmem:[%s612_s3 + $0x38] sm:$0xff] %v418_v38  ;;  %368 = vst [vmem:[%s612_s3 + $0x78] sm:$0xff] %v426_v39 }

// kernel: custom-call
= control target key start
LH: loop header
LB: loop body
LE: loop exit
PB: predicated region body
PF: predicated region fallthrough
CT: control target
= control target key end

     0   :  { %s6_s0 = inlined_call_operand.vmem [shape: f32[1152], index: 0, kind: output, shape index: {}]  }

// kernel: sam_fine_tuner_forward.3
= control target key start
LH: loop header
LB: loop body
LE: loop exit
PB: predicated region body
PF: predicated region fallthrough
CT: control target
= control target key end

     0   :  { %v385_v55 = vlaneseq  ;;  %vm1488_vm0 = vcmask 523264   ;;  %vm8626_vm1 = vmmov 0   ;;  %vm2277_vm2 = vcmask 516096   ;;  %s11401_s4 = inlined_call_operand.vmem [shape: bf16[256,1152], index: 4, kind: input, shape index: {}]   ;;  %s11402_s2 = inlined_call_operand.vmem [shape: bf16[64,256], index: 2, kind: input, shape index: {}]   ;;  %s11403_s0 = inlined_call_operand.vmem [shape: bf16[2,8,256], index: 0, kind: input, shape index: {}]   ;;  %s11404_s1 = inlined_call_operand.vmem [shape: bf16[2,64,256], index: 1, kind: input, shape index: {}]   ;;  %s11405_s3 = inlined_call_operand.vmem [shape: f32[1,256], index: 3, kind: input, shape index: {}]   ;;  %s11406_s5 = inlined_call_operand.vmem [shape: f32[1,1152], index: 5, kind: input, shape index: {}]   ;;  %s11407_s6 = inlined_call_operand.vmem [shape: bf16[256,768], index: 6, kind: input, shape index: {}]   ;;  %s11408_s8 = inlined_call_operand.vmem [shape: bf16[256,640], index: 8, kind: input, shape index: {}]   ;;  %s11409_s7 = inlined_call_operand.vmem [shape: f32[1,768], index: 7, kind: input, shape index: {}]   ;;  %s11410_s9 = inlined_call_operand.vmem [shape: f32[1,640], index: 9, kind: input, shape index: {}]   ;;  %s11411_s12 = inlined_call_operand.vmem [shape: f32[2,1,64], index: 12, kind: output, shape index: {0}]   ;;  %s11412_s13 = inlined_call_operand.vmem [shape: f32[2,1,4], index: 13, kind: output, shape index: {1}]   ;;  %s11413_s10 = inlined_call_operand.vmem [shape: bf16[128,4], index: 10, kind: input, shape index: {}]   ;;  %s11414_s11 = inlined_call_operand.vmem [shape: f32[1,4], index: 11, kind: input, shape index: {}]   ;;  %s11415_s14 = inlined_call_operand.vmem [shape: f32[2,3,4], index: 14, kind: output, shape index: {2}]  }
   0x1   :  { %v8705_v0 = vld [vmem:[%s11401_s4 + $0xc] ss:$36 sps:$4 sm:$0xff]   ;;  %v8716_v2 = vld [vmem:[%s11401_s4 + $0x54] ss:$36 sps:$4 sm:$0xff]   ;;  %v8728_v4 = vld [vmem:[%s11401_s4 + $0x9c] ss:$36 sps:$4 sm:$0xff]  }
   0x2   :  { %v8710_v1 = vld [vmem:[%s11401_s4 + $0x8] ss:$36 sps:$4 sm:$0xff]   ;;  %285 = vmatprep.subr.bf16.mxu0 %v8705_v0  ;;  %v8722_v3 = vld [vmem:[%s11401_s4 + $0x50] ss:$36 sps:$4 sm:$0xff]   ;;  %v8734_v5 = vld [vmem:[%s11401_s4 + $0x98] ss:$36 sps:$4 sm:$0xff]  }
   0x3   :  { %286 = vmatpush1.bf16.msra.mxu0 %v8710_v1  ;;  %v8740_v6 = vld [vmem:[%s11401_s4 + $0xe4] ss:$36 sps:$4 sm:$0xff]   ;;  %v8752_v8 = vld [vmem:[%s11401_s4 + $0x12c] ss:$36 sps:$4 sm:$0xff]   ;;  %v8764_v10 = vld [vmem:[%s11401_s4 + $0x174] ss:$36 sps:$4 sm:$0xff]  }
   0x4   :  { %287 = vmatprep.subr.bf16.mxu0 %v8716_v2  ;;  %v8746_v7 = vld [vmem:[%s11401_s4 + $0xe0] ss:$36 sps:$4 sm:$0xff]   ;;  %v8758_v9 = vld [vmem:[%s11401_s4 + $0x128] ss:$36 sps:$4 sm:$0xff]   ;;  %v8770_v11 = vld [vmem:[%s11401_s4 + $0x170] ss:$36 sps:$4 sm:$0xff]  }
   0x5   :  { %v8776_v12 = vld [vmem:[%s11401_s4 + $0x1bc] ss:$36 sps:$4 sm:$0xff]   ;;  %v7736_v14 = vld [vmem:[%s11402_s2 + $0x4] ss:$8 sps:$4 sm:$0xff]   ;;  %v7746_v21 = vld [vmem:[%s11401_s4 + $0x94] ss:$36 sps:$4 sm:$0xff]  }
   0x6   :  { %v8781_v13 = vld [vmem:[%s11401_s4 + $0x1b8] ss:$36 sps:$4 sm:$0xff]   ;;  %v7737_v15 = vld [vmem:[%s11401_s4 + $0x4] ss:$36 sps:$4 sm:$0xff]   ;;  %317 = vmatprep.mubr.bf16.mxu0 %v7736_v14  ;;  %v7742_v18 = vld [vmem:[%s11401_s4 + $0x4c] ss:$36 sps:$4 sm:$0xff]  }
   0x7   :  { %288 = vmatpush1.bf16.msra.mxu0 %v8722_v3  ;;  %v7739_v16 = vld [vmem:[%s11401_s4] ss:$36 sps:$4 sm:$0xff]   ;;  %630 = vmatprep.subr.bf16.mxu1 %v7737_v15  ;;  %v7745_v19 = vld [vmem:[%s11401_s4 + $0x48] ss:$36 sps:$4 sm:$0xff]   ;;  %v7748_v23 = vld [vmem:[%s11401_s4 + $0x90] ss:$36 sps:$4 sm:$0xff]  }
   0x8   :  { %289 = vmatprep.subr.bf16.mxu0 %v8728_v4  ;;  %v8797_v17 = vld [vmem:[%s11401_s4 + $0x204] ss:$36 sps:$4 sm:$0xff]   ;;  %631 = vmatpush1.bf16.msra.mxu1 %v7739_v16  ;;  %v8818_v22 = vld [vmem:[%s11401_s4 + $0x24c] ss:$36 sps:$4 sm:$0xff]   ;;  %v7751_v25 = vld [vmem:[%s11401_s4 + $0xdc] ss:$36 sps:$4 sm:$0xff]  }
   0x9   :  { %v8809_v20 = vld [vmem:[%s11401_s4 + $0x200] ss:$36 sps:$4 sm:$0xff]   ;;  %632 = vmatprep.subr.bf16.mxu1 %v7742_v18  ;;  %v8827_v24 = vld [vmem:[%s11401_s4 + $0x248] ss:$36 sps:$4 sm:$0xff]   ;;  %v8836_v26 = vld [vmem:[%s11401_s4 + $0x294] ss:$36 sps:$4 sm:$0xff]  }
   0xa   :  { %v7754_v27 = vld [vmem:[%s11401_s4 + $0xd8] ss:$36 sps:$4 sm:$0xff]   ;;  %v8845_v28 = vld [vmem:[%s11401_s4 + $0x290] ss:$36 sps:$4 sm:$0xff]   ;;  %v7755_v29 = vld [vmem:[%s11401_s4 + $0x124] ss:$36 sps:$4 sm:$0xff]  }
   0xb   :  { %290 = vmatpush1.bf16.msra.mxu0 %v8734_v5  ;;  %v8854_v30 = vld [vmem:[%s11401_s4 + $0x2dc] ss:$36 sps:$4 sm:$0xff]   ;;  %v7760_v33 = vld [vmem:[%s11401_s4 + $0x16c] ss:$36 sps:$4 sm:$0xff]   ;;  %v8872_v34 = vld [vmem:[%s11401_s4 + $0x324] ss:$36 sps:$4 sm:$0xff]  }
   0xc   :  { %291 = vmatprep.subr.bf16.mxu0 %v8740_v6  ;;  %633 = vmatpush1.bf16.msra.mxu1 %v7745_v19  ;;  %v7757_v31 = vld [vmem:[%s11401_s4 + $0x120] ss:$36 sps:$4 sm:$0xff]   ;;  %v8863_v32 = vld [vmem:[%s11401_s4 + $0x2d8] ss:$36 sps:$4 sm:$0xff]   ;;  %v7763_v36 = vld [vmem:[%s11401_s4 + $0x168] ss:$36 sps:$4 sm:$0xff]  }
   0xd   :  { %634 = vmatprep.subr.bf16.mxu1 %v7746_v21  ;;  %v8877_v35 = vld [vmem:[%s11401_s4 + $0x320] ss:$36 sps:$4 sm:$0xff]   ;;  %v7764_v37 = vld [vmem:[%s11401_s4 + $0x1b4] ss:$36 sps:$4 sm:$0xff]   ;;  %v8890_v38 = vld [vmem:[%s11401_s4 + $0x36c] ss:$36 sps:$4 sm:$0xff]  }
   0xe   :  { %v7766_v39 = vld [vmem:[%s11401_s4 + $0x1b0] ss:$36 sps:$4 sm:$0xff]   ;;  %v8899_v40 = vld [vmem:[%s11401_s4 + $0x368] ss:$36 sps:$4 sm:$0xff]   ;;  %v7767_v41 = vld [vmem:[%s11401_s4 + $0x1fc] ss:$36 sps:$4 sm:$0xff]  }
   0xf   :  { %292 = vmatpush1.bf16.msra.mxu0 %v8746_v7  ;;  %v8908_v42 = vld [vmem:[%s11401_s4 + $0x3b4] ss:$36 sps:$4 sm:$0xff]   ;;  %v8918_v44 = vld [vmem:[%s11401_s4 + $0x3fc] ss:$36 sps:$4 sm:$0xff]   ;;  %v7770_v46 = vld [vmem:[%s11401_s4 + $0x244] ss:$36 sps:$4 sm:$0xff]  }
  0x10   :  { %293 = vmatprep.subr.bf16.mxu0 %v8752_v8  ;;  %635 = vmatpush1.bf16.msra.mxu1 %v7748_v23  ;;  %v8913_v43 = vld [vmem:[%s11401_s4 + $0x3b0] ss:$36 sps:$4 sm:$0xff]   ;;  %v7769_v45 = vld [vmem:[%s11401_s4 + $0x1f8] ss:$36 sps:$4 sm:$0xff]   ;;  %v8930_v47 = vld [vmem:[%s11403_s0] sm:$0xff]  ;;  %v8978_v60 = vshrl.u32 %v385_v55, 7 }
  0x11   :  { %636 = vmatprep.subr.bf16.mxu1 %v7751_v25  ;;  %v7772_v48 = vld [vmem:[%s11401_s4 + $0x240] ss:$36 sps:$4 sm:$0xff]   ;;  %v8938_v49 = vcombine.high %v8930_v47, %v8930_v47  ;;  %v8943_v50 = vld [vmem:[%s11401_s4 + $0x3f8] ss:$36 sps:$4 sm:$0xff]   ;;  %v7773_v51 = vld [vmem:[%s11401_s4 + $0x28c] ss:$36 sps:$4 sm:$0xff]  }
  0x12   :  { %v8951_v52 = vld [vmem:[%s11401_s4 + $0x444] ss:$36 sps:$4 sm:$0xff]   ;;  %v7776_v56 = vld [vmem:[%s11401_s4 + $0x2d4] ss:$36 sps:$4 sm:$0xff]   ;;  %v7779_v61 = vld [vmem:[%s11401_s4 + $0x31c] ss:$36 sps:$4 sm:$0xff]  }
  0x13   :  { %294 = vmatpush1.bf16.msra.mxu0 %v8758_v9  ;;  %662 = vmatprep.mubr.bf16.mxu1 %v8938_v49  ;;  %v7775_v53 = vld [vmem:[%s11401_s4 + $0x288] ss:$36 sps:$4 sm:$0xff]   ;;  %v8962_v54 = vld [vmem:[%s11401_s4 + $0x440] ss:$36 sps:$4 sm:$0xff]   ;;  %v7778_v58 = vld [vmem:[%s11401_s4 + $0x2d0] ss:$36 sps:$4 sm:$0xff]  }
  0x14   :  { %295 = vmatprep.subr.bf16.mxu0 %v8764_v10  ;;  %637 = vmatpush1.bf16.msra.mxu1 %v7754_v27  ;;  %v7734_v57 = vld [vmem:[%s11402_s2] ss:$8 sps:$4 sm:$0xff]   ;;  %v7740_v59 = vld [vmem:[%s11402_s2 + $0x14] ss:$8 sps:$4 sm:$0xff]   ;;  %v7744_v14 = vld [vmem:[%s11402_s2 + $0x10] ss:$8 sps:$4 sm:$0xff]  }
  0x15   :  { %638 = vmatprep.subr.bf16.mxu1 %v7755_v29  ;;  %v7781_v62 = vld [vmem:[%s11401_s4 + $0x318] ss:$36 sps:$4 sm:$0xff]   ;;  %v7782_v63 = vld [vmem:[%s11401_s4 + $0x364] ss:$36 sps:$4 sm:$0xff]   ;;  %v9028_v19 = vsub.s32 1, %v8978_v60  ;;  %vm2697_vm3 = vcmask 24576  }
  0x16   :  { %v7749_v15 = vld [vmem:[%s11402_s2 + $0x24] ss:$8 sps:$4 sm:$0xff]   ;;  %v7788_v16 = vld [vmem:[%s11401_s4 + $0x3f4] ss:$36 sps:$4 sm:$0xff]   ;;  %v7753_v21 = vld [vmem:[%s11402_s2 + $0x20] ss:$8 sps:$4 sm:$0xff]  }
  0x17   :  { %296 = vmatpush1.bf16.msra.mxu0 %v8770_v11  ;;  %v9016_v18 = vld [vmem:[%s11404_s1] sm:$0xff]  ;;  %v7790_v23 = vld [vmem:[%s11401_s4 + $0x3f0] ss:$36 sps:$4 sm:$0xff]   ;;  %vm3501_vm4 = vcmask 26624  }
  0x18   :  { %297 = vmatprep.subr.bf16.mxu0 %v8776_v12  ;;  %639 = vmatpush1.bf16.msra.mxu1 %v7757_v31  ;;  %v7758_v25 = vld [vmem:[%s11402_s2 + $0x34] ss:$8 sps:$4 sm:$0xff]  }
  0x19   :  { %640 = vmatprep.subr.bf16.mxu1 %v7760_v33  ;;  %v7793_v31 = vld [vmem:[%s11401_s4 + $0x438] ss:$36 sps:$4 sm:$0xff]  }
  0x1b   :  { %298 = vmatpush1.bf16.msra.mxu0 %v8781_v13 }
  0x1c   :  { %299 = vmatprep.subr.bf16.mxu0 %v8797_v17  ;;  %641 = vmatpush1.bf16.msra.mxu1 %v7763_v36  ;;  %v7762_v36 = vld [vmem:[%s11402_s2 + $0x30] ss:$8 sps:$4 sm:$0xff]  }
  0x1d   :  { %642 = vmatprep.subr.bf16.mxu1 %v7764_v37 }
  0x1f   :  { %300 = vmatpush1.bf16.msra.mxu0 %v8809_v20 }
  0x20   :  { %301 = vmatprep.subr.bf16.mxu0 %v8818_v22  ;;  %643 = vmatpush1.bf16.msra.mxu1 %v7766_v39 }
  0x21   :  { %644 = vmatprep.subr.bf16.mxu1 %v7767_v41 }
  0x23   :  { %302 = vmatpush1.bf16.msra.mxu0 %v8827_v24 }
  0x24   :  { %303 = vmatprep.subr.bf16.mxu0 %v8836_v26  ;;  %645 = vmatpush1.bf16.msra.mxu1 %v7769_v45  ;;  %v365_v45 = vld [vmem:[%s11404_s1 + $0x30] sm:$0xff] }
  0x25   :  { %646 = vmatprep.subr.bf16.mxu1 %v7770_v46  ;;  %v366_v46 = vld [vmem:[%s11404_s1 + $0x38] sm:$0xff] }
  0x26   :  { %v382_v55 = vunpack.c.h.bf16 %v366_v46 }
  0x27   :  { %304 = vmatpush1.bf16.msra.mxu0 %v8845_v28 }
  0x28   :  { %305 = vmatprep.subr.bf16.mxu0 %v8854_v30  ;;  %647 = vmatpush1.bf16.msra.mxu1 %v7772_v48 }
  0x29   :  { %648 = vmatprep.subr.bf16.mxu1 %v7773_v51 }
  0x2b   :  { %306 = vmatpush1.bf16.msra.mxu0 %v8863_v32 }
  0x2c   :  { %307 = vmatprep.subr.bf16.mxu0 %v8872_v34  ;;  %649 = vmatpush1.bf16.msra.mxu1 %v7775_v53 }
  0x2d   :  { %650 = vmatprep.subr.bf16.mxu1 %v7776_v56 }
  0x2f   :  { %308 = vmatpush1.bf16.msra.mxu0 %v8877_v35 }
  0x30   :  { %309 = vmatprep.subr.bf16.mxu0 %v8890_v38  ;;  %651 = vmatpush1.bf16.msra.mxu1 %v7778_v58 }
  0x31   :  { %652 = vmatprep.subr.bf16.mxu1 %v7779_v61 }
  0x33   :  { %310 = vmatpush1.bf16.msra.mxu0 %v8899_v40 }
  0x34   :  { %311 = vmatprep.subr.bf16.mxu0 %v8908_v42  ;;  %653 = vmatpush1.bf16.msra.mxu1 %v7781_v62  ;;  %v379_v62 = vunpack.c.l.bf16 %v365_v45 }
  0x35   :  { %654 = vmatprep.subr.bf16.mxu1 %v7782_v63  ;;  %v381_v63 = vunpack.c.l.bf16 %v366_v46 }
  0x37   :  { %312 = vmatpush1.bf16.msra.mxu0 %v8913_v43 }
  0x38   :  { %313 = vmatprep.subr.bf16.mxu0 %v8918_v44 }
  0x3b   :  { %314 = vmatpush1.bf16.msra.mxu0 %v8943_v50 }
  0x3c   :  { %315 = vmatprep.subr.bf16.mxu0 %v8951_v52 }
  0x3f   :  { %316 = vmatpush1.bf16.msra.mxu0 %v8962_v54 }
  0x40   :  { %1210 = vmatprep.subr.bf16.mxu0 %v8705_v0  ;;  %v7784_v0 = vld [vmem:[%s11401_s4 + $0x360] ss:$36 sps:$4 sm:$0xff]  }
  0x41   :  { %655 = vmatpush1.bf16.msra.mxu1 %v7784_v0 }
  0x42   :  { %318 = vmatmul.mubr.bf16.vlgmr.msra.gmra.mrb[0].mxu0 %v7734_v57 }
  0x43   :  { %1211 = vmatpush1.bf16.msra.mxu0 %v8710_v1  ;;  %327 = vmatprep.mubr.bf16.mxu0 %v7740_v59  ;;  %v7785_v1 = vld [vmem:[%s11401_s4 + $0x3ac] ss:$36 sps:$4 sm:$0xff]  }
  0x44   :  { %1212 = vmatprep.subr.bf16.mxu0 %v8716_v2  ;;  %v7787_v2 = vld [vmem:[%s11401_s4 + $0x3a8] ss:$36 sps:$4 sm:$0xff]   ;;  %656 = vmatprep.subr.bf16.mxu1 %v7785_v1 }
  0x45   :  { %657 = vmatpush1.bf16.msra.mxu1 %v7787_v2  ;;  %v7796_v2 = vld [vmem:[%s11401_s4 + $0x10] ss:$36 sps:$4 sm:$0xff]  }
  0x46   :  { %658 = vmatprep.subr.bf16.mxu1 %v7788_v16  ;;  %v7798_v16 = vld [vmem:[%s11401_s4 + $0x14] ss:$36 sps:$4 sm:$0xff]  }
  0x47   :  { %1213 = vmatpush1.bf16.msra.mxu0 %v8722_v3  ;;  %v9021_v3 = vld [vmem:[%s11404_s1 + $0x8] sm:$0xff] }
  0x48   :  { %1214 = vmatprep.subr.bf16.mxu0 %v8728_v4  ;;  %v383_v4 = vld [vmem:[%s11405_s3] sm:$0x3]  ;;  %v370_v27 = vunpack.c.h.bf16 %v9021_v3 }
  0x49   :  { %v9047_v29 = vrot.slane %v383_v4, %v9028_v19  ;;  %659 = vmatpush1.bf16.msra.mxu1 %v7790_v23  ;;  %v7807_v23 = vld [vmem:[%s11401_s4 + $0xec] ss:$36 sps:$4 sm:$0xff]  }
  0x4a   :  { %328 = vmatmul.mubr.bf16.gmra.mrb[4].mxu0 %v7744_v14 }
  0x4b   :  { %1215 = vmatpush1.bf16.msra.mxu0 %v8734_v5  ;;  %337 = vmatprep.mubr.bf16.mxu0 %v7749_v15  ;;  %v7791_v5 = vld [vmem:[%s11401_s4 + $0x43c] ss:$36 sps:$4 sm:$0xff]   ;;  %v398_v33 = vadd.f32 %v9047_v29, %v370_v27  ;;  %v410_v59 = vadd.f32 %v9047_v29, %v382_v55 }
  0x4c   :  { %1216 = vmatprep.subr.bf16.mxu0 %v8740_v6  ;;  %v368_v6 = vunpack.c.h.bf16 %v9016_v18  ;;  %660 = vmatprep.subr.bf16.mxu1 %v7791_v5  ;;  %v7810_v5 = vld [vmem:[%s11401_s4 + $0x134] ss:$36 sps:$4 sm:$0xff]   ;;  %v7813_v27 = vld [vmem:[%s11401_s4 + $0x17c] ss:$36 sps:$4 sm:$0xff]  }
  0x4d   :  { %661 = vmatpush1.bf16.msra.mxu1 %v7793_v31  ;;  %v7816_v31 = vld [vmem:[%s11401_s4 + $0x1c4] ss:$36 sps:$4 sm:$0xff]  }
  0x4e   :  { %1283 = vmatprep.subr.bf16.mxu1 %v7798_v16 }
  0x4f   :  { %1217 = vmatpush1.bf16.msra.mxu0 %v8746_v7  ;;  %v396_v7 = vadd.f32 %v9047_v29, %v368_v6  ;;  %v7808_v6 = vld [vmem:[%s11401_s4 + $0x130] ss:$36 sps:$4 sm:$0xff]  }
  0x50   :  { %1218 = vmatprep.subr.bf16.mxu0 %v8752_v8  ;;  %v9062_v8 = vcombine.low %v8930_v47, %v8930_v47 }
  0x52   :  { %338 = vmatmul.mubr.bf16.gmra.mrb[8].mxu0 %v7753_v21  ;;  %663 = vmatmul.mubr.bf16.vlgmr.msra.gmra.mrb[0].mxu1 %v9062_v8  ;;  %v7802_v21 = vld [vmem:[%s11401_s4 + $0xa0] ss:$36 sps:$4 sm:$0xff]  }
  0x53   :  { %1219 = vmatpush1.bf16.msra.mxu0 %v8758_v9  ;;  %347 = vmatprep.mubr.bf16.mxu0 %v7758_v25  ;;  %v9065_v9 = vpack.c.bf16 %v398_v33, %v396_v7  ;;  %v7805_v25 = vld [vmem:[%s11401_s4 + $0xe8] ss:$36 sps:$4 sm:$0xff]   ;;  %v7814_v7 = vld [vmem:[%s11401_s4 + $0x1c0] ss:$36 sps:$4 sm:$0xff]  }
  0x54   :  { %1220 = vmatprep.subr.bf16.mxu0 %v8764_v10  ;;  %v9080_v10 = vsub.s32 0, %v8978_v60  ;;  %1284 = vmatpush1.bf16.msra.mxu1 %v7796_v2  ;;  %v7819_v33 = vld [vmem:[%s11401_s4 + $0x20c] ss:$36 sps:$4 sm:$0xff]  }
  0x55   :  { %1315 = vmatprep.mubr.bf16.mxu1 %v9065_v9 }
  0x57   :  { %1221 = vmatpush1.bf16.msra.mxu0 %v8770_v11  ;;  %v361_v11 = vld [vmem:[%s11404_s1 + $0x10] sm:$0xff] }
  0x58   :  { %1222 = vmatprep.subr.bf16.mxu0 %v8776_v12  ;;  %v362_v12 = vld [vmem:[%s11404_s1 + $0x18] sm:$0xff] }
  0x59   :  { %v373_v39 = vunpack.c.l.bf16 %v362_v12 }
  0x5a   :  { %348 = vmatmul.mubr.bf16.gmra.mrb[12].mxu0 %v7762_v36  ;;  %v7817_v36 = vld [vmem:[%s11401_s4 + $0x208] ss:$36 sps:$4 sm:$0xff]  }
  0x5b   :  { %1223 = vmatpush1.bf16.msra.mxu0 %v8781_v13  ;;  %1242 = vmatprep.mubr.bf16.mxu0 %v9065_v9  ;;  %v367_v13 = vunpack.c.l.bf16 %v9016_v18  ;;  %v7801_v18 = vld [vmem:[%s11401_s4 + $0x5c] ss:$36 sps:$4 sm:$0xff]  }
  0x5c   :  { %1224 = vmatprep.subr.bf16.mxu0 %v8797_v17  ;;  %v369_v17 = vunpack.c.l.bf16 %v9021_v3  ;;  %v7799_v3 = vld [vmem:[%s11401_s4 + $0x58] ss:$36 sps:$4 sm:$0xff]   ;;  %1285 = vmatprep.subr.bf16.mxu1 %v7801_v18 }
  0x5d   :  { %1286 = vmatpush1.bf16.msra.mxu1 %v7799_v3 }
  0x5f   :  { %1225 = vmatpush1.bf16.msra.mxu0 %v8809_v20  ;;  %v388_v20 = vrot.slane %v383_v4, %v9080_v10  ;;  %v7804_v4 = vld [vmem:[%s11401_s4 + $0xa4] ss:$36 sps:$4 sm:$0xff]  }
  0x60   :  { %1226 = vmatprep.subr.bf16.mxu0 %v8818_v22  ;;  %v372_v22 = vunpack.c.h.bf16 %v361_v11  ;;  %1287 = vmatprep.subr.bf16.mxu1 %v7804_v4 }
  0x61   :  { %v407_v0 = vadd.f32 %v388_v20, %v379_v62  ;;  %v409_v15 = vadd.f32 %v388_v20, %v381_v63  ;;  %1288 = vmatpush1.bf16.msra.mxu1 %v7802_v21 }
  0x62   :  { %1289 = vmatprep.subr.bf16.mxu1 %v7807_v23  ;;  %v9287_v23 = vld [vmem:[%s11406_s5 + $0x2] sm:$0x1f] }
  0x63   :  { %1227 = vmatpush1.bf16.msra.mxu0 %v8827_v24  ;;  %v374_v24 = vunpack.c.h.bf16 %v362_v12  ;;  %v9138_v1 = vpack.c.bf16 %v409_v15, %v407_v0  ;;  %v7825_v12 = vld [vmem:[%s11401_s4 + $0x29c] ss:$36 sps:$4 sm:$0xff]  }
  0x64   :  { %1228 = vmatprep.subr.bf16.mxu0 %v8836_v26  ;;  %v395_v26 = vadd.f32 %v388_v20, %v367_v13  ;;  %v7823_v13 = vld [vmem:[%s11401_s4 + $0x298] ss:$36 sps:$4 sm:$0xff]  }
  0x65   :  { %1290 = vmatpush1.bf16.msra.mxu1 %v7805_v25  ;;  %v772_v25 = vrot.slane %v9287_v23, %v9080_v10 }
  0x66   :  { %1291 = vmatprep.subr.bf16.mxu1 %v7810_v5  ;;  %v776_v5 = vrot.slane %v9287_v23, %v9028_v19 }
  0x67   :  { %1229 = vmatpush1.bf16.msra.mxu0 %v8845_v28  ;;  %v397_v28 = vadd.f32 %v388_v20, %v369_v17  ;;  %v7828_v17 = vld [vmem:[%s11401_s4 + $0x2e4] ss:$36 sps:$4 sm:$0xff]  }
  0x68   :  { %1230 = vmatprep.subr.bf16.mxu0 %v8854_v30  ;;  %v363_v30 = vld [vmem:[%s11404_s1 + $0x20] sm:$0xff] }
  0x69   :  { %v9109_v37 = vpack.c.bf16 %v397_v28, %v395_v26  ;;  %v376_v41 = vunpack.c.h.bf16 %v363_v30  ;;  %v375_v51 = vunpack.c.l.bf16 %v363_v30  ;;  %1292 = vmatpush1.bf16.msra.mxu1 %v7808_v6  ;;  %v7834_v26 = vld [vmem:[%s11401_s4 + $0x374] ss:$36 sps:$4 sm:$0xff]   ;;  %v7837_v30 = vld [vmem:[%s11401_s4 + $0x3bc] ss:$36 sps:$4 sm:$0xff]  }
  0x6a   :  { %1293 = vmatprep.subr.bf16.mxu1 %v7813_v27  ;;  %v7832_v28 = vld [vmem:[%s11401_s4 + $0x370] ss:$36 sps:$4 sm:$0xff]  }
  0x6b   :  { %1231 = vmatpush1.bf16.msra.mxu0 %v8863_v32  ;;  %v364_v32 = vld [vmem:[%s11404_s1 + $0x28] sm:$0xff]  ;;  %v404_v47 = vadd.f32 %v9047_v29, %v376_v41  ;;  %v403_v56 = vadd.f32 %v388_v20, %v375_v51 }
  0x6c   :  { %1232 = vmatprep.subr.bf16.mxu0 %v8872_v34  ;;  %v400_v34 = vadd.f32 %v9047_v29, %v372_v22  ;;  %v7831_v22 = vld [vmem:[%s11401_s4 + $0x32c] ss:$36 sps:$4 sm:$0xff]  }
  0x6f   :  { %1233 = vmatpush1.bf16.msra.mxu0 %v8877_v35  ;;  %v402_v35 = vadd.f32 %v9047_v29, %v374_v24  ;;  %v7829_v24 = vld [vmem:[%s11401_s4 + $0x328] ss:$36 sps:$4 sm:$0xff]  }
  0x70   :  { %1234 = vmatprep.subr.bf16.mxu0 %v8890_v38  ;;  %v371_v38 = vunpack.c.l.bf16 %v361_v11  ;;  %v7820_v11 = vld [vmem:[%s11401_s4 + $0x250] ss:$36 sps:$4 sm:$0xff]  }
  0x73   :  { %1235 = vmatpush1.bf16.msra.mxu0 %v8899_v40  ;;  %v9112_v40 = vpack.c.bf16 %v402_v35, %v400_v34  ;;  %v7840_v34 = vld [vmem:[%s11401_s4 + $0x404] ss:$36 sps:$4 sm:$0xff]  }
  0x74   :  { %1236 = vmatprep.subr.bf16.mxu0 %v8908_v42  ;;  %v378_v42 = vunpack.c.h.bf16 %v364_v32  ;;  %v7838_v35 = vld [vmem:[%s11401_s4 + $0x400] ss:$36 sps:$4 sm:$0xff]  }
  0x76   :  { %v406_v48 = vadd.f32 %v9047_v29, %v378_v42 }
  0x77   :  { %1237 = vmatpush1.bf16.msra.mxu0 %v8913_v43  ;;  %v399_v43 = vadd.f32 %v388_v20, %v371_v38  ;;  %v7843_v38 = vld [vmem:[%s11401_s4 + $0x44c] ss:$36 sps:$4 sm:$0xff]  }
  0x78   :  { %1238 = vmatprep.subr.bf16.mxu0 %v8918_v44  ;;  %v401_v44 = vadd.f32 %v388_v20, %v373_v39  ;;  %v9126_v53 = vpack.c.bf16 %v406_v48, %v404_v47  ;;  %v7841_v39 = vld [vmem:[%s11401_s4 + $0x448] ss:$36 sps:$4 sm:$0xff]  }
  0x7b   :  { %1239 = vmatpush1.bf16.msra.mxu0 %v8943_v50  ;;  %v9124_v50 = vpack.c.bf16 %v401_v44, %v399_v43 }
  0x7c   :  { %1240 = vmatprep.subr.bf16.mxu0 %v8951_v52  ;;  %v377_v52 = vunpack.c.l.bf16 %v364_v32  ;;  %v7835_v32 = vld [vmem:[%s11401_s4 + $0x3b8] ss:$36 sps:$4 sm:$0xff]  }
  0x7e   :  { %v405_v57 = vadd.f32 %v388_v20, %v377_v52  ;;  %v7826_v20 = vld [vmem:[%s11401_s4 + $0x2e0] ss:$36 sps:$4 sm:$0xff]  }
  0x7f   :  { %1241 = vmatpush1.bf16.msra.mxu0 %v8962_v54  ;;  %v380_v54 = vunpack.c.h.bf16 %v365_v45 }
  0x80   :  { %v9132_v61 = vpack.c.bf16 %v405_v57, %v403_v56 }
  0x81   :  { %v408_v58 = vadd.f32 %v9047_v29, %v380_v54  ;;  %v7811_v29 = vld [vmem:[%s11401_s4 + $0x178] ss:$36 sps:$4 sm:$0xff]   ;;  %v451_v54 = vld [vmem:[%s11406_s5] sm:$0x3] }
  0x82   :  { %1243 = vmatmul.mubr.bf16.vlgmr.msra.gmra.mrb[16].mxu0 %v9109_v37  ;;  %1294 = vmatpush1.bf16.msra.mxu1 %v7811_v29  ;;  %v456_v57 = vrot.slane %v451_v54, %v9080_v10 }
  0x83   :  { %1252 = vmatprep.mubr.bf16.mxu0 %v9112_v40  ;;  %v9134_v14 = vpack.c.bf16 %v410_v59, %v408_v58  ;;  %1295 = vmatprep.subr.bf16.mxu1 %v7816_v31  ;;  %v460_v58 = vrot.slane %v451_v54, %v9028_v19 }
  0x86   :  { %1296 = vmatpush1.bf16.msra.mxu1 %v7814_v7 }
  0x87   :  { %1297 = vmatprep.subr.bf16.mxu1 %v7819_v33 }
  0x8a   :  { %1253 = vmatmul.mubr.bf16.gmra.mrb[20].mxu0 %v9124_v50  ;;  %1298 = vmatpush1.bf16.msra.mxu1 %v7817_v36 }
  0x8b   :  { %1262 = vmatprep.mubr.bf16.mxu0 %v9126_v53 }
  0x92   :  { %1263 = vmatmul.mubr.bf16.gmra.mrb[24].mxu0 %v9132_v61 }
  0x93   :  { %1272 = vmatprep.mubr.bf16.mxu0 %v9134_v14 }
  0x9a   :  { %1273 = vmatmul.mubr.bf16.gmra.mrb[28].mxu0 %v9138_v1 }
  0x9b   :  { %1388 = vmatprep.mubr.bf16.mxu0 %v9065_v9  ;;  %v7822_v9 = vld [vmem:[%s11401_s4 + $0x254] ss:$36 sps:$4 sm:$0xff]  }
  0x9c   :  { %1299 = vmatprep.subr.bf16.mxu1 %v7822_v9 }
  0x9d   :  { %1300 = vmatpush1.bf16.msra.mxu1 %v7820_v11 }
  0x9e   :  { %1301 = vmatprep.subr.bf16.mxu1 %v7825_v12 }
  0xa1   :  { %1302 = vmatpush1.bf16.msra.mxu1 %v7823_v13 }
  0xa2   :  { %1303 = vmatprep.subr.bf16.mxu1 %v7828_v17 }
  0xa5   :  { %1304 = vmatpush1.bf16.msra.mxu1 %v7826_v20 }
  0xa6   :  { %1305 = vmatprep.subr.bf16.mxu1 %v7831_v22 }
  0xa9   :  { %1306 = vmatpush1.bf16.msra.mxu1 %v7829_v24 }
  0xaa   :  { %1307 = vmatprep.subr.bf16.mxu1 %v7834_v26 }
  0xad   :  { %1308 = vmatpush1.bf16.msra.mxu1 %v7832_v28 }
  0xae   :  { %1309 = vmatprep.subr.bf16.mxu1 %v7837_v30 }
  0xb1   :  { %1310 = vmatpush1.bf16.msra.mxu1 %v7835_v32 }
  0xb2   :  { %1311 = vmatprep.subr.bf16.mxu1 %v7840_v34 }
  0xb5   :  { %1312 = vmatpush1.bf16.msra.mxu1 %v7838_v35 }
  0xb6   :  { %1313 = vmatprep.subr.bf16.mxu1 %v7843_v38 }
  0xb9   :  { %1314 = vmatpush1.bf16.msra.mxu1 %v7841_v39 }
  0xbc   :  { %1316 = vmatmul.mubr.bf16.vlgmr.msra.gmra.mrb[4].mxu1 %v9109_v37 }
  0xbd   :  { %1325 = vmatprep.mubr.bf16.mxu1 %v9112_v40 }
  0xc4   :  { %1326 = vmatmul.mubr.bf16.gmra.mrb[8].mxu1 %v9124_v50 }
  0xc5   :  { %1335 = vmatprep.mubr.bf16.mxu1 %v9126_v53 }
  0xcc   :  { %1336 = vmatmul.mubr.bf16.gmra.mrb[12].mxu1 %v9132_v61 }
  0xcd   :  { %1345 = vmatprep.mubr.bf16.mxu1 %v9134_v14 }
  0xd4   :  { %1346 = vmatmul.mubr.bf16.gmra.mrb[16].mxu1 %v9138_v1 }
 0x115   :  { %v9245_v41 = vpop.f32.mrb[0].mxu0 }
 0x116   :  { %v9247_v42 = vpop.f32.mrb[1].mxu0 }
 0x117   :  { %v9249_v43 = vpop.f32.mrb[2].mxu0 }
 0x118   :  { %v9251_v44 = vpop.f32.mrb[3].mxu0 }
 0x11d   :  { %v9253_v45 = vpop.f32.mrb[4].mxu0 }
 0x11e   :  { %v9255_v46 = vpop.f32.mrb[5].mxu0 }
 0x11f   :  { %v9257_v47 = vpop.f32.mrb[6].mxu0 }
 0x120   :  { %v9259_v48 = vpop.f32.mrb[7].mxu0 }
 0x125   :  { %v9261_v51 = vpop.f32.mrb[8].mxu0  ;;  %v664_v59 = vpop.f32.mrb[0].mxu1 }
 0x126   :  { %v9263_v52 = vpop.f32.mrb[9].mxu0  ;;  %v9276_v63 = vadd.f32 %v664_v59, %v456_v57  ;;  %v666_v0 = vpop.f32.mrb[1].mxu1 }
 0x127   :  { %v9268_v55 = vpop.f32.mrb[10].mxu0  ;;  %v667_v2 = vadd.f32 %v666_v0, %v460_v58  ;;  %v668_v16 = vpop.f32.mrb[2].mxu1 }
 0x128   :  { %v9270_v56 = vpop.f32.mrb[11].mxu0  ;;  %v669_v3 = vpop.f32.mrb[3].mxu1 }
 0x129   :  { %v1438_v21 = vpack.c.bf16 %v667_v2, %v667_v2 }
 0x12b   :  { %1479 = vmatprep.mubr.bf16.mxu1 %v1438_v21 }
 0x12d   :  { %v9274_v62 = vpop.f32.mrb[12].mxu0 }
 0x12e   :  { %v9278_v15 = vpop.f32.mrb[13].mxu0 }
 0x12f   :  { %v9280_v18 = vpop.f32.mrb[14].mxu0 }
 0x130   :  { %v9282_v4 = vpop.f32.mrb[15].mxu0 }
 0x155   :  { %v1244_v6 = vpop.f32.mrb[16].mxu0 }
 0x156   :  { %v1245_v27 = vadd.f32 %v1244_v6, %v772_v25  ;;  %v1246_v29 = vpop.f32.mrb[17].mxu0 }
 0x157   :  { %v1247_v31 = vadd.f32 %v1246_v29, %v776_v5  ;;  %v1248_v7 = vpop.f32.mrb[18].mxu0 }
 0x158   :  { %v1421_v33 = vadd.f32 %v1245_v27, %v9245_v41  ;;  %v1249_v36 = vadd.f32 %v1248_v7, %v772_v25  ;;  %v1250_v9 = vpop.f32.mrb[19].mxu0 }
 0x159   :  { %v1422_v11 = vadd.f32 %v1247_v31, %v9247_v42  ;;  %v1251_v12 = vadd.f32 %v1250_v9, %v776_v5 }
 0x15a   :  { %v1423_v13 = vadd.f32 %v1249_v36, %v9249_v43 }
 0x15b   :  { %v1424_v17 = vadd.f32 %v1251_v12, %v9251_v44 }
 0x15c   :  { %v1439_v20 = vpack.c.bf16 %v1423_v13, %v1421_v33 }
 0x15d   :  { %v1254_v22 = vpop.f32.mrb[20].mxu0  ;;  %v1440_v24 = vpack.c.bf16 %v1424_v17, %v1422_v11 }
 0x15e   :  { %v1255_v26 = vadd.f32 %v1254_v22, %v772_v25  ;;  %v1256_v28 = vpop.f32.mrb[21].mxu0 }
 0x15f   :  { %v1257_v30 = vadd.f32 %v1256_v28, %v776_v5  ;;  %v1258_v32 = vpop.f32.mrb[22].mxu0  ;;  %1447 = vmatprep.subr.bf16.mxu1 %v1440_v24 }
 0x160   :  { %v1425_v34 = vadd.f32 %v1255_v26, %v9253_v45  ;;  %v1259_v35 = vadd.f32 %v1258_v32, %v772_v25  ;;  %v1260_v38 = vpop.f32.mrb[23].mxu0  ;;  %1448 = vmatpush1.bf16.xpose.msra.mxu1 %v1439_v20 }
 0x161   :  { %v1426_v39 = vadd.f32 %v1257_v30, %v9255_v46  ;;  %v1261_v54 = vadd.f32 %v1260_v38, %v776_v5 }
 0x162   :  { %v1427_v57 = vadd.f32 %v1259_v35, %v9257_v47 }
 0x163   :  { %v1428_v58 = vadd.f32 %v1261_v54, %v9259_v48 }
 0x164   :  { %v1441_v59 = vpack.c.bf16 %v1427_v57, %v1425_v34  ;;  %v1437_v57 = vpack.c.bf16 %v9276_v63, %v9276_v63 }
 0x165   :  { %v1264_v0 = vpop.f32.mrb[24].mxu0  ;;  %v1442_v2 = vpack.c.bf16 %v1428_v58, %v1426_v39  ;;  %v779_v58 = vsub.s32 2, %v8978_v60 }
 0x166   :  { %v1265_v16 = vadd.f32 %v1264_v0, %v772_v25  ;;  %v1266_v3 = vpop.f32.mrb[25].mxu0 }
 0x167   :  { %v1267_v21 = vadd.f32 %v1266_v3, %v776_v5  ;;  %v1268_v6 = vpop.f32.mrb[26].mxu0  ;;  %1449 = vmatprep.subr.bf16.mxu1 %v1442_v2 }
 0x168   :  { %v1429_v27 = vadd.f32 %v1265_v16, %v9261_v51  ;;  %v1269_v29 = vadd.f32 %v1268_v6, %v772_v25  ;;  %v1270_v31 = vpop.f32.mrb[27].mxu0  ;;  %1450 = vmatpush1.bf16.xpose.msra.mxu1 %v1441_v59 }
 0x169   :  { %v1430_v7 = vadd.f32 %v1267_v21, %v9263_v52  ;;  %v1271_v33 = vadd.f32 %v1270_v31, %v776_v5 }
 0x16a   :  { %v1431_v36 = vadd.f32 %v1269_v29, %v9268_v55 }
 0x16b   :  { %v1432_v9 = vadd.f32 %v1271_v33, %v9270_v56 }
 0x16c   :  { %v1443_v11 = vpack.c.bf16 %v1431_v36, %v1429_v27 }
 0x16d   :  { %v1274_v12 = vpop.f32.mrb[28].mxu0  ;;  %v1444_v13 = vpack.c.bf16 %v1432_v9, %v1430_v7 }
 0x16e   :  { %v1275_v17 = vadd.f32 %v1274_v12, %v772_v25  ;;  %v1276_v20 = vpop.f32.mrb[29].mxu0 }
 0x16f   :  { %v1277_v22 = vadd.f32 %v1276_v20, %v776_v5  ;;  %v1278_v24 = vpop.f32.mrb[30].mxu0  ;;  %1451 = vmatprep.subr.bf16.mxu1 %v1444_v13 }
 0x170   :  { %v1433_v26 = vadd.f32 %v1275_v17, %v9274_v62  ;;  %v1279_v28 = vadd.f32 %v1278_v24, %v772_v25  ;;  %v1280_v30 = vpop.f32.mrb[31].mxu0  ;;  %1452 = vmatpush1.bf16.xpose.msra.mxu1 %v1443_v11  ;;  %v783_v25 = vsub.s32 3, %v8978_v60 }
 0x171   :  { %v1434_v32 = vadd.f32 %v1277_v22, %v9278_v15  ;;  %v1281_v34 = vadd.f32 %v1280_v30, %v776_v5  ;;  %v780_v5 = vrot.slane %v9287_v23, %v779_v58 }
 0x172   :  { %v1435_v35 = vadd.f32 %v1279_v28, %v9280_v18  ;;  %v784_v59 = vrot.slane %v9287_v23, %v783_v25 }
 0x173   :  { %v1436_v38 = vadd.f32 %v1281_v34, %v9282_v4 }
 0x174   :  { %v1445_v39 = vpack.c.bf16 %v1435_v35, %v1433_v26 }
 0x175   :  { %v1446_v54 = vpack.c.bf16 %v1436_v38, %v1434_v32 }
 0x177   :  { %1453 = vmatprep.subr.bf16.mxu1 %v1446_v54 }
 0x178   :  { %1454 = vmatpush1.bf16.xpose.msra.mxu1 %v1445_v39 }
 0x17f   :  { %1480 = vmatmul.mubr.bf16.vlgmr.msra.gmra.mrb[20].mxu1 %v1437_v57 }
 0x18f   :  { %v1317_v0 = vpop.f32.mrb[4].mxu1 }
 0x190   :  { %v1318_v2 = vadd.f32 %v1317_v0, %v780_v5  ;;  %v1319_v16 = vpop.f32.mrb[5].mxu1 }
 0x191   :  { %v1320_v3 = vadd.f32 %v1319_v16, %v784_v59  ;;  %v1321_v21 = vpop.f32.mrb[6].mxu1 }
 0x192   :  { %v1322_v6 = vadd.f32 %v1321_v21, %v780_v5  ;;  %v1323_v63 = vpop.f32.mrb[7].mxu1 }
 0x193   :  { %v1324_v27 = vadd.f32 %v1323_v63, %v784_v59 }
 0x194   :  { %v1501_v29 = vpack.c.bf16 %v1322_v6, %v1318_v2 }
 0x195   :  { %v1502_v31 = vpack.c.bf16 %v1324_v27, %v1320_v3 }
 0x197   :  { %v1327_v7 = vpop.f32.mrb[8].mxu1  ;;  %1512 = vmatprep.subr.bf16.mxu1 %v1502_v31 }
 0x198   :  { %v1328_v33 = vadd.f32 %v1327_v7, %v780_v5  ;;  %v1329_v36 = vpop.f32.mrb[9].mxu1  ;;  %1513 = vmatpush1.bf16.msra.mxu1 %v1501_v29 }
 0x199   :  { %v1330_v9 = vadd.f32 %v1329_v36, %v784_v59  ;;  %v1331_v11 = vpop.f32.mrb[10].mxu1 }
 0x19a   :  { %v1332_v12 = vadd.f32 %v1331_v11, %v780_v5  ;;  %v1333_v13 = vpop.f32.mrb[11].mxu1 }
 0x19b   :  { %v1334_v17 = vadd.f32 %v1333_v13, %v784_v59 }
 0x19c   :  { %v1503_v20 = vpack.c.bf16 %v1332_v12, %v1328_v33 }
 0x19d   :  { %v1504_v22 = vpack.c.bf16 %v1334_v17, %v1330_v9 }
 0x19f   :  { %v1337_v24 = vpop.f32.mrb[12].mxu1  ;;  %1514 = vmatprep.subr.bf16.mxu1 %v1504_v22  ;;  %v7844_v22 = vld [vmem:[%s11401_s4 + $0x258] ss:$36 sps:$4 sm:$0xff]  }
 0x1a0   :  { %v1338_v26 = vadd.f32 %v1337_v24, %v780_v5  ;;  %v1339_v28 = vpop.f32.mrb[13].mxu1  ;;  %1515 = vmatpush1.bf16.msra.mxu1 %v1503_v20  ;;  %v8624_v20 = vmov 0   ;;  %v7845_v24 = vld [vmem:[%s11401_s4 + $0x18] ss:$36 sps:$4 sm:$0xff]   ;;  %7379 = vmatprep.subr.bf16.mxu0 %v7844_v22 }
 0x1a1   :  { %v1340_v30 = vadd.f32 %v1339_v28, %v784_v59  ;;  %v1341_v32 = vpop.f32.mrb[14].mxu1  ;;  %1544 = vmatprep.mubr.bf16.mxu1 %v8624_v20  ;;  %7380 = vmatpush3.bf16.msra.mxu0 %v7845_v24  ;;  %v7847_v28 = vld [vmem:[%s11401_s4 + $0x60] ss:$36 sps:$4 sm:$0xff]   ;;  %v7895_v22 = vld [vmem:[%s11401_s4 + $0x338] ss:$36 sps:$4 sm:$0xff]  }
 0x1a2   :  { %v1342_v34 = vadd.f32 %v1341_v32, %v780_v5  ;;  %v1343_v35 = vpop.f32.mrb[15].mxu1  ;;  %v7849_v32 = vld [vmem:[%s11401_s4 + $0xa8] ss:$36 sps:$4 sm:$0xff]   ;;  %v7893_v24 = vld [vmem:[%s11401_s4 + $0x334] ss:$36 sps:$4 sm:$0xff]  }
 0x1a3   :  { %v1344_v38 = vadd.f32 %v1343_v35, %v784_v59  ;;  %v7851_v35 = vld [vmem:[%s11401_s4 + $0xf0] ss:$36 sps:$4 sm:$0xff]  }
 0x1a4   :  { %v1505_v39 = vpack.c.bf16 %v1342_v34, %v1338_v26  ;;  %v7846_v26 = vld [vmem:[%s11401_s4 + $0x2a0] ss:$36 sps:$4 sm:$0xff]   ;;  %v7850_v34 = vld [vmem:[%s11401_s4 + $0x330] ss:$36 sps:$4 sm:$0xff]  }
 0x1a5   :  { %v1506_v54 = vpack.c.bf16 %v1344_v38, %v1340_v30  ;;  %7381 = vmatprep.subr.bf16.mxu0 %v7846_v26  ;;  %v7848_v30 = vld [vmem:[%s11401_s4 + $0x2e8] ss:$36 sps:$4 sm:$0xff]   ;;  %v7852_v38 = vld [vmem:[%s11401_s4 + $0x378] ss:$36 sps:$4 sm:$0xff]   ;;  %v7898_v26 = vld [vmem:[%s11401_s4 + $0x380] ss:$36 sps:$4 sm:$0xff]  }
 0x1a6   :  { %7382 = vmatpush3.bf16.msra.mxu0 %v7847_v28  ;;  %v7896_v28 = vld [vmem:[%s11401_s4 + $0x37c] ss:$36 sps:$4 sm:$0xff]  }
 0x1a7   :  { %v1347_v57 = vpop.f32.mrb[16].mxu1  ;;  %1516 = vmatprep.subr.bf16.mxu1 %v1506_v54  ;;  %7383 = vmatprep.subr.bf16.mxu0 %v7848_v30  ;;  %v7854_v54 = vld [vmem:[%s11401_s4 + $0x3c0] ss:$36 sps:$4 sm:$0xff]   ;;  %v7901_v30 = vld [vmem:[%s11401_s4 + $0x3c8] ss:$36 sps:$4 sm:$0xff]  }
 0x1a8   :  { %v1348_v0 = vadd.f32 %v1347_v57, %v780_v5  ;;  %v1349_v2 = vpop.f32.mrb[17].mxu1  ;;  %1517 = vmatpush1.bf16.msra.mxu1 %v1505_v39  ;;  %v7853_v39 = vld [vmem:[%s11401_s4 + $0x138] ss:$36 sps:$4 sm:$0xff]   ;;  %v7855_v57 = vld [vmem:[%s11401_s4 + $0x180] ss:$36 sps:$4 sm:$0xff]  }
 0x1a9   :  { %v1350_v16 = vadd.f32 %v1349_v2, %v784_v59  ;;  %v1351_v3 = vpop.f32.mrb[18].mxu1  ;;  %v7857_v2 = vld [vmem:[%s11401_s4 + $0x1c8] ss:$36 sps:$4 sm:$0xff]  }
 0x1aa   :  { %v1352_v21 = vadd.f32 %v1351_v3, %v780_v5  ;;  %v1353_v6 = vpop.f32.mrb[19].mxu1  ;;  %7384 = vmatpush3.bf16.msra.mxu0 %v7849_v32  ;;  %v7859_v3 = vld [vmem:[%s11401_s4 + $0x210] ss:$36 sps:$4 sm:$0xff]   ;;  %v7899_v32 = vld [vmem:[%s11401_s4 + $0x3c4] ss:$36 sps:$4 sm:$0xff]  }
 0x1ab   :  { %v1354_v63 = vadd.f32 %v1353_v6, %v784_v59  ;;  %7385 = vmatprep.subr.bf16.mxu0 %v7850_v34  ;;  %v7860_v6 = vld [vmem:[%s11401_s4 + $0x1c] ss:$36 sps:$4 sm:$0xff]   ;;  %v7904_v34 = vld [vmem:[%s11401_s4 + $0x410] ss:$36 sps:$4 sm:$0xff]  }
 0x1ac   :  { %v1507_v27 = vpack.c.bf16 %v1352_v21, %v1348_v0  ;;  %v7856_v0 = vld [vmem:[%s11401_s4 + $0x408] ss:$36 sps:$4 sm:$0xff]   ;;  %v7862_v21 = vld [vmem:[%s11401_s4 + $0x20] ss:$36 sps:$4 sm:$0xff]  }
 0x1ad   :  { %v1508_v29 = vpack.c.bf16 %v1354_v63, %v1350_v16  ;;  %v7858_v16 = vld [vmem:[%s11401_s4 + $0x450] ss:$36 sps:$4 sm:$0xff]   ;;  %v7865_v63 = vld [vmem:[%s11401_s4 + $0x68] ss:$36 sps:$4 sm:$0xff]  }
 0x1ae   :  { %7386 = vmatpush3.bf16.msra.mxu0 %v7851_v35  ;;  %v7902_v35 = vld [vmem:[%s11401_s4 + $0x40c] ss:$36 sps:$4 sm:$0xff]  }
 0x1af   :  { %1518 = vmatprep.subr.bf16.mxu1 %v1508_v29  ;;  %7387 = vmatprep.subr.bf16.mxu0 %v7852_v38  ;;  %v7868_v29 = vld [vmem:[%s11401_s4 + $0xb0] ss:$36 sps:$4 sm:$0xff]  }
 0x1b0   :  { %1519 = vmatpush1.bf16.msra.mxu1 %v1507_v27  ;;  %v7863_v27 = vld [vmem:[%s11401_s4 + $0x64] ss:$36 sps:$4 sm:$0xff]  }
 0x1b2   :  { %7388 = vmatpush3.bf16.msra.mxu0 %v7853_v39 }
 0x1b3   :  { %7389 = vmatprep.subr.bf16.mxu0 %v7854_v54 }
 0x1b6   :  { %7390 = vmatpush3.bf16.msra.mxu0 %v7855_v57 }
 0x1b7   :  { %7391 = vmatprep.subr.bf16.mxu0 %v7856_v0  ;;  %v7907_v0 = vld [vmem:[%s11401_s4 + $0x458] ss:$36 sps:$4 sm:$0xff]  }
 0x1ba   :  { %7392 = vmatpush3.bf16.msra.mxu0 %v7857_v2  ;;  %v7905_v2 = vld [vmem:[%s11401_s4 + $0x454] ss:$36 sps:$4 sm:$0xff]  }
 0x1bb   :  { %7393 = vmatprep.subr.bf16.mxu0 %v7858_v16  ;;  %v7908_v16 = vld [vmem:[%s11407_s6] ss:$24 sps:$4 sm:$0xff]  }
 0x1be   :  { %7394 = vmatpush3.bf16.msra.mxu0 %v7859_v3  ;;  %v7913_v3 = vld [vmem:[%s11407_s6 + $0x34] ss:$24 sps:$4 sm:$0xff]  }
 0x1bf   :  { %1759 = vmatprep.subr.bf16.mxu0 %v7862_v21  ;;  %v7911_v21 = vld [vmem:[%s11407_s6 + $0x30] ss:$24 sps:$4 sm:$0xff]  }
 0x1c1   :  { %1389 = vmatmul.mubr.bf16.vlgmr.msra.gmra.mrb[32].mxu0 %v9109_v37  ;;  %v7871_v37 = vld [vmem:[%s11401_s4 + $0xf8] ss:$36 sps:$4 sm:$0xff]  }
 0x1c2   :  { %1760 = vmatpush1.bf16.msra.mxu0 %v7860_v6  ;;  %1396 = vmatprep.mubr.bf16.mxu0 %v9112_v40  ;;  %v7869_v40 = vld [vmem:[%s11401_s4 + $0xf4] ss:$36 sps:$4 sm:$0xff]   ;;  %v7916_v6 = vld [vmem:[%s11407_s6 + $0x64] ss:$24 sps:$4 sm:$0xff]  }
 0x1c3   :  { %1761 = vmatprep.subr.bf16.mxu0 %v7865_v63  ;;  %v7914_v63 = vld [vmem:[%s11407_s6 + $0x60] ss:$24 sps:$4 sm:$0xff]  }
 0x1c6   :  { %1762 = vmatpush1.bf16.msra.mxu0 %v7863_v27  ;;  %v7919_v27 = vld [vmem:[%s11407_s6 + $0x94] ss:$24 sps:$4 sm:$0xff]  }
 0x1c7   :  { %1763 = vmatprep.subr.bf16.mxu0 %v7868_v29  ;;  %v7917_v29 = vld [vmem:[%s11407_s6 + $0x90] ss:$24 sps:$4 sm:$0xff]  }
 0x1c9   :  { %1397 = vmatmul.mubr.bf16.gmra.mrb[36].mxu0 %v9124_v50  ;;  %v7877_v50 = vld [vmem:[%s11401_s4 + $0x188] ss:$36 sps:$4 sm:$0xff]  }
 0x1ca   :  { %1404 = vmatprep.mubr.bf16.mxu0 %v9126_v53  ;;  %v7875_v53 = vld [vmem:[%s11401_s4 + $0x184] ss:$36 sps:$4 sm:$0xff]  }
 0x1d1   :  { %1405 = vmatmul.mubr.bf16.gmra.mrb[40].mxu0 %v9132_v61  ;;  %v7883_v61 = vld [vmem:[%s11401_s4 + $0x218] ss:$36 sps:$4 sm:$0xff]  }
 0x1d2   :  { %1412 = vmatprep.mubr.bf16.mxu0 %v9134_v14  ;;  %v7881_v14 = vld [vmem:[%s11401_s4 + $0x214] ss:$36 sps:$4 sm:$0xff]  }
 0x1d9   :  { %1413 = vmatmul.mubr.bf16.gmra.mrb[44].mxu0 %v9138_v1  ;;  %v7889_v1 = vld [vmem:[%s11401_s4 + $0x2a8] ss:$36 sps:$4 sm:$0xff]  }
 0x252   :  { %v1481_v31 = vpop.f32.mrb[20].mxu1 }
 0x253   :  { %v1487_v7 = vmul.f32 0.0625, %v1481_v31  ;;  %v1483_v33 = vpop.f32.mrb[21].mxu1  ;;  %v7866_v31 = vld [vmem:[%s11401_s4 + $0xac] ss:$36 sps:$4 sm:$0xff]  }
 0x254   :  { %v1484_v36 = vpop.f32.mrb[22].mxu1  ;;  %1764 = vmatpush1.bf16.msra.mxu0 %v7866_v31  ;;  %v7872_v33 = vld [vmem:[%s11401_s4 + $0x13c] ss:$36 sps:$4 sm:$0xff]  }
 0x255   :  { %v1485_v9 = vpop.f32.mrb[23].mxu1  ;;  %v1489_v11 = vsel %vm1488_vm0, %v1487_v7, -inf  ;;  %1765 = vmatprep.subr.bf16.mxu0 %v7871_v37  ;;  %v7880_v36 = vld [vmem:[%s11401_s4 + $0x1d0] ss:$36 sps:$4 sm:$0xff]   ;;  %v7922_v31 = vld [vmem:[%s11407_s6 + $0xc4] ss:$24 sps:$4 sm:$0xff]  }
 0x256   :  { %1490 = vmax.xlane.f32.xlu0 %v1489_v11  ;;  %v7878_v9 = vld [vmem:[%s11401_s4 + $0x1cc] ss:$36 sps:$4 sm:$0xff]   ;;  %v7886_v11 = vld [vmem:[%s11401_s4 + $0x260] ss:$36 sps:$4 sm:$0xff]  }
 0x257   :  { %v7920_v37 = vld [vmem:[%s11407_s6 + $0xc0] ss:$24 sps:$4 sm:$0xff]  }
 0x258   :  { %1766 = vmatpush1.bf16.msra.mxu0 %v7869_v40  ;;  %v7925_v40 = vld [vmem:[%s11407_s6 + $0xf4] ss:$24 sps:$4 sm:$0xff]  }
 0x2e3   :  { %v1491_v12 = vpop.xlane.xlu0 %1490 }
 0x2e4   :  { %v1492_v13 = vsub.f32 %v1487_v7, %v1491_v12  ;;  %v7874_v7 = vld [vmem:[%s11401_s4 + $0x140] ss:$36 sps:$4 sm:$0xff]  }
 0x2e5   :  { %1767 = vmatprep.subr.bf16.mxu0 %v7874_v7  ;;  %v7884_v12 = vld [vmem:[%s11401_s4 + $0x25c] ss:$36 sps:$4 sm:$0xff]   ;;  %v7923_v7 = vld [vmem:[%s11407_s6 + $0xf0] ss:$24 sps:$4 sm:$0xff]  }
 0x2e6   :  { %v1493_v17 = vmul.f32 1.442695, %v1492_v13  ;;  %1768 = vmatpush1.bf16.msra.mxu0 %v7872_v33  ;;  %v7887_v13 = vld [vmem:[%s11401_s4 + $0x2a4] ss:$36 sps:$4 sm:$0xff]  }
 0x2e7   :  { %1769 = vmatprep.subr.bf16.mxu0 %v7877_v50  ;;  %v7928_v33 = vld [vmem:[%s11407_s6 + $0x124] ss:$24 sps:$4 sm:$0xff]   ;;  %v7926_v50 = vld [vmem:[%s11407_s6 + $0x120] ss:$24 sps:$4 sm:$0xff]  }
 0x2e8   :  { %8614 = vpow2.f32 %v1493_v17  ;;  %v7892_v17 = vld [vmem:[%s11401_s4 + $0x2f0] ss:$36 sps:$4 sm:$0xff]  }
 0x2ea   :  { %1770 = vmatpush1.bf16.msra.mxu0 %v7875_v53  ;;  %v7931_v53 = vld [vmem:[%s11407_s6 + $0x154] ss:$24 sps:$4 sm:$0xff]  }
 0x2eb   :  { %1771 = vmatprep.subr.bf16.mxu0 %v7880_v36  ;;  %v787_v36 = vsub.s32 4, %v8978_v60 }
 0x2ee   :  { %1772 = vmatpush1.bf16.msra.mxu0 %v7878_v9  ;;  %v7929_v9 = vld [vmem:[%s11407_s6 + $0x150] ss:$24 sps:$4 sm:$0xff]  }
 0x2ef   :  { %1773 = vmatprep.subr.bf16.mxu0 %v7883_v61  ;;  %v7934_v61 = vld [vmem:[%s11407_s6 + $0x184] ss:$24 sps:$4 sm:$0xff]  }
 0x2f2   :  { %v9320_v5 = vpop.eup %8614  ;;  %1774 = vmatpush1.bf16.msra.mxu0 %v7881_v14  ;;  %v7395_v14 = vpop.f32.mrb[32].mxu0 }
 0x2f3   :  { %v1495_v59 = vsel %vm1488_vm0, %v9320_v5, 0.0  ;;  %1775 = vmatprep.subr.bf16.mxu0 %v7886_v11  ;;  %v9533_v11 = vrot.slane %v9287_v23, %v787_v36 }
 0x2f4   :  { %1496 = vadd.xlane.f32.xlu0 %v1495_v59  ;;  %v7890_v59 = vld [vmem:[%s11401_s4 + $0x2ec] ss:$36 sps:$4 sm:$0xff]  }
 0x2f6   :  { %1776 = vmatpush1.bf16.msra.mxu0 %v7884_v12  ;;  %v7396_v12 = vpop.f32.mrb[33].mxu0 }
 0x2f7   :  { %1777 = vmatprep.subr.bf16.mxu0 %v7889_v1  ;;  %v7397_v1 = vadd.f32 %v7396_v12, %v7395_v14 }
 0x2fa   :  { %1778 = vmatpush1.bf16.msra.mxu0 %v7887_v13  ;;  %v7398_v13 = vpop.f32.mrb[34].mxu0 }
 0x2fb   :  { %1779 = vmatprep.subr.bf16.mxu0 %v7892_v17  ;;  %v7932_v17 = vld [vmem:[%s11407_s6 + $0x180] ss:$24 sps:$4 sm:$0xff]  }
 0x2fe   :  { %1780 = vmatpush1.bf16.msra.mxu0 %v7890_v59  ;;  %v7399_v59 = vpop.f32.mrb[35].mxu0 }
 0x2ff   :  { %1781 = vmatprep.subr.bf16.mxu0 %v7895_v22  ;;  %v7937_v22 = vld [vmem:[%s11407_s6 + $0x1b4] ss:$24 sps:$4 sm:$0xff]  }
 0x302   :  { %1782 = vmatpush1.bf16.msra.mxu0 %v7893_v24  ;;  %v9542_v24 = vadd.f32 %v7397_v1, %v9533_v11 }
 0x303   :  { %1783 = vmatprep.subr.bf16.mxu0 %v7898_v26  ;;  %v7400_v26 = vadd.f32 %v7399_v59, %v7398_v13  ;;  %v7950_v59 = vld [vmem:[%s11407_s6 + $0x2a0] ss:$24 sps:$4 sm:$0xff]  }
 0x305   :  { %v9545_v23 = vadd.f32 %v7400_v26, %v9533_v11 }
 0x306   :  { %1784 = vmatpush1.bf16.msra.mxu0 %v7896_v28  ;;  %v7935_v28 = vld [vmem:[%s11407_s6 + $0x1b0] ss:$24 sps:$4 sm:$0xff]  }
 0x307   :  { %1785 = vmatprep.subr.bf16.mxu0 %v7901_v30  ;;  %v7940_v30 = vld [vmem:[%s11407_s6 + $0x1e4] ss:$24 sps:$4 sm:$0xff]  }
 0x30a   :  { %1786 = vmatpush1.bf16.msra.mxu0 %v7899_v32  ;;  %v2233_v32 = vpack.c.bf16 %v9545_v23, %v9542_v24  ;;  %v7968_v24 = vld [vmem:[%s11408_s8 + $0x230] ss:$20 sps:$4 sm:$0xff]  }
 0x30b   :  { %1787 = vmatprep.subr.bf16.mxu0 %v7904_v34  ;;  %v7401_v34 = vpop.f32.mrb[36].mxu0  ;;  %v7969_v23 = vld [vmem:[%s11408_s8 + $0xf0] ss:$20 sps:$4 sm:$0xff]  }
 0x30e   :  { %1788 = vmatpush1.bf16.msra.mxu0 %v7902_v35  ;;  %v7402_v35 = vpop.f32.mrb[37].mxu0 }
 0x30f   :  { %1789 = vmatprep.subr.bf16.mxu0 %v7907_v0  ;;  %v7943_v0 = vld [vmem:[%s11407_s6 + $0x214] ss:$24 sps:$4 sm:$0xff]  }
 0x312   :  { %1790 = vmatpush1.bf16.msra.mxu0 %v7905_v2 }
 0x381   :  { %v1497_v38 = vpop.xlane.xlu0 %1496 }
 0x382   :  { %8616 = vrcp.f32 %v1497_v38  ;;  %v7403_v38 = vadd.f32 %v7402_v35, %v7401_v34 }
 0x384   :  { %v9562_v2 = vadd.f32 %v7403_v38, %v9533_v11 }
 0x38c   :  { %v8617_v39 = vpop.eup %8616 }
 0x38d   :  { %v1499_v54 = vmul.f32 %v8617_v39, %v9320_v5  ;;  %v7910_v5 = vld [vmem:[%s11407_s6 + $0x4] ss:$24 sps:$4 sm:$0xff]   ;;  %v7404_v39 = vpop.f32.mrb[38].mxu0 }
 0x38e   :  { %2018 = vmatprep.subr.bf16.mxu1 %v7910_v5 }
 0x38f   :  { %v1500_v57 = vpack.c.bf16 %v1499_v54, %v1499_v54  ;;  %v7938_v54 = vld [vmem:[%s11407_s6 + $0x1e0] ss:$24 sps:$4 sm:$0xff]  }
 0x391   :  { %6815 = vmatmul.mubr.msk.bf16.vlgmr.msra.gmra.mrb[24].mxu1 %vm1488_vm0, %v1500_v57  ;;  %v7405_v57 = vpop.f32.mrb[39].mxu0 }
 0x392   :  { %2019 = vmatpush1.bf16.msra.mxu1 %v7908_v16  ;;  %v7406_v16 = vadd.f32 %v7405_v57, %v7404_v39 }
 0x393   :  { %2020 = vmatprep.subr.bf16.mxu1 %v7913_v3  ;;  %v7941_v3 = vld [vmem:[%s11407_s6 + $0x210] ss:$24 sps:$4 sm:$0xff]  }
 0x394   :  { %v9565_v5 = vadd.f32 %v7406_v16, %v9533_v11  ;;  %v7955_v16 = vld [vmem:[%s11407_s6 + $0x2d4] ss:$24 sps:$4 sm:$0xff]  }
 0x396   :  { %2021 = vmatpush1.bf16.msra.mxu1 %v7911_v21  ;;  %v7946_v21 = vld [vmem:[%s11407_s6 + $0x244] ss:$24 sps:$4 sm:$0xff]  }
 0x397   :  { %2022 = vmatprep.subr.bf16.mxu1 %v7916_v6  ;;  %v2234_v6 = vpack.c.bf16 %v9565_v5, %v9562_v2  ;;  %v7971_v2 = vld [vmem:[%s11408_s8 + $0x118] ss:$20 sps:$4 sm:$0xff]  }
 0x398   :  { %v7974_v5 = vld [vmem:[%s11407_s6 + $0xc] ss:$24 sps:$4 sm:$0xff]  }
 0x39a   :  { %2023 = vmatpush1.bf16.msra.mxu1 %v7914_v63  ;;  %v7407_v63 = vpop.f32.mrb[40].mxu0 }
 0x39b   :  { %2024 = vmatprep.subr.bf16.mxu1 %v7919_v27  ;;  %v7408_v27 = vpop.f32.mrb[41].mxu0 }
 0x39e   :  { %2025 = vmatpush1.bf16.msra.mxu1 %v7917_v29  ;;  %v7409_v29 = vadd.f32 %v7408_v27, %v7407_v63  ;;  %v7957_v63 = vld [vmem:[%s11408_s8] ss:$20 sps:$4 sm:$0xff]   ;;  %v7958_v27 = vld [vmem:[%s11408_s8 + $0x168] ss:$20 sps:$4 sm:$0xff]  }
 0x39f   :  { %2026 = vmatprep.subr.bf16.mxu1 %v7922_v31  ;;  %v7410_v31 = vpop.f32.mrb[42].mxu0 }
 0x3a2   :  { %2027 = vmatpush1.bf16.msra.mxu1 %v7920_v37  ;;  %v7944_v37 = vld [vmem:[%s11407_s6 + $0x240] ss:$24 sps:$4 sm:$0xff]  }
 0x3a3   :  { %2028 = vmatprep.subr.bf16.mxu1 %v7925_v40  ;;  %v7411_v40 = vpop.f32.mrb[43].mxu0 }
 0x3a4   :  { %v7413_v12 = vpop.f32.mrb[44].mxu0 }
 0x3a5   :  { %v7414_v1 = vpop.f32.mrb[45].mxu0 }
 0x3a6   :  { %2029 = vmatpush1.bf16.msra.mxu1 %v7923_v7  ;;  %v7949_v7 = vld [vmem:[%s11407_s6 + $0x274] ss:$24 sps:$4 sm:$0xff]   ;;  %v7415_v13 = vadd.f32 %v7414_v1, %v7413_v12  ;;  %v7967_v12 = vld [vmem:[%s11408_s8 + $0xc8] ss:$20 sps:$4 sm:$0xff]  }
 0x3a7   :  { %2030 = vmatprep.subr.bf16.mxu1 %v7928_v33  ;;  %v9582_v33 = vadd.f32 %v7409_v29, %v9533_v11  ;;  %v7959_v29 = vld [vmem:[%s11408_s8 + $0x28] ss:$20 sps:$4 sm:$0xff]  }
 0x3a8   :  { %v9599_v26 = vadd.f32 %v7415_v13, %v9533_v11  ;;  %v1587_v1 = vld [vmem:[%s11406_s5 + $0x7] sm:$0x3] }
 0x3a9   :  { %v1592_v13 = vrot.slane %v1587_v1, %v9080_v10 }
 0x3aa   :  { %2031 = vmatpush1.bf16.msra.mxu1 %v7926_v50  ;;  %v7412_v50 = vadd.f32 %v7411_v40, %v7410_v31  ;;  %v7960_v31 = vld [vmem:[%s11408_s8 + $0x190] ss:$20 sps:$4 sm:$0xff]   ;;  %v7962_v40 = vld [vmem:[%s11408_s8 + $0x1b8] ss:$20 sps:$4 sm:$0xff]  }
 0x3ab   :  { %2032 = vmatprep.subr.bf16.mxu1 %v7931_v53 }
 0x3ac   :  { %v9585_v53 = vadd.f32 %v7412_v50, %v9533_v11  ;;  %v7964_v50 = vld [vmem:[%s11408_s8 + $0x1e0] ss:$20 sps:$4 sm:$0xff]  }
 0x3ae   :  { %2033 = vmatpush1.bf16.msra.mxu1 %v7929_v9  ;;  %v7947_v9 = vld [vmem:[%s11407_s6 + $0x270] ss:$24 sps:$4 sm:$0xff]   ;;  %v2235_v14 = vpack.c.bf16 %v9585_v53, %v9582_v33 }
 0x3af   :  { %2034 = vmatprep.subr.bf16.mxu1 %v7934_v61  ;;  %v7952_v61 = vld [vmem:[%s11407_s6 + $0x2a4] ss:$24 sps:$4 sm:$0xff]  }
 0x3b2   :  { %2035 = vmatpush1.bf16.msra.mxu1 %v7932_v17  ;;  %v7416_v17 = vpop.f32.mrb[46].mxu0 }
 0x3b3   :  { %2036 = vmatprep.subr.bf16.mxu1 %v7937_v22  ;;  %v7417_v22 = vpop.f32.mrb[47].mxu0 }
 0x3b6   :  { %2037 = vmatpush1.bf16.msra.mxu1 %v7935_v28  ;;  %v7418_v28 = vadd.f32 %v7417_v22, %v7416_v17  ;;  %v1596_v17 = vrot.slane %v1587_v1, %v9028_v19  ;;  %v7975_v1 = vld [vmem:[%s11407_s6 + $0x38] ss:$24 sps:$4 sm:$0xff]  }
 0x3b7   :  { %2038 = vmatprep.subr.bf16.mxu1 %v7940_v30 }
 0x3b8   :  { %v9602_v30 = vadd.f32 %v7418_v28, %v9533_v11  ;;  %v7953_v11 = vld [vmem:[%s11407_s6 + $0x2d0] ss:$24 sps:$4 sm:$0xff]  }
 0x3ba   :  { %2039 = vmatpush1.bf16.msra.mxu1 %v7938_v54  ;;  %v2236_v34 = vpack.c.bf16 %v9602_v30, %v9599_v26 }
 0x3bb   :  { %2040 = vmatprep.subr.bf16.mxu1 %v7943_v0 }
 0x3be   :  { %2041 = vmatpush1.bf16.msra.mxu1 %v7941_v3  ;;  %v8625_v3 = vmov 0.0  }
 0x3bf   :  { %2042 = vmatprep.subr.bf16.mxu1 %v7946_v21  ;;  %v7956_v21 = vld [vmem:[%s11408_s8 + $0x140] ss:$20 sps:$4 sm:$0xff]  }
 0x3c0   :  { %7419 = vmatprep.subr.bf16.mxu0 %v7956_v21 }
 0x3c2   :  { %2043 = vmatpush1.bf16.msra.mxu1 %v7944_v37  ;;  %v7961_v37 = vld [vmem:[%s11408_s8 + $0x50] ss:$20 sps:$4 sm:$0xff]  }
 0x3c3   :  { %2044 = vmatprep.subr.bf16.mxu1 %v7949_v7  ;;  %v7963_v7 = vld [vmem:[%s11408_s8 + $0x78] ss:$20 sps:$4 sm:$0xff]  }
 0x3c6   :  { %2045 = vmatpush1.bf16.msra.mxu1 %v7947_v9  ;;  %v7965_v9 = vld [vmem:[%s11408_s8 + $0xa0] ss:$20 sps:$4 sm:$0xff]  }
 0x3c7   :  { %2046 = vmatprep.subr.bf16.mxu1 %v7952_v61  ;;  %v7966_v61 = vld [vmem:[%s11408_s8 + $0x208] ss:$20 sps:$4 sm:$0xff]  }
 0x3ca   :  { %2047 = vmatpush1.bf16.msra.mxu1 %v7950_v59  ;;  %v8622_v59 = vld [vmem:[%s11403_s0] sm:$0xff] }
 0x3cb   :  { %2048 = vmatprep.subr.bf16.mxu1 %v7955_v16  ;;  %v1800_v22 = vunpack.c.l.bf16 %v8622_v59 }
 0x3ce   :  { %2049 = vmatpush1.bf16.msra.mxu1 %v7953_v11 }
 0x3cf   :  { %7619 = vmatprep.subr.bf16.mxu1 %v8625_v3 }
 0x464   :  { %v1546_v35 = vpop.f32.mrb[24].mxu1 }
 0x465   :  { %v1548_v38 = vpop.f32.mrb[25].mxu1  ;;  %v1553_v57 = vpack.c.bf16 %v1546_v35, %v1546_v35  ;;  %v1801_v35 = vunpack.c.h.bf16 %v8622_v59  ;;  %v7983_v59 = vld [vmem:[%s11407_s6 + $0x9c] ss:$24 sps:$4 sm:$0xff]  }
 0x466   :  { %v1554_v39 = vpack.c.bf16 %v1548_v38, %v1548_v38  ;;  %v1550_v54 = vpop.f32.mrb[26].mxu1 }
 0x467   :  { %v1551_v0 = vpop.f32.mrb[27].mxu1 }
 0x468   :  { %1791 = vmatprep.mubr.bf16.mxu0 %v1554_v39 }
 0x469   :  { %1792 = vmatmul.mubr.bf16.vlgmr.msra.gmra.mrb[48].mxu0 %v1553_v57 }
 0x46a   :  { %7420 = vmatpush3.bf16.msra.mxu0 %v7957_v63 }
 0x46b   :  { %7421 = vmatprep.subr.bf16.mxu0 %v7958_v27 }
 0x46e   :  { %7422 = vmatpush3.bf16.msra.mxu0 %v7959_v29 }
 0x46f   :  { %7423 = vmatprep.subr.bf16.mxu0 %v7960_v31 }
 0x472   :  { %7424 = vmatpush3.bf16.msra.mxu0 %v7961_v37 }
 0x473   :  { %7425 = vmatprep.subr.bf16.mxu0 %v7962_v40 }
 0x476   :  { %7426 = vmatpush3.bf16.msra.mxu0 %v7963_v7 }
 0x477   :  { %7427 = vmatprep.subr.bf16.mxu0 %v7964_v50 }
 0x47a   :  { %7428 = vmatpush3.bf16.msra.mxu0 %v7965_v9  ;;  %v7972_v9 = vld [vmem:[%s11407_s6 + $0x8] ss:$24 sps:$4 sm:$0xff]  }
 0x47b   :  { %7429 = vmatprep.subr.bf16.mxu0 %v7966_v61 }
 0x47e   :  { %7430 = vmatpush3.bf16.msra.mxu0 %v7967_v12  ;;  %v7977_v12 = vld [vmem:[%s11407_s6 + $0x3c] ss:$24 sps:$4 sm:$0xff]  }
 0x47f   :  { %7431 = vmatprep.subr.bf16.mxu0 %v7968_v24  ;;  %v8004_v24 = vld [vmem:[%s11407_s6 + $0x1ec] ss:$24 sps:$4 sm:$0xff]  }
 0x482   :  { %7432 = vmatpush3.bf16.msra.mxu0 %v7969_v23  ;;  %v8002_v23 = vld [vmem:[%s11407_s6 + $0x1e8] ss:$24 sps:$4 sm:$0xff]  }
 0x53c   :  { %v1793_v28 = vpop.f32.mrb[48].mxu0 }
 0x53d   :  { %v1794_v38 = vadd.f32 %v1793_v28, %v1592_v13  ;;  %v1795_v39 = vpop.f32.mrb[49].mxu0  ;;  %v7980_v13 = vld [vmem:[%s11407_s6 + $0x6c] ss:$24 sps:$4 sm:$0xff]  }
 0x53e   :  { %v1796_v54 = vadd.f32 %v1795_v39, %v1596_v17  ;;  %v1797_v57 = vpop.f32.mrb[50].mxu0  ;;  %v7978_v17 = vld [vmem:[%s11407_s6 + $0x68] ss:$24 sps:$4 sm:$0xff]   ;;  %v7986_v28 = vld [vmem:[%s11407_s6 + $0xcc] ss:$24 sps:$4 sm:$0xff]  }
 0x53f   :  { %v1802_v0 = vadd.f32 %v1800_v22, %v1794_v38  ;;  %v1798_v16 = vpop.f32.mrb[51].mxu0  ;;  %v7981_v22 = vld [vmem:[%s11407_s6 + $0x98] ss:$24 sps:$4 sm:$0xff]   ;;  %v7989_v38 = vld [vmem:[%s11407_s6 + $0xfc] ss:$24 sps:$4 sm:$0xff]  }
 0x540   :  { %v1803_v11 = vadd.f32 %v1801_v35, %v1796_v54  ;;  %v7984_v35 = vld [vmem:[%s11407_s6 + $0xc8] ss:$24 sps:$4 sm:$0xff]   ;;  %v7987_v39 = vld [vmem:[%s11407_s6 + $0xf8] ss:$24 sps:$4 sm:$0xff]   ;;  %v7992_v54 = vld [vmem:[%s11407_s6 + $0x12c] ss:$24 sps:$4 sm:$0xff]  }
 0x541   :  { %v9657_v21 = vpack.c.bf16 %v1802_v0, %v1802_v0  ;;  %v7990_v57 = vld [vmem:[%s11407_s6 + $0x128] ss:$24 sps:$4 sm:$0xff]   ;;  %v7995_v0 = vld [vmem:[%s11407_s6 + $0x15c] ss:$24 sps:$4 sm:$0xff]   ;;  %v7993_v16 = vld [vmem:[%s11407_s6 + $0x158] ss:$24 sps:$4 sm:$0xff]  }
 0x542   :  { %v1805_v63 = vpack.c.bf16 %v1803_v11, %v1803_v11  ;;  %v7998_v11 = vld [vmem:[%s11407_s6 + $0x18c] ss:$24 sps:$4 sm:$0xff]  }
 0x543   :  { %v1840_v29 = vshrl.u32 %v9657_v21, 16 }
 0x544   :  { %v1843_v27 = vshrl.u32 %v1805_v63, 16 }
 0x546   :  { %2050 = vmatprep.mubr.bf16.mxu1 %v1843_v27  ;;  %v8001_v27 = vld [vmem:[%s11407_s6 + $0x1bc] ss:$24 sps:$4 sm:$0xff]  }
 0x547   :  { %2051 = vmatmul.mubr.bf16.vlgmr.msra.gmra.mrb[28].mxu1 %v1840_v29  ;;  %v7999_v29 = vld [vmem:[%s11407_s6 + $0x1b8] ss:$24 sps:$4 sm:$0xff]  }
 0x548   :  { %7620 = vmatpush3.bf16.xpose.msra.mxu1 %v2233_v32  ;;  %v7970_v32 = vld [vmem:[%s11408_s8 + $0x258] ss:$20 sps:$4 sm:$0xff]   ;;  %7627 = vmatprep.mubr.msk.bf16.mxu1 %vm8626_vm1, %v8625_v3 }
 0x549   :  { %7621 = vmatprep.subr.bf16.mxu1 %v8625_v3  ;;  %7433 = vmatprep.subr.bf16.mxu0 %v7970_v32  ;;  %v8007_v32 = vld [vmem:[%s11407_s6 + $0x21c] ss:$24 sps:$4 sm:$0xff]  }
 0x54a   :  { %7434 = vmatpush3.bf16.msra.mxu0 %v7971_v2  ;;  %v8005_v2 = vld [vmem:[%s11407_s6 + $0x218] ss:$24 sps:$4 sm:$0xff]  }
 0x54b   :  { %2483 = vmatprep.subr.bf16.mxu0 %v7974_v5  ;;  %v8010_v5 = vld [vmem:[%s11407_s6 + $0x24c] ss:$24 sps:$4 sm:$0xff]  }
 0x550   :  { %7622 = vmatpush3.bf16.xpose.msra.mxu1 %v2234_v6  ;;  %v1838_v6 = vld [vmem:[%s11409_s7] sm:$0x3] }
 0x551   :  { %7623 = vmatprep.subr.bf16.mxu1 %v8625_v3  ;;  %v2011_v33 = vrot.slane %v1838_v6, %v9080_v10  ;;  %v2015_v53 = vrot.slane %v1838_v6, %v9028_v19  ;;  %v8008_v6 = vld [vmem:[%s11407_s6 + $0x248] ss:$24 sps:$4 sm:$0xff]  }
 0x558   :  { %7624 = vmatpush3.bf16.xpose.msra.mxu1 %v2235_v14 }
 0x559   :  { %7625 = vmatprep.subr.bf16.mxu1 %v8625_v3 }
 0x560   :  { %7626 = vmatpush3.bf16.xpose.msra.mxu1 %v2236_v34 }
 0x61a   :  { %v2052_v14 = vpop.f32.mrb[28].mxu1 }
 0x61b   :  { %v2053_v26 = vadd.f32 %v2052_v14, %v2011_v33  ;;  %v2054_v30 = vpop.f32.mrb[29].mxu1  ;;  %v8013_v33 = vld [vmem:[%s11407_s6 + $0x27c] ss:$24 sps:$4 sm:$0xff]   ;;  %v8016_v14 = vld [vmem:[%s11407_s6 + $0x2ac] ss:$24 sps:$4 sm:$0xff]  }
 0x61c   :  { %v2055_v34 = vadd.f32 %v2054_v30, %v2015_v53  ;;  %v2056_v31 = vpop.f32.mrb[30].mxu1  ;;  %v8011_v53 = vld [vmem:[%s11407_s6 + $0x278] ss:$24 sps:$4 sm:$0xff]   ;;  %v8019_v30 = vld [vmem:[%s11407_s6 + $0x2dc] ss:$24 sps:$4 sm:$0xff]  }
 0x61d   :  { %v2059_v37 = vmax.f32 %v2053_v26, 0.0  ;;  %v2057_v40 = vpop.f32.mrb[31].mxu1  ;;  %v8014_v26 = vld [vmem:[%s11407_s6 + $0x2a8] ss:$24 sps:$4 sm:$0xff]   ;;  %v8020_v31 = vld [vmem:[%s11408_s8 + $0x144] ss:$20 sps:$4 sm:$0xff]  }
 0x61e   :  { %v2060_v7 = vmax.f32 %v2055_v34, 0.0  ;;  %v8017_v34 = vld [vmem:[%s11407_s6 + $0x2d8] ss:$24 sps:$4 sm:$0xff]   ;;  %7446 = vmatprep.subr.bf16.mxu1 %v8020_v31  ;;  %v2095_v40 = vld [vmem:[%s11410_s9] sm:$0x1] }
 0x61f   :  { %v2061_v61 = vpack.c.bf16 %v2059_v37, %v2059_v37 }
 0x620   :  { %v2062_v50 = vpack.c.bf16 %v2060_v7, %v2060_v7 }
 0x622   :  { %2224 = vmatprep.mubr.bf16.mxu0 %v2062_v50 }
 0x623   :  { %2225 = vmatmul.mubr.bf16.vlgmr.msra.gmra.mrb[52].mxu0 %v2061_v61 }
 0x624   :  { %2484 = vmatpush1.bf16.msra.mxu0 %v7972_v9  ;;  %2515 = vmatprep.mubr.bf16.mxu0 %v1805_v63  ;;  %v7996_v63 = vld [vmem:[%s11407_s6 + $0x188] ss:$24 sps:$4 sm:$0xff]  }
 0x625   :  { %2485 = vmatprep.subr.bf16.mxu0 %v7977_v12 }
 0x628   :  { %2486 = vmatpush1.bf16.msra.mxu0 %v7975_v1 }
 0x629   :  { %2487 = vmatprep.subr.bf16.mxu0 %v7980_v13  ;;  %v8022_v13 = vld [vmem:[%s11408_s8 + $0x16c] ss:$20 sps:$4 sm:$0xff]  }
 0x62c   :  { %2488 = vmatpush1.bf16.msra.mxu0 %v7978_v17  ;;  %v8023_v17 = vld [vmem:[%s11408_s8 + $0x2c] ss:$20 sps:$4 sm:$0xff]  }
 0x62d   :  { %2489 = vmatprep.subr.bf16.mxu0 %v7983_v59  ;;  %v8024_v59 = vld [vmem:[%s11408_s8 + $0x194] ss:$20 sps:$4 sm:$0xff]  }
 0x630   :  { %2490 = vmatpush1.bf16.msra.mxu0 %v7981_v22  ;;  %v8025_v22 = vld [vmem:[%s11408_s8 + $0x54] ss:$20 sps:$4 sm:$0xff]  }
 0x631   :  { %2491 = vmatprep.subr.bf16.mxu0 %v7986_v28  ;;  %v8026_v28 = vld [vmem:[%s11408_s8 + $0x1bc] ss:$20 sps:$4 sm:$0xff]  }
 0x634   :  { %2492 = vmatpush1.bf16.msra.mxu0 %v7984_v35  ;;  %v8027_v35 = vld [vmem:[%s11408_s8 + $0x7c] ss:$20 sps:$4 sm:$0xff]  }
 0x635   :  { %2493 = vmatprep.subr.bf16.mxu0 %v7989_v38  ;;  %v8028_v38 = vld [vmem:[%s11408_s8 + $0x1e4] ss:$20 sps:$4 sm:$0xff]  }
 0x638   :  { %2494 = vmatpush1.bf16.msra.mxu0 %v7987_v39  ;;  %v8029_v39 = vld [vmem:[%s11408_s8 + $0xa4] ss:$20 sps:$4 sm:$0xff]  }
 0x639   :  { %2495 = vmatprep.subr.bf16.mxu0 %v7992_v54  ;;  %v8030_v54 = vld [vmem:[%s11408_s8 + $0x20c] ss:$20 sps:$4 sm:$0xff]  }
 0x63c   :  { %2496 = vmatpush1.bf16.msra.mxu0 %v7990_v57  ;;  %v8031_v57 = vld [vmem:[%s11408_s8 + $0xcc] ss:$20 sps:$4 sm:$0xff]  }
 0x63d   :  { %2497 = vmatprep.subr.bf16.mxu0 %v7995_v0  ;;  %v8032_v0 = vld [vmem:[%s11408_s8 + $0x234] ss:$20 sps:$4 sm:$0xff]  }
 0x640   :  { %2498 = vmatpush1.bf16.msra.mxu0 %v7993_v16  ;;  %v8033_v16 = vld [vmem:[%s11408_s8 + $0xf4] ss:$20 sps:$4 sm:$0xff]  }
 0x641   :  { %2499 = vmatprep.subr.bf16.mxu0 %v7998_v11  ;;  %v8034_v11 = vld [vmem:[%s11408_s8 + $0x25c] ss:$20 sps:$4 sm:$0xff]  }
 0x644   :  { %2500 = vmatpush1.bf16.msra.mxu0 %v7996_v63  ;;  %v8035_v63 = vld [vmem:[%s11408_s8 + $0x11c] ss:$20 sps:$4 sm:$0xff]  }
 0x645   :  { %2501 = vmatprep.subr.bf16.mxu0 %v8001_v27  ;;  %v8038_v27 = vld [vmem:[%s11407_s6 + $0x14] ss:$24 sps:$4 sm:$0xff]  }
 0x648   :  { %2502 = vmatpush1.bf16.msra.mxu0 %v7999_v29  ;;  %v2311_v29 = vld [vmem:[%s11409_s7 + $0x2] sm:$0x3] }
 0x649   :  { %2503 = vmatprep.subr.bf16.mxu0 %v8004_v24  ;;  %v2476_v24 = vrot.slane %v2311_v29, %v9080_v10 }
 0x64c   :  { %2504 = vmatpush1.bf16.msra.mxu0 %v8002_v23  ;;  %v2480_v23 = vrot.slane %v2311_v29, %v9028_v19  ;;  %v8071_v29 = vld [vmem:[%s11407_s6 + $0x224] ss:$24 sps:$4 sm:$0xff]  }
 0x64d   :  { %2505 = vmatprep.subr.bf16.mxu0 %v8007_v32  ;;  %v2752_v32 = vshrl.u32 %v8938_v49, 16 }
 0x650   :  { %2506 = vmatpush1.bf16.msra.mxu0 %v8005_v2  ;;  %v2755_v2 = vshll.u32 %v8938_v49, 16  ;;  %v8041_v49 = vld [vmem:[%s11407_s6 + $0x44] ss:$24 sps:$4 sm:$0xff]  }
 0x651   :  { %2507 = vmatprep.subr.bf16.mxu0 %v8010_v5 }
 0x654   :  { %2508 = vmatpush1.bf16.msra.mxu0 %v8008_v6 }
 0x655   :  { %2509 = vmatprep.subr.bf16.mxu0 %v8013_v33 }
 0x658   :  { %2510 = vmatpush1.bf16.msra.mxu0 %v8011_v53 }
 0x659   :  { %2511 = vmatprep.subr.bf16.mxu0 %v8016_v14 }
 0x65c   :  { %2512 = vmatpush1.bf16.msra.mxu0 %v8014_v26  ;;  %v2754_v26 = vrot.slane %v2752_v32, 2  ;;  %v8072_v32 = vld [vmem:[%s11407_s6 + $0x250] ss:$24 sps:$4 sm:$0xff]  }
 0x65d   :  { %2513 = vmatprep.subr.bf16.mxu0 %v8019_v30  ;;  %v2757_v30 = vrot.slane %v2755_v2, 3  ;;  %v8077_v2 = vld [vmem:[%s11407_s6 + $0x284] ss:$24 sps:$4 sm:$0xff]  }
 0x660   :  { %2514 = vmatpush1.bf16.msra.mxu0 %v8017_v34 }
 0x663   :  { %2516 = vmatmul.mubr.bf16.vlgmr.msra.gmra.mrb[56].mxu0 %v9657_v21  ;;  %v8021_v21 = vld [vmem:[%s11408_s8 + $0x4] ss:$20 sps:$4 sm:$0xff]  }
 0x6f6   :  { %v7435_v37 = vpop.f32.mrb[52].mxu0 }
 0x6f7   :  { %v7436_v7 = vpop.f32.mrb[53].mxu0 }
 0x6f8   :  { %v7437_v50 = vadd.f32 %v7436_v7, %v7435_v37  ;;  %v7438_v9 = vpop.f32.mrb[54].mxu0  ;;  %v8036_v7 = vld [vmem:[%s11407_s6 + $0x10] ss:$24 sps:$4 sm:$0xff]  }
 0x6f9   :  { %v7439_v61 = vpop.f32.mrb[55].mxu0 }
 0x6fa   :  { %v2227_v12 = vadd.f32 %v7437_v50, %v2095_v40  ;;  %v2758_v50 = vor.u32 %v2757_v30, %v2754_v26  ;;  %v8039_v61 = vld [vmem:[%s11407_s6 + $0x40] ss:$24 sps:$4 sm:$0xff]   ;;  %v8083_v26 = vld [vmem:[%s11407_s6 + $0x2e4] ss:$24 sps:$4 sm:$0xff]  }
 0x6fc   :  { %v2232_v1 = vpack.c.bf16 %v2227_v12, %v2227_v12  ;;  %v8044_v12 = vld [vmem:[%s11407_s6 + $0x74] ss:$24 sps:$4 sm:$0xff]  }
 0x6fe   :  { %7628 = vmatmul.mubr.bf16.vlgmr.msra.gmra.mrb[32].mxu1 %v2232_v1  ;;  %v8047_v1 = vld [vmem:[%s11407_s6 + $0xa4] ss:$24 sps:$4 sm:$0xff]  }
 0x6ff   :  { %7447 = vmatpush3.bf16.msra.mxu1 %v8021_v21  ;;  %v8042_v21 = vld [vmem:[%s11407_s6 + $0x70] ss:$24 sps:$4 sm:$0xff]  }
 0x700   :  { %7448 = vmatprep.subr.bf16.mxu1 %v8022_v13  ;;  %v8045_v13 = vld [vmem:[%s11407_s6 + $0xa0] ss:$24 sps:$4 sm:$0xff]  }
 0x703   :  { %7449 = vmatpush3.bf16.msra.mxu1 %v8023_v17  ;;  %v8050_v17 = vld [vmem:[%s11407_s6 + $0xd4] ss:$24 sps:$4 sm:$0xff]  }
 0x704   :  { %7450 = vmatprep.subr.bf16.mxu1 %v8024_v59  ;;  %v8048_v59 = vld [vmem:[%s11407_s6 + $0xd0] ss:$24 sps:$4 sm:$0xff]  }
 0x707   :  { %7451 = vmatpush3.bf16.msra.mxu1 %v8025_v22  ;;  %v8053_v22 = vld [vmem:[%s11407_s6 + $0x104] ss:$24 sps:$4 sm:$0xff]  }
 0x708   :  { %7452 = vmatprep.subr.bf16.mxu1 %v8026_v28  ;;  %v8051_v28 = vld [vmem:[%s11407_s6 + $0x100] ss:$24 sps:$4 sm:$0xff]  }
 0x70b   :  { %7453 = vmatpush3.bf16.msra.mxu1 %v8027_v35  ;;  %v8056_v35 = vld [vmem:[%s11407_s6 + $0x134] ss:$24 sps:$4 sm:$0xff]  }
 0x70c   :  { %7454 = vmatprep.subr.bf16.mxu1 %v8028_v38  ;;  %v8054_v38 = vld [vmem:[%s11407_s6 + $0x130] ss:$24 sps:$4 sm:$0xff]  }
 0x70f   :  { %7455 = vmatpush3.bf16.msra.mxu1 %v8029_v39  ;;  %v8059_v39 = vld [vmem:[%s11407_s6 + $0x164] ss:$24 sps:$4 sm:$0xff]  }
 0x710   :  { %7456 = vmatprep.subr.bf16.mxu1 %v8030_v54  ;;  %v8057_v54 = vld [vmem:[%s11407_s6 + $0x160] ss:$24 sps:$4 sm:$0xff]  }
 0x713   :  { %7457 = vmatpush3.bf16.msra.mxu1 %v8031_v57  ;;  %v8062_v57 = vld [vmem:[%s11407_s6 + $0x194] ss:$24 sps:$4 sm:$0xff]  }
 0x714   :  { %7458 = vmatprep.subr.bf16.mxu1 %v8032_v0  ;;  %v8060_v0 = vld [vmem:[%s11407_s6 + $0x190] ss:$24 sps:$4 sm:$0xff]  }
 0x717   :  { %7459 = vmatpush3.bf16.msra.mxu1 %v8033_v16  ;;  %v8065_v16 = vld [vmem:[%s11407_s6 + $0x1c4] ss:$24 sps:$4 sm:$0xff]  }
 0x718   :  { %7460 = vmatprep.subr.bf16.mxu1 %v8034_v11  ;;  %v8063_v11 = vld [vmem:[%s11407_s6 + $0x1c0] ss:$24 sps:$4 sm:$0xff]  }
 0x71b   :  { %7461 = vmatpush3.bf16.msra.mxu1 %v8035_v63  ;;  %v8068_v63 = vld [vmem:[%s11407_s6 + $0x1f4] ss:$24 sps:$4 sm:$0xff]  }
 0x71c   :  { %2921 = vmatprep.subr.bf16.mxu1 %v8038_v27  ;;  %v8066_v27 = vld [vmem:[%s11407_s6 + $0x1f0] ss:$24 sps:$4 sm:$0xff]  }
 0x736   :  { %v2517_v5 = vpop.f32.mrb[56].mxu0 }
 0x737   :  { %v2518_v6 = vadd.f32 %v2517_v5, %v2476_v24  ;;  %v2519_v33 = vpop.f32.mrb[57].mxu0  ;;  %v8069_v24 = vld [vmem:[%s11407_s6 + $0x220] ss:$24 sps:$4 sm:$0xff]  }
 0x738   :  { %v2520_v53 = vadd.f32 %v2519_v33, %v2480_v23  ;;  %v2521_v14 = vpop.f32.mrb[58].mxu0  ;;  %v8074_v23 = vld [vmem:[%s11407_s6 + $0x254] ss:$24 sps:$4 sm:$0xff]   ;;  %v8075_v5 = vld [vmem:[%s11407_s6 + $0x280] ss:$24 sps:$4 sm:$0xff]   ;;  %v2744_v33 = vshrl.u32 %v9062_v8, 16 }
 0x739   :  { %v2524_v34 = vmax.f32 %v2518_v6, 0.0  ;;  %v2522_v31 = vpop.f32.mrb[59].mxu0  ;;  %v8080_v6 = vld [vmem:[%s11407_s6 + $0x2b4] ss:$24 sps:$4 sm:$0xff]   ;;  %v8078_v14 = vld [vmem:[%s11407_s6 + $0x2b0] ss:$24 sps:$4 sm:$0xff]  }
 0x73a   :  { %v2525_v37 = vmax.f32 %v2520_v53, 0.0  ;;  %v2747_v53 = vshll.u32 %v9062_v8, 16  ;;  %v2746_v30 = vrot.slane %v2744_v33, 2  ;;  %v8081_v31 = vld [vmem:[%s11407_s6 + $0x2e0] ss:$24 sps:$4 sm:$0xff]  }
 0x73b   :  { %v2526_v9 = vpack.c.bf16 %v2524_v34, %v2524_v34  ;;  %v8084_v8 = vld [vmem:[%s11408_s8 + $0x8] ss:$20 sps:$4 sm:$0xff]  }
 0x73c   :  { %v2527_v40 = vpack.c.bf16 %v2525_v37, %v2525_v37  ;;  %v2749_v34 = vrot.slane %v2747_v53, 3 }
 0x73e   :  { %2689 = vmatprep.mubr.bf16.mxu1 %v2527_v40  ;;  %v2750_v37 = vor.u32 %v2749_v34, %v2746_v30  ;;  %v8086_v40 = vld [vmem:[%s11408_s8 + $0xc] ss:$20 sps:$4 sm:$0xff]   ;;  %v8132_v30 = vld [vmem:[%s11408_s8 + $0x150] ss:$20 sps:$4 sm:$0xff]  }
 0x73f   :  { %2690 = vmatmul.mubr.bf16.vlgmr.msra.gmra.mrb[36].mxu1 %v2526_v9  ;;  %3170 = vmatprep.subr.bf16.mxu0 %v8086_v40  ;;  %v8092_v9 = vld [vmem:[%s11408_s8 + $0x5c] ss:$20 sps:$4 sm:$0xff]   ;;  %v8137_v40 = vld [vmem:[%s11408_s8 + $0x60] ss:$20 sps:$4 sm:$0xff]  }
 0x740   :  { %2922 = vmatpush1.bf16.msra.mxu1 %v8036_v7  ;;  %2953 = vmatprep.mubr.bf16.mxu1 %v2758_v50  ;;  %v8089_v7 = vld [vmem:[%s11408_s8 + $0x34] ss:$20 sps:$4 sm:$0xff]   ;;  %v8087_v50 = vld [vmem:[%s11408_s8 + $0x30] ss:$20 sps:$4 sm:$0xff]  }
 0x741   :  { %2923 = vmatprep.subr.bf16.mxu1 %v8041_v49  ;;  %3171 = vmatpush1.bf16.msra.mxu0 %v8084_v8  ;;  %v8090_v49 = vld [vmem:[%s11408_s8 + $0x58] ss:$20 sps:$4 sm:$0xff]   ;;  %v8133_v34 = vld [vmem:[%s11408_s8 + $0x10] ss:$20 sps:$4 sm:$0xff]   ;;  %v8136_v8 = vld [vmem:[%s11408_s8 + $0x1a0] ss:$20 sps:$4 sm:$0xff]  }
 0x742   :  { %3172 = vmatprep.subr.bf16.mxu0 %v8089_v7  ;;  %v8138_v7 = vld [vmem:[%s11408_s8 + $0x1c8] ss:$20 sps:$4 sm:$0xff]  }
 0x744   :  { %2924 = vmatpush1.bf16.msra.mxu1 %v8039_v61  ;;  %v8095_v61 = vld [vmem:[%s11408_s8 + $0x84] ss:$20 sps:$4 sm:$0xff]  }
 0x745   :  { %2925 = vmatprep.subr.bf16.mxu1 %v8044_v12  ;;  %3173 = vmatpush1.bf16.msra.mxu0 %v8087_v50  ;;  %v8093_v12 = vld [vmem:[%s11408_s8 + $0x80] ss:$20 sps:$4 sm:$0xff]   ;;  %v8139_v50 = vld [vmem:[%s11408_s8 + $0x88] ss:$20 sps:$4 sm:$0xff]  }
 0x746   :  { %3174 = vmatprep.subr.bf16.mxu0 %v8092_v9  ;;  %v8140_v9 = vld [vmem:[%s11408_s8 + $0x1f0] ss:$20 sps:$4 sm:$0xff]  }
 0x748   :  { %2926 = vmatpush1.bf16.msra.mxu1 %v8042_v21  ;;  %v8098_v21 = vld [vmem:[%s11408_s8 + $0xac] ss:$20 sps:$4 sm:$0xff]  }
 0x749   :  { %2927 = vmatprep.subr.bf16.mxu1 %v8047_v1  ;;  %3175 = vmatpush1.bf16.msra.mxu0 %v8090_v49  ;;  %v8096_v1 = vld [vmem:[%s11408_s8 + $0xa8] ss:$20 sps:$4 sm:$0xff]   ;;  %v8141_v49 = vld [vmem:[%s11408_s8 + $0xb0] ss:$20 sps:$4 sm:$0xff]  }
 0x74a   :  { %3176 = vmatprep.subr.bf16.mxu0 %v8095_v61  ;;  %v8142_v61 = vld [vmem:[%s11408_s8 + $0x218] ss:$20 sps:$4 sm:$0xff]  }
 0x74c   :  { %2928 = vmatpush1.bf16.msra.mxu1 %v8045_v13  ;;  %v8101_v13 = vld [vmem:[%s11408_s8 + $0xd4] ss:$20 sps:$4 sm:$0xff]  }
 0x74d   :  { %2929 = vmatprep.subr.bf16.mxu1 %v8050_v17  ;;  %3177 = vmatpush1.bf16.msra.mxu0 %v8093_v12  ;;  %v8099_v17 = vld [vmem:[%s11408_s8 + $0xd0] ss:$20 sps:$4 sm:$0xff]   ;;  %v8143_v12 = vld [vmem:[%s11408_s8 + $0xd8] ss:$20 sps:$4 sm:$0xff]  }
 0x74e   :  { %3178 = vmatprep.subr.bf16.mxu0 %v8098_v21  ;;  %v8144_v21 = vld [vmem:[%s11408_s8 + $0x240] ss:$20 sps:$4 sm:$0xff]  }
 0x750   :  { %2930 = vmatpush1.bf16.msra.mxu1 %v8048_v59  ;;  %v8104_v59 = vld [vmem:[%s11408_s8 + $0xfc] ss:$20 sps:$4 sm:$0xff]  }
 0x751   :  { %2931 = vmatprep.subr.bf16.mxu1 %v8053_v22  ;;  %3179 = vmatpush1.bf16.msra.mxu0 %v8096_v1  ;;  %v8102_v22 = vld [vmem:[%s11408_s8 + $0xf8] ss:$20 sps:$4 sm:$0xff]  }
 0x752   :  { %3180 = vmatprep.subr.bf16.mxu0 %v8101_v13  ;;  %v2560_v13 = vld [vmem:[%s11410_s9 + $0x1] sm:$0x1] }
 0x754   :  { %2932 = vmatpush1.bf16.msra.mxu1 %v8051_v28  ;;  %v8107_v28 = vld [vmem:[%s11408_s8 + $0x124] ss:$20 sps:$4 sm:$0xff]  }
 0x755   :  { %2933 = vmatprep.subr.bf16.mxu1 %v8056_v35  ;;  %3181 = vmatpush1.bf16.msra.mxu0 %v8099_v17  ;;  %v8105_v35 = vld [vmem:[%s11408_s8 + $0x120] ss:$20 sps:$4 sm:$0xff]  }
 0x756   :  { %3182 = vmatprep.subr.bf16.mxu0 %v8104_v59 }
 0x758   :  { %2934 = vmatpush1.bf16.msra.mxu1 %v8054_v38  ;;  %v8110_v38 = vld [vmem:[%s11408_s8 + $0x14c] ss:$20 sps:$4 sm:$0xff]  }
 0x759   :  { %2935 = vmatprep.subr.bf16.mxu1 %v8059_v39  ;;  %3183 = vmatpush1.bf16.msra.mxu0 %v8102_v22  ;;  %v8108_v39 = vld [vmem:[%s11408_s8 + $0x148] ss:$20 sps:$4 sm:$0xff]  }
 0x75a   :  { %3184 = vmatprep.subr.bf16.mxu0 %v8107_v28 }
 0x75c   :  { %2936 = vmatpush1.bf16.msra.mxu1 %v8057_v54  ;;  %v8113_v54 = vld [vmem:[%s11408_s8 + $0x174] ss:$20 sps:$4 sm:$0xff]  }
 0x75d   :  { %2937 = vmatprep.subr.bf16.mxu1 %v8062_v57  ;;  %3185 = vmatpush1.bf16.msra.mxu0 %v8105_v35  ;;  %v8111_v57 = vld [vmem:[%s11408_s8 + $0x170] ss:$20 sps:$4 sm:$0xff]  }
 0x75e   :  { %3186 = vmatprep.subr.bf16.mxu0 %v8110_v38  ;;  %v2731_v38 = vld [vmem:[%s11409_s7 + $0x4] sm:$0x3] }
 0x760   :  { %2938 = vmatpush1.bf16.msra.mxu1 %v8060_v0  ;;  %v8116_v0 = vld [vmem:[%s11408_s8 + $0x19c] ss:$20 sps:$4 sm:$0xff]  }
 0x761   :  { %2939 = vmatprep.subr.bf16.mxu1 %v8065_v16  ;;  %3187 = vmatpush1.bf16.msra.mxu0 %v8108_v39  ;;  %v8114_v16 = vld [vmem:[%s11408_s8 + $0x198] ss:$20 sps:$4 sm:$0xff]   ;;  %v2736_v39 = vrot.slane %v2731_v38, %v9080_v10 }
 0x762   :  { %3188 = vmatprep.subr.bf16.mxu0 %v8113_v54  ;;  %v2740_v54 = vrot.slane %v2731_v38, %v9028_v19  ;;  %v8195_v38 = vld [vmem:[%s11401_s4 + $0x90] ss:$36 sps:$4 sm:$0xff]  }
 0x764   :  { %2940 = vmatpush1.bf16.msra.mxu1 %v8063_v11  ;;  %v8119_v11 = vld [vmem:[%s11408_s8 + $0x1c4] ss:$20 sps:$4 sm:$0xff]  }
 0x765   :  { %2941 = vmatprep.subr.bf16.mxu1 %v8068_v63  ;;  %3189 = vmatpush1.bf16.msra.mxu0 %v8111_v57  ;;  %v8117_v63 = vld [vmem:[%s11408_s8 + $0x1c0] ss:$20 sps:$4 sm:$0xff]  }
 0x766   :  { %3190 = vmatprep.subr.bf16.mxu0 %v8116_v0 }
 0x768   :  { %2942 = vmatpush1.bf16.msra.mxu1 %v8066_v27  ;;  %v8122_v27 = vld [vmem:[%s11408_s8 + $0x1ec] ss:$20 sps:$4 sm:$0xff]  }
 0x769   :  { %2943 = vmatprep.subr.bf16.mxu1 %v8071_v29  ;;  %3191 = vmatpush1.bf16.msra.mxu0 %v8114_v16  ;;  %v8120_v29 = vld [vmem:[%s11408_s8 + $0x1e8] ss:$20 sps:$4 sm:$0xff]  }
 0x76a   :  { %3192 = vmatprep.subr.bf16.mxu0 %v8119_v11 }
 0x76c   :  { %2944 = vmatpush1.bf16.msra.mxu1 %v8069_v24  ;;  %v8125_v24 = vld [vmem:[%s11408_s8 + $0x214] ss:$20 sps:$4 sm:$0xff]  }
 0x76d   :  { %2945 = vmatprep.subr.bf16.mxu1 %v8074_v23  ;;  %3193 = vmatpush1.bf16.msra.mxu0 %v8117_v63  ;;  %v8123_v23 = vld [vmem:[%s11408_s8 + $0x210] ss:$20 sps:$4 sm:$0xff]  }
 0x76e   :  { %3194 = vmatprep.subr.bf16.mxu0 %v8122_v27 }
 0x770   :  { %2946 = vmatpush1.bf16.msra.mxu1 %v8072_v32 }
 0x771   :  { %2947 = vmatprep.subr.bf16.mxu1 %v8077_v2  ;;  %3195 = vmatpush1.bf16.msra.mxu0 %v8120_v29  ;;  %v8128_v2 = vld [vmem:[%s11408_s8 + $0x23c] ss:$20 sps:$4 sm:$0xff]  }
 0x772   :  { %3196 = vmatprep.subr.bf16.mxu0 %v8125_v24 }
 0x774   :  { %2948 = vmatpush1.bf16.msra.mxu1 %v8075_v5 }
 0x775   :  { %2949 = vmatprep.subr.bf16.mxu1 %v8080_v6  ;;  %3197 = vmatpush1.bf16.msra.mxu0 %v8123_v23  ;;  %v8126_v6 = vld [vmem:[%s11408_s8 + $0x238] ss:$20 sps:$4 sm:$0xff]  }
 0x776   :  { %3198 = vmatprep.subr.bf16.mxu0 %v8128_v2  ;;  %v8145_v2 = vld [vmem:[%s11408_s8 + $0x100] ss:$20 sps:$4 sm:$0xff]  }
 0x778   :  { %2950 = vmatpush1.bf16.msra.mxu1 %v8078_v14  ;;  %v8131_v14 = vld [vmem:[%s11408_s8 + $0x264] ss:$20 sps:$4 sm:$0xff]  }
 0x779   :  { %2951 = vmatprep.subr.bf16.mxu1 %v8083_v26  ;;  %3199 = vmatpush1.bf16.msra.mxu0 %v8126_v6  ;;  %v8129_v26 = vld [vmem:[%s11408_s8 + $0x260] ss:$20 sps:$4 sm:$0xff]   ;;  %v8147_v6 = vld [vmem:[%s11408_s8 + $0x128] ss:$20 sps:$4 sm:$0xff]  }
 0x77a   :  { %3200 = vmatprep.subr.bf16.mxu0 %v8131_v14  ;;  %v8150_v14 = vld [vmem:[%s11413_s10 + $0x10] sm:$0xff]  }
 0x77c   :  { %2952 = vmatpush1.bf16.msra.mxu1 %v8081_v31  ;;  %v8134_v31 = vld [vmem:[%s11408_s8 + $0x178] ss:$20 sps:$4 sm:$0xff]  }
 0x77d   :  { %3201 = vmatpush1.bf16.msra.mxu0 %v8129_v26  ;;  %7468 = vmatprep.subr.bf16.mxu1 %v8132_v30  ;;  %v8151_v26 = vld [vmem:[%s11413_s10 + $0x18] sm:$0xff]   ;;  %v8152_v30 = vld [vmem:[%s11413_s10 + $0x20] sm:$0xff]  }
 0x77e   :  { %7631 = vmatprep.subr.bf16.mxu0 %v8625_v3 }
 0x77f   :  { %2954 = vmatmul.mubr.bf16.vlgmr.msra.gmra.mrb[40].mxu1 %v2750_v37  ;;  %v8135_v37 = vld [vmem:[%s11408_s8 + $0x38] ss:$20 sps:$4 sm:$0xff]  }
 0x780   :  { %7469 = vmatpush3.bf16.msra.mxu1 %v8133_v34  ;;  %v8153_v34 = vld [vmem:[%s11413_s10 + $0x28] sm:$0xff]  }
 0x781   :  { %7470 = vmatprep.subr.bf16.mxu1 %v8134_v31  ;;  %v2998_v31 = vld [vmem:[%s11410_s9 + $0x2] sm:$0x3] }
 0x784   :  { %7471 = vmatpush3.bf16.msra.mxu1 %v8135_v37  ;;  %v3003_v37 = vrot.slane %v2998_v31, %v9080_v10 }
 0x785   :  { %7472 = vmatprep.subr.bf16.mxu1 %v8136_v8  ;;  %v3007_v8 = vrot.slane %v2998_v31, %v9028_v19  ;;  %v8228_v31 = vld [vmem:[%s11401_s4 + $0x240] ss:$36 sps:$4 sm:$0xff]  }
 0x788   :  { %7473 = vmatpush3.bf16.msra.mxu1 %v8137_v40 }
 0x789   :  { %7474 = vmatprep.subr.bf16.mxu1 %v8138_v7 }
 0x78c   :  { %7475 = vmatpush3.bf16.msra.mxu1 %v8139_v50 }
 0x78d   :  { %7476 = vmatprep.subr.bf16.mxu1 %v8140_v9 }
 0x790   :  { %7477 = vmatpush3.bf16.msra.mxu1 %v8141_v49 }
 0x791   :  { %7478 = vmatprep.subr.bf16.mxu1 %v8142_v61 }
 0x794   :  { %7479 = vmatpush3.bf16.msra.mxu1 %v8143_v12 }
 0x795   :  { %7480 = vmatprep.subr.bf16.mxu1 %v8144_v21 }
 0x798   :  { %7481 = vmatpush3.bf16.msra.mxu1 %v8145_v2  ;;  %v8225_v2 = vld [vmem:[%s11401_s4 + $0x1f8] ss:$36 sps:$4 sm:$0xff]  }
 0x7d1   :  { %v2271_v32 = vpop.f32.mrb[32].mxu1 }
 0x7d2   :  { %2278 = vst.msk [vmem:[%s11411_s12] sm:$0x1] %vm2277_vm2, %v2271_v32  ;;  %v7629_v5 = vpop.f32.mrb[33].mxu1 }
 0x7d3   :  { %v2274_v33 = vpop.f32.mrb[34].mxu1  ;;  %v8146_v5 = vld [vmem:[%s11408_s8 + $0x268] ss:$20 sps:$4 sm:$0xff]  }
 0x7d4   :  { %v7630_v53 = vpop.f32.mrb[35].mxu1  ;;  %7482 = vmatprep.subr.bf16.mxu1 %v8146_v5  ;;  %v8148_v33 = vld [vmem:[%s11413_s10] sm:$0xff]  }
 0x7d5   :  { %7483 = vmatpush3.bf16.msra.mxu1 %v8147_v6  ;;  %v8149_v53 = vld [vmem:[%s11413_s10 + $0x8] sm:$0xff]   ;;  %v8227_v5 = vld [vmem:[%s11401_s4 + $0x1fc] ss:$36 sps:$4 sm:$0xff]  }
 0x812   :  { %v7462_v1 = vpop.f32.mrb[36].mxu1 }
 0x813   :  { %v7463_v17 = vpop.f32.mrb[37].mxu1 }
 0x814   :  { %v7464_v59 = vadd.f32 %v7463_v17, %v7462_v1  ;;  %v7465_v22 = vpop.f32.mrb[38].mxu1  ;;  %v8154_v1 = vld [vmem:[%s11413_s10 + $0x30] sm:$0xff]  }
 0x815   :  { %v7466_v28 = vpop.f32.mrb[39].mxu1  ;;  %v8158_v17 = vld [vmem:[%s11401_s4 + $0xc] ss:$36 sps:$4 sm:$0xff]   ;;  %v8185_v22 = vld [vmem:[%s11401_s4 + $0x4] ss:$36 sps:$4 sm:$0xff]  }
 0x816   :  { %v2692_v35 = vadd.f32 %v7464_v59, %v2560_v13  ;;  %v8155_v13 = vld [vmem:[%s11413_s10 + $0x38] sm:$0xff]   ;;  %v8183_v59 = vld [vmem:[%s11401_s4] ss:$36 sps:$4 sm:$0xff]   ;;  %3777 = vmatprep.subr.bf16.mxu1 %v8185_v22  ;;  %v8189_v28 = vld [vmem:[%s11401_s4 + $0x48] ss:$36 sps:$4 sm:$0xff]  }
 0x817   :  { %v8246_v22 = vld [vmem:[%s11401_s4 + $0x3f0] ss:$36 sps:$4 sm:$0xff]  }
 0x818   :  { %2698 = vst.msk [vmem:[%s11412_s13] sm:$0x1] %vm2697_vm3, %v2692_v35  ;;  %v8191_v35 = vld [vmem:[%s11401_s4 + $0x4c] ss:$36 sps:$4 sm:$0xff]  }
 0x852   :  { %v2955_v57 = vpop.f32.mrb[40].mxu1 }
 0x853   :  { %v2956_v0 = vadd.f32 %v2955_v57, %v2736_v39  ;;  %v2957_v16 = vpop.f32.mrb[41].mxu1  ;;  %v8197_v39 = vld [vmem:[%s11401_s4 + $0x94] ss:$36 sps:$4 sm:$0xff]   ;;  %v8203_v57 = vld [vmem:[%s11401_s4 + $0xdc] ss:$36 sps:$4 sm:$0xff]  }
 0x854   :  { %v2958_v11 = vadd.f32 %v2957_v16, %v2740_v54  ;;  %v2959_v63 = vpop.f32.mrb[42].mxu1  ;;  %v8201_v54 = vld [vmem:[%s11401_s4 + $0xd8] ss:$36 sps:$4 sm:$0xff]   ;;  %v8209_v16 = vld [vmem:[%s11401_s4 + $0x124] ss:$36 sps:$4 sm:$0xff]  }
 0x855   :  { %v2962_v27 = vmax.f32 %v2956_v0, 0.0  ;;  %v2960_v29 = vpop.f32.mrb[43].mxu1  ;;  %v8207_v0 = vld [vmem:[%s11401_s4 + $0x120] ss:$36 sps:$4 sm:$0xff]   ;;  %v8215_v63 = vld [vmem:[%s11401_s4 + $0x16c] ss:$36 sps:$4 sm:$0xff]  }
 0x856   :  { %v2963_v24 = vmax.f32 %v2958_v11, 0.0  ;;  %v8213_v11 = vld [vmem:[%s11401_s4 + $0x168] ss:$36 sps:$4 sm:$0xff]   ;;  %v8221_v29 = vld [vmem:[%s11401_s4 + $0x1b4] ss:$36 sps:$4 sm:$0xff]  }
 0x857   :  { %v2964_v32 = vpack.c.bf16 %v2962_v27, %v2962_v27  ;;  %v8219_v27 = vld [vmem:[%s11401_s4 + $0x1b0] ss:$36 sps:$4 sm:$0xff]  }
 0x858   :  { %v2965_v23 = vpack.c.bf16 %v2963_v24, %v2963_v24  ;;  %v7035_v24 = vld [vmem:[%s11404_s1 + $0x40] sm:$0xff] }
 0x859   :  { %v3514_v6 = vunpack.c.l.bf16 %v7035_v24 }
 0x85a   :  { %3202 = vmatprep.mubr.bf16.mxu0 %v2965_v23  ;;  %v7036_v23 = vld [vmem:[%s11404_s1 + $0x48] sm:$0xff] }
 0x85b   :  { %3203 = vmatmul.mubr.bf16.vlgmr.msra.gmra.mrb[60].mxu0 %v2964_v32  ;;  %v3530_v32 = vld [vmem:[%s11405_s3] sm:$0x3] }
 0x85c   :  { %7647 = vmatprep.mubr.msk.bf16.mxu0 %vm8626_vm1, %v8625_v3  ;;  %7632 = vmatpush3.bf16.msra.mxu0 %v8148_v33  ;;  %v3516_v33 = vunpack.c.l.bf16 %v7036_v23 }
 0x85d   :  { %7633 = vmatprep.subr.bf16.mxu0 %v8625_v3 }
 0x860   :  { %7634 = vmatpush3.bf16.msra.mxu0 %v8149_v53  ;;  %v10207_v53 = vrot.slane %v3530_v32, %v9080_v10 }
 0x861   :  { %7635 = vmatprep.subr.bf16.mxu0 %v8625_v3 }
 0x864   :  { %7636 = vmatpush3.bf16.msra.mxu0 %v8150_v14  ;;  %v3542_v14 = vadd.f32 %v10207_v53, %v3514_v6 }
 0x865   :  { %7637 = vmatprep.subr.bf16.mxu0 %v8625_v3 }
 0x868   :  { %7638 = vmatpush3.bf16.msra.mxu0 %v8151_v26  ;;  %v3544_v26 = vadd.f32 %v10207_v53, %v3516_v33  ;;  %v8161_v33 = vld [vmem:[%s11401_s4 + $0x54] ss:$36 sps:$4 sm:$0xff]  }
 0x869   :  { %7639 = vmatprep.subr.bf16.mxu0 %v8625_v3 }
 0x86c   :  { %7640 = vmatpush3.bf16.msra.mxu0 %v8152_v30  ;;  %v10211_v30 = vpack.c.bf16 %v3544_v26, %v3542_v14  ;;  %v8159_v14 = vld [vmem:[%s11401_s4 + $0x50] ss:$36 sps:$4 sm:$0xff]   ;;  %v8164_v26 = vld [vmem:[%s11401_s4 + $0x9c] ss:$36 sps:$4 sm:$0xff]  }
 0x86d   :  { %7641 = vmatprep.subr.bf16.mxu0 %v8625_v3 }
 0x870   :  { %7642 = vmatpush3.bf16.msra.mxu0 %v8153_v34  ;;  %v8230_v34 = vld [vmem:[%s11401_s4 + $0x244] ss:$36 sps:$4 sm:$0xff]  }
 0x871   :  { %7643 = vmatprep.subr.bf16.mxu0 %v8625_v3 }
 0x874   :  { %7644 = vmatpush3.bf16.msra.mxu0 %v8154_v1  ;;  %v8248_v1 = vld [vmem:[%s11401_s4 + $0x3f4] ss:$36 sps:$4 sm:$0xff]  }
 0x875   :  { %7645 = vmatprep.subr.bf16.mxu0 %v8625_v3 }
 0x878   :  { %7646 = vmatpush3.bf16.msra.mxu0 %v8155_v13  ;;  %v3515_v13 = vunpack.c.h.bf16 %v7035_v24 }
 0x879   :  { %4357 = vmatprep.subr.bf16.mxu0 %v8158_v17  ;;  %v3517_v17 = vunpack.c.h.bf16 %v7036_v23 }
 0x92e   :  { %v3204_v40 = vpop.f32.mrb[60].mxu0 }
 0x92f   :  { %v3205_v7 = vadd.f32 %v3204_v40, %v3003_v37  ;;  %v3206_v50 = vpop.f32.mrb[61].mxu0  ;;  %v8233_v37 = vld [vmem:[%s11401_s4 + $0x28c] ss:$36 sps:$4 sm:$0xff]   ;;  %v8236_v40 = vld [vmem:[%s11401_s4 + $0x2d4] ss:$36 sps:$4 sm:$0xff]  }
 0x930   :  { %v3207_v9 = vadd.f32 %v3206_v50, %v3007_v8  ;;  %v3208_v49 = vpop.f32.mrb[62].mxu0  ;;  %v8231_v8 = vld [vmem:[%s11401_s4 + $0x288] ss:$36 sps:$4 sm:$0xff]   ;;  %v8239_v50 = vld [vmem:[%s11401_s4 + $0x31c] ss:$36 sps:$4 sm:$0xff]  }
 0x931   :  { %v3209_v61 = vpop.f32.mrb[63].mxu0  ;;  %v3211_v21 = vpack.c.bf16 %v3205_v7, %v3205_v7  ;;  %v8234_v7 = vld [vmem:[%s11401_s4 + $0x2d0] ss:$36 sps:$4 sm:$0xff]   ;;  %v8242_v49 = vld [vmem:[%s11401_s4 + $0x364] ss:$36 sps:$4 sm:$0xff]  }
 0x932   :  { %v3212_v12 = vpack.c.bf16 %v3207_v9, %v3207_v9  ;;  %v8237_v9 = vld [vmem:[%s11401_s4 + $0x318] ss:$36 sps:$4 sm:$0xff]   ;;  %v8240_v61 = vld [vmem:[%s11401_s4 + $0x360] ss:$36 sps:$4 sm:$0xff]  }
 0x934   :  { %3380 = vmatprep.mubr.bf16.mxu1 %v3212_v12  ;;  %v8245_v12 = vld [vmem:[%s11401_s4 + $0x3ac] ss:$36 sps:$4 sm:$0xff]  }
 0x935   :  { %3381 = vmatmul.mubr.bf16.vlgmr.msra.gmra.mrb[44].mxu1 %v3211_v21  ;;  %v8243_v21 = vld [vmem:[%s11401_s4 + $0x3a8] ss:$36 sps:$4 sm:$0xff]  }
 0x936   :  { %3778 = vmatpush1.bf16.msra.mxu1 %v8183_v59  ;;  %v10253_v59 = vrot.slane %v3530_v32, %v9028_v19 }
 0x937   :  { %3779 = vmatprep.subr.bf16.mxu1 %v8191_v35  ;;  %v7034_v35 = vld [vmem:[%s11403_s0 + $0x8] sm:$0xff] }
 0x93a   :  { %3780 = vmatpush1.bf16.msra.mxu1 %v8189_v28  ;;  %v8251_v28 = vld [vmem:[%s11401_s4 + $0x43c] ss:$36 sps:$4 sm:$0xff]  }
 0x93b   :  { %3781 = vmatprep.subr.bf16.mxu1 %v8197_v39  ;;  %v10267_v39 = vcombine.high %v7034_v35, %v7034_v35 }
 0x93d   :  { %3809 = vmatprep.mubr.bf16.mxu1 %v10267_v39 }
 0x93e   :  { %3782 = vmatpush1.bf16.msra.mxu1 %v8195_v38  ;;  %v8249_v38 = vld [vmem:[%s11401_s4 + $0x438] ss:$36 sps:$4 sm:$0xff]  }
 0x93f   :  { %3783 = vmatprep.subr.bf16.mxu1 %v8203_v57  ;;  %v3545_v57 = vadd.f32 %v10253_v59, %v3517_v17  ;;  %v8186_v17 = vld [vmem:[%s11401_s4 + $0x290] ss:$36 sps:$4 sm:$0xff]  }
 0x942   :  { %3784 = vmatpush1.bf16.msra.mxu1 %v8201_v54  ;;  %v3543_v54 = vadd.f32 %v10253_v59, %v3515_v13  ;;  %v8188_v13 = vld [vmem:[%s11401_s4 + $0x294] ss:$36 sps:$4 sm:$0xff]  }
 0x943   :  { %3785 = vmatprep.subr.bf16.mxu1 %v8209_v16 }
 0x944   :  { %v10274_v16 = vpack.c.bf16 %v3545_v57, %v3543_v54  ;;  %v8206_v54 = vld [vmem:[%s11401_s4 + $0x36c] ss:$36 sps:$4 sm:$0xff]  }
 0x945   :  { %v8204_v57 = vld [vmem:[%s11401_s4 + $0x368] ss:$36 sps:$4 sm:$0xff]  }
 0x946   :  { %3786 = vmatpush1.bf16.msra.mxu1 %v8207_v0  ;;  %v10272_v0 = vcombine.low %v7034_v35, %v7034_v35  ;;  %v8200_v35 = vld [vmem:[%s11401_s4 + $0x324] ss:$36 sps:$4 sm:$0xff]  }
 0x947   :  { %3787 = vmatprep.subr.bf16.mxu1 %v8215_v63  ;;  %v7008_v63 = vld [vmem:[%s11410_s9 + $0x4] ss:$0 sm:$0xff] }
 0x94a   :  { %3788 = vmatpush1.bf16.msra.mxu1 %v8213_v11 }
 0x94b   :  { %3789 = vmatprep.subr.bf16.mxu1 %v8221_v29 }
 0x94e   :  { %3790 = vmatpush1.bf16.msra.mxu1 %v8219_v27 }
 0x94f   :  { %3791 = vmatprep.subr.bf16.mxu1 %v8227_v5  ;;  %v8156_v5 = vld [vmem:[%s11401_s4 + $0x8] ss:$36 sps:$4 sm:$0xff]  }
 0x952   :  { %3792 = vmatpush1.bf16.msra.mxu1 %v8225_v2 }
 0x953   :  { %3793 = vmatprep.subr.bf16.mxu1 %v8230_v34  ;;  %v8162_v34 = vld [vmem:[%s11401_s4 + $0x98] ss:$36 sps:$4 sm:$0xff]  }
 0x956   :  { %3794 = vmatpush1.bf16.msra.mxu1 %v8228_v31  ;;  %v8167_v31 = vld [vmem:[%s11401_s4 + $0xe4] ss:$36 sps:$4 sm:$0xff]  }
 0x957   :  { %3795 = vmatprep.subr.bf16.mxu1 %v8233_v37  ;;  %v8165_v37 = vld [vmem:[%s11401_s4 + $0xe0] ss:$36 sps:$4 sm:$0xff]  }
 0x95a   :  { %3796 = vmatpush1.bf16.msra.mxu1 %v8231_v8  ;;  %v8170_v8 = vld [vmem:[%s11401_s4 + $0x12c] ss:$36 sps:$4 sm:$0xff]  }
 0x95b   :  { %3797 = vmatprep.subr.bf16.mxu1 %v8236_v40  ;;  %v8168_v40 = vld [vmem:[%s11401_s4 + $0x128] ss:$36 sps:$4 sm:$0xff]  }
 0x95e   :  { %3798 = vmatpush1.bf16.msra.mxu1 %v8234_v7  ;;  %v8173_v7 = vld [vmem:[%s11401_s4 + $0x174] ss:$36 sps:$4 sm:$0xff]  }
 0x95f   :  { %3799 = vmatprep.subr.bf16.mxu1 %v8239_v50  ;;  %v8171_v50 = vld [vmem:[%s11401_s4 + $0x170] ss:$36 sps:$4 sm:$0xff]  }
 0x962   :  { %3800 = vmatpush1.bf16.msra.mxu1 %v8237_v9  ;;  %v8176_v9 = vld [vmem:[%s11401_s4 + $0x1bc] ss:$36 sps:$4 sm:$0xff]  }
 0x963   :  { %3801 = vmatprep.subr.bf16.mxu1 %v8242_v49  ;;  %v8174_v49 = vld [vmem:[%s11401_s4 + $0x1b8] ss:$36 sps:$4 sm:$0xff]  }
 0x966   :  { %3802 = vmatpush1.bf16.msra.mxu1 %v8240_v61  ;;  %v8179_v61 = vld [vmem:[%s11401_s4 + $0x204] ss:$36 sps:$4 sm:$0xff]  }
 0x967   :  { %3803 = vmatprep.subr.bf16.mxu1 %v8245_v12  ;;  %v8177_v12 = vld [vmem:[%s11401_s4 + $0x200] ss:$36 sps:$4 sm:$0xff]  }
 0x96a   :  { %3804 = vmatpush1.bf16.msra.mxu1 %v8243_v21  ;;  %v8182_v21 = vld [vmem:[%s11401_s4 + $0x24c] ss:$36 sps:$4 sm:$0xff]  }
 0x96b   :  { %3805 = vmatprep.subr.bf16.mxu1 %v8248_v1  ;;  %v8180_v1 = vld [vmem:[%s11401_s4 + $0x248] ss:$36 sps:$4 sm:$0xff]  }
 0x96e   :  { %3806 = vmatpush1.bf16.msra.mxu1 %v8246_v22  ;;  %v8194_v22 = vld [vmem:[%s11401_s4 + $0x2dc] ss:$36 sps:$4 sm:$0xff]  }
 0x96f   :  { %3807 = vmatprep.subr.bf16.mxu1 %v8251_v28  ;;  %v8192_v28 = vld [vmem:[%s11401_s4 + $0x2d8] ss:$36 sps:$4 sm:$0xff]  }
 0x972   :  { %3808 = vmatpush1.bf16.msra.mxu1 %v8249_v38  ;;  %v8198_v38 = vld [vmem:[%s11401_s4 + $0x320] ss:$36 sps:$4 sm:$0xff]  }
 0x975   :  { %3810 = vmatmul.mubr.bf16.vlgmr.msra.gmra.mrb[48].mxu1 %v10272_v0 }
 0x976   :  { %4462 = vmatprep.mubr.bf16.mxu1 %v10274_v16 }
 0xa08   :  { %v7484_v11 = vpop.f32.mrb[44].mxu1 }
 0xa09   :  { %v7485_v27 = vpop.f32.mrb[45].mxu1 }
 0xa0a   :  { %v7486_v29 = vadd.f32 %v7485_v27, %v7484_v11  ;;  %v7487_v24 = vpop.f32.mrb[46].mxu1  ;;  %v8212_v11 = vld [vmem:[%s11401_s4 + $0x3b4] ss:$36 sps:$4 sm:$0xff]   ;;  %v8218_v27 = vld [vmem:[%s11401_s4 + $0x3fc] ss:$36 sps:$4 sm:$0xff]  }
 0xa0b   :  { %v7488_v23 = vpop.f32.mrb[47].mxu1  ;;  %v7038_v24 = vld [vmem:[%s11404_s1 + $0x58] sm:$0xff] }
 0xa0c   :  { %v3383_v32 = vadd.f32 %v7486_v29, %v7008_v63  ;;  %v8210_v63 = vld [vmem:[%s11401_s4 + $0x3b0] ss:$36 sps:$4 sm:$0xff]   ;;  %v8216_v23 = vld [vmem:[%s11401_s4 + $0x3f8] ss:$36 sps:$4 sm:$0xff]  }
 0xa0d   :  { %v7037_v29 = vld [vmem:[%s11404_s1 + $0x50] sm:$0xff] }
 0xa0e   :  { %v3388_v2 = vmax.f32 %v3383_v32, 0.0  ;;  %v3519_v32 = vunpack.c.h.bf16 %v7037_v29 }
 0xa10   :  { %v3389_v6 = vpack.c.bf16 %v3388_v2, %v3388_v2  ;;  %v3521_v2 = vunpack.c.h.bf16 %v7038_v24 }
 0xa12   :  { %7648 = vmatmul.mubr.bf16.vlgmr.msra.gmra.mrb[64].mxu0 %v3389_v6  ;;  %v8222_v6 = vld [vmem:[%s11401_s4 + $0x440] ss:$36 sps:$4 sm:$0xff]  }
 0xa13   :  { %4358 = vmatpush1.bf16.msra.mxu0 %v8156_v5  ;;  %4389 = vmatprep.mubr.bf16.mxu0 %v10274_v16  ;;  %v8224_v5 = vld [vmem:[%s11401_s4 + $0x444] ss:$36 sps:$4 sm:$0xff]  }
 0xa14   :  { %4359 = vmatprep.subr.bf16.mxu0 %v8161_v33  ;;  %v3547_v33 = vadd.f32 %v10253_v59, %v3519_v32 }
 0xa17   :  { %4360 = vmatpush1.bf16.msra.mxu0 %v8159_v14  ;;  %v3549_v14 = vadd.f32 %v10253_v59, %v3521_v2 }
 0xa18   :  { %4361 = vmatprep.subr.bf16.mxu0 %v8164_v26  ;;  %v7039_v26 = vld [vmem:[%s11404_s1 + $0x60] sm:$0xff] }
 0xa1b   :  { %4362 = vmatpush1.bf16.msra.mxu0 %v8162_v34  ;;  %v7040_v34 = vld [vmem:[%s11404_s1 + $0x68] sm:$0xff] }
 0xa1c   :  { %4363 = vmatprep.subr.bf16.mxu0 %v8167_v31  ;;  %v3518_v31 = vunpack.c.l.bf16 %v7037_v29 }
 0xa1f   :  { %4364 = vmatpush1.bf16.msra.mxu0 %v8165_v37  ;;  %v3520_v37 = vunpack.c.l.bf16 %v7038_v24 }
 0xa20   :  { %4365 = vmatprep.subr.bf16.mxu0 %v8170_v8  ;;  %v10389_v8 = vpack.c.bf16 %v3549_v14, %v3547_v33  ;;  %v8258_v33 = vld [vmem:[%s11401_s4 + $0x2e8] ss:$36 sps:$4 sm:$0xff]  }
 0xa21   :  { %v8259_v14 = vld [vmem:[%s11401_s4 + $0xa8] ss:$36 sps:$4 sm:$0xff]  }
 0xa23   :  { %4366 = vmatpush1.bf16.msra.mxu0 %v8168_v40  ;;  %v3523_v40 = vunpack.c.h.bf16 %v7039_v26 }
 0xa24   :  { %4367 = vmatprep.subr.bf16.mxu0 %v8173_v7  ;;  %v3525_v7 = vunpack.c.h.bf16 %v7040_v34 }
 0xa27   :  { %4368 = vmatpush1.bf16.msra.mxu0 %v8171_v50  ;;  %v3546_v50 = vadd.f32 %v10207_v53, %v3518_v31  ;;  %v8263_v31 = vld [vmem:[%s11401_s4 + $0x138] ss:$36 sps:$4 sm:$0xff]  }
 0xa28   :  { %4369 = vmatprep.subr.bf16.mxu0 %v8176_v9  ;;  %v3548_v9 = vadd.f32 %v10207_v53, %v3520_v37  ;;  %v8264_v37 = vld [vmem:[%s11401_s4 + $0x3c0] ss:$36 sps:$4 sm:$0xff]  }
 0xa2b   :  { %4370 = vmatpush1.bf16.msra.mxu0 %v8174_v49  ;;  %v3551_v49 = vadd.f32 %v10253_v59, %v3523_v40  ;;  %v8265_v40 = vld [vmem:[%s11401_s4 + $0x180] ss:$36 sps:$4 sm:$0xff]  }
 0xa2c   :  { %4371 = vmatprep.subr.bf16.mxu0 %v8179_v61  ;;  %v3553_v61 = vadd.f32 %v10253_v59, %v3525_v7  ;;  %v8266_v7 = vld [vmem:[%s11401_s4 + $0x408] ss:$36 sps:$4 sm:$0xff]  }
 0xa2f   :  { %4372 = vmatpush1.bf16.msra.mxu0 %v8177_v12  ;;  %v7041_v12 = vld [vmem:[%s11404_s1 + $0x70] sm:$0xff] }
 0xa30   :  { %4373 = vmatprep.subr.bf16.mxu0 %v8182_v21  ;;  %v7042_v21 = vld [vmem:[%s11404_s1 + $0x78] sm:$0xff] }
 0xa31   :  { %v3528_v29 = vunpack.c.l.bf16 %v7042_v21 }
 0xa33   :  { %4374 = vmatpush1.bf16.msra.mxu0 %v8180_v1  ;;  %v10403_v1 = vpack.c.bf16 %v3548_v9, %v3546_v50  ;;  %v3556_v32 = vadd.f32 %v10207_v53, %v3528_v29  ;;  %v8267_v50 = vld [vmem:[%s11401_s4 + $0x1c8] ss:$36 sps:$4 sm:$0xff]   ;;  %v8268_v9 = vld [vmem:[%s11401_s4 + $0x450] ss:$36 sps:$4 sm:$0xff]  }
 0xa34   :  { %4375 = vmatprep.subr.bf16.mxu0 %v8188_v13  ;;  %v3522_v13 = vunpack.c.l.bf16 %v7039_v26  ;;  %v8260_v26 = vld [vmem:[%s11401_s4 + $0x330] ss:$36 sps:$4 sm:$0xff]  }
 0xa37   :  { %4376 = vmatpush1.bf16.msra.mxu0 %v8186_v17  ;;  %v3524_v17 = vunpack.c.l.bf16 %v7040_v34  ;;  %v8262_v34 = vld [vmem:[%s11401_s4 + $0x378] ss:$36 sps:$4 sm:$0xff]  }
 0xa38   :  { %4377 = vmatprep.subr.bf16.mxu0 %v8194_v22  ;;  %v10405_v22 = vpack.c.bf16 %v3553_v61, %v3551_v49  ;;  %v8269_v49 = vld [vmem:[%s11401_s4 + $0x210] ss:$36 sps:$4 sm:$0xff]   ;;  %v3598_v61 = vld [vmem:[%s11406_s5] sm:$0x3] }
 0xa3b   :  { %4378 = vmatpush1.bf16.msra.mxu0 %v8192_v28  ;;  %v3527_v28 = vunpack.c.h.bf16 %v7041_v12 }
 0xa3c   :  { %4379 = vmatprep.subr.bf16.mxu0 %v8200_v35  ;;  %v3529_v35 = vunpack.c.h.bf16 %v7042_v21 }
 0xa3f   :  { %4380 = vmatpush1.bf16.msra.mxu0 %v8198_v38  ;;  %v3550_v38 = vadd.f32 %v10207_v53, %v3522_v13  ;;  %v3607_v13 = vrot.slane %v3598_v61, %v9028_v19 }
 0xa40   :  { %4381 = vmatprep.subr.bf16.mxu0 %v8206_v54  ;;  %v3552_v54 = vadd.f32 %v10207_v53, %v3524_v17 }
 0xa43   :  { %4382 = vmatpush1.bf16.msra.mxu0 %v8204_v57  ;;  %v3555_v57 = vadd.f32 %v10253_v59, %v3527_v28 }
 0xa44   :  { %4383 = vmatprep.subr.bf16.mxu0 %v8212_v11  ;;  %v3557_v11 = vadd.f32 %v10253_v59, %v3529_v35  ;;  %v8254_v59 = vld [vmem:[%s11401_s4 + $0x258] ss:$36 sps:$4 sm:$0xff]  }
 0xa46   :  { %v10415_v24 = vpack.c.bf16 %v3557_v11, %v3555_v57  ;;  %v7025_v11 = vld [vmem:[%s11414_s11] ss:$0 sm:$0xff] }
 0xa47   :  { %4384 = vmatpush1.bf16.msra.mxu0 %v8210_v63  ;;  %v10413_v63 = vpack.c.bf16 %v3552_v54, %v3550_v38 }
 0xa48   :  { %4385 = vmatprep.subr.bf16.mxu0 %v8218_v27  ;;  %v3526_v27 = vunpack.c.l.bf16 %v7041_v12  ;;  %v3603_v12 = vrot.slane %v3598_v61, %v9080_v10  ;;  %v3811_v21 = vpop.f32.mrb[48].mxu1 }
 0xa49   :  { %v3813_v17 = vpop.f32.mrb[49].mxu1 }
 0xa4a   :  { %v10485_v28 = vadd.f32 %v3811_v21, %v3603_v12  ;;  %v3814_v35 = vadd.f32 %v3813_v17, %v3607_v13  ;;  %v3815_v38 = vpop.f32.mrb[50].mxu1 }
 0xa4b   :  { %4386 = vmatpush1.bf16.msra.mxu0 %v8216_v23  ;;  %v3554_v23 = vadd.f32 %v10207_v53, %v3526_v27  ;;  %v8257_v53 = vld [vmem:[%s11401_s4 + $0x60] ss:$36 sps:$4 sm:$0xff]   ;;  %v3816_v54 = vpop.f32.mrb[51].mxu1 }
 0xa4c   :  { %4387 = vmatprep.subr.bf16.mxu0 %v8224_v5  ;;  %v8255_v5 = vld [vmem:[%s11401_s4 + $0x18] ss:$36 sps:$4 sm:$0xff]   ;;  %v4585_v57 = vpack.c.bf16 %v3814_v35, %v3814_v35 }
 0xa4d   :  { %v10421_v2 = vpack.c.bf16 %v3556_v32, %v3554_v23 }
 0xa4f   :  { %4388 = vmatpush1.bf16.msra.mxu0 %v8222_v6  ;;  %v8256_v6 = vld [vmem:[%s11401_s4 + $0x2a0] ss:$36 sps:$4 sm:$0xff]  }
 0xa50   :  { %7499 = vmatprep.subr.bf16.mxu0 %v8254_v59 }
 0xa52   :  { %4390 = vmatmul.mubr.bf16.vlgmr.msra.gmra.mrb[68].mxu0 %v10211_v30 }
 0xa53   :  { %4399 = vmatprep.mubr.bf16.mxu0 %v10389_v8  ;;  %7500 = vmatpush3.bf16.msra.mxu0 %v8255_v5  ;;  %v10497_v5 = vld [vmem:[%s11406_s5 + $0x2] sm:$0x1f] }
 0xa54   :  { %7501 = vmatprep.subr.bf16.mxu0 %v8256_v6  ;;  %v3919_v6 = vrot.slane %v10497_v5, %v9080_v10 }
 0xa57   :  { %7502 = vmatpush3.bf16.msra.mxu0 %v8257_v53  ;;  %v3923_v53 = vrot.slane %v10497_v5, %v9028_v19 }
 0xa58   :  { %7503 = vmatprep.subr.bf16.mxu0 %v8258_v33 }
 0xa5a   :  { %4400 = vmatmul.mubr.bf16.gmra.mrb[72].mxu0 %v10403_v1 }
 0xa5b   :  { %4409 = vmatprep.mubr.bf16.mxu0 %v10405_v22  ;;  %7504 = vmatpush3.bf16.msra.mxu0 %v8259_v14 }
 0xa5c   :  { %7505 = vmatprep.subr.bf16.mxu0 %v8260_v26 }
 0xa62   :  { %4410 = vmatmul.mubr.bf16.gmra.mrb[76].mxu0 %v10413_v63 }
 0xa63   :  { %4419 = vmatprep.mubr.bf16.mxu0 %v10415_v24 }
 0xa6a   :  { %4420 = vmatmul.mubr.bf16.gmra.mrb[80].mxu0 %v10421_v2 }
 0xa6b   :  { %4535 = vmatprep.mubr.bf16.mxu0 %v10274_v16  ;;  %v8261_v16 = vld [vmem:[%s11401_s4 + $0xf0] ss:$36 sps:$4 sm:$0xff]  }
 0xa6c   :  { %7506 = vmatpush3.bf16.msra.mxu0 %v8261_v16 }
 0xa6d   :  { %7507 = vmatprep.subr.bf16.mxu0 %v8262_v34 }
 0xa70   :  { %7508 = vmatpush3.bf16.msra.mxu0 %v8263_v31 }
 0xa71   :  { %7509 = vmatprep.subr.bf16.mxu0 %v8264_v37 }
 0xa74   :  { %7510 = vmatpush3.bf16.msra.mxu0 %v8265_v40 }
 0xa75   :  { %7511 = vmatprep.subr.bf16.mxu0 %v8266_v7 }
 0xa78   :  { %7512 = vmatpush3.bf16.msra.mxu0 %v8267_v50 }
 0xa79   :  { %7513 = vmatprep.subr.bf16.mxu0 %v8268_v9 }
 0xa7c   :  { %7514 = vmatpush3.bf16.msra.mxu0 %v8269_v49 }
 0xa7f   :  { %4536 = vmatmul.mubr.bf16.vlgmr.msra.gmra.mrb[84].mxu0 %v10211_v30 }
 0xa80   :  { %4543 = vmatprep.mubr.bf16.mxu0 %v10389_v8 }
 0xa87   :  { %4544 = vmatmul.mubr.bf16.gmra.mrb[88].mxu0 %v10403_v1 }
 0xa88   :  { %4551 = vmatprep.mubr.bf16.mxu0 %v10405_v22 }
 0xa8f   :  { %4552 = vmatmul.mubr.bf16.gmra.mrb[92].mxu0 %v10413_v63 }
 0xa90   :  { %4559 = vmatprep.mubr.bf16.mxu0 %v10415_v24 }
 0xa97   :  { %4560 = vmatmul.mubr.bf16.gmra.mrb[96].mxu0 %v10421_v2 }
 0xa98   :  { %4626 = vmatprep.mubr.bf16.mxu0 %v4585_v57 }
 0xae5   :  { %v3495_v27 = vpop.f32.mrb[64].mxu0 }
 0xae6   :  { %v3496_v29 = vadd.f32 %v7025_v11, %v3495_v27  ;;  %v7649_v23 = vpop.f32.mrb[65].mxu0 }
 0xae7   :  { %v3498_v32 = vpop.f32.mrb[66].mxu0 }
 0xae8   :  { %3502 = vst.msk [vmem:[%s11415_s14] sm:$0x7] %vm3501_vm4, %v3496_v29  ;;  %v7650_v59 = vpop.f32.mrb[67].mxu0 }
 0xb25   :  { %v4391_v33 = vpop.f32.mrb[68].mxu0 }
 0xb26   :  { %v4392_v14 = vadd.f32 %v4391_v33, %v3919_v6  ;;  %v4393_v26 = vpop.f32.mrb[69].mxu0 }
 0xb27   :  { %v4394_v16 = vadd.f32 %v4393_v26, %v3923_v53  ;;  %v4395_v34 = vpop.f32.mrb[70].mxu0 }
 0xb28   :  { %v4568_v31 = vadd.f32 %v4392_v14, %v9245_v41  ;;  %v4396_v37 = vadd.f32 %v4395_v34, %v3919_v6  ;;  %v4397_v40 = vpop.f32.mrb[71].mxu0 }
 0xb29   :  { %v4569_v7 = vadd.f32 %v4394_v16, %v9247_v42  ;;  %v4398_v50 = vadd.f32 %v4397_v40, %v3923_v53 }
 0xb2a   :  { %v4570_v9 = vadd.f32 %v4396_v37, %v9249_v43 }
 0xb2b   :  { %v4571_v49 = vadd.f32 %v4398_v50, %v9251_v44 }
 0xb2c   :  { %v4586_v61 = vpack.c.bf16 %v4570_v9, %v4568_v31 }
 0xb2d   :  { %v4401_v12 = vpop.f32.mrb[72].mxu0  ;;  %v4587_v21 = vpack.c.bf16 %v4571_v49, %v4569_v7 }
 0xb2e   :  { %v4402_v13 = vadd.f32 %v4401_v12, %v3919_v6  ;;  %v4403_v17 = vpop.f32.mrb[73].mxu0 }
 0xb2f   :  { %v4404_v35 = vadd.f32 %v4403_v17, %v3923_v53  ;;  %v4405_v38 = vpop.f32.mrb[74].mxu0  ;;  %4594 = vmatprep.subr.bf16.mxu0 %v4587_v21 }
 0xb30   :  { %v4572_v54 = vadd.f32 %v4402_v13, %v9253_v45  ;;  %v4406_v41 = vadd.f32 %v4405_v38, %v3919_v6  ;;  %v4407_v57 = vpop.f32.mrb[75].mxu0  ;;  %4595 = vmatpush1.bf16.xpose.msra.mxu0 %v4586_v61 }
 0xb31   :  { %v4573_v42 = vadd.f32 %v4404_v35, %v9255_v46  ;;  %v4408_v11 = vadd.f32 %v4407_v57, %v3923_v53  ;;  %v4584_v35 = vpack.c.bf16 %v10485_v28, %v10485_v28 }
 0xb32   :  { %v4574_v43 = vadd.f32 %v4406_v41, %v9257_v47 }
 0xb33   :  { %v4575_v44 = vadd.f32 %v4408_v11, %v9259_v48 }
 0xb34   :  { %v4588_v27 = vpack.c.bf16 %v4574_v43, %v4572_v54 }
 0xb35   :  { %v4411_v29 = vpop.f32.mrb[76].mxu0  ;;  %v4589_v23 = vpack.c.bf16 %v4575_v44, %v4573_v42 }
 0xb36   :  { %v4412_v32 = vadd.f32 %v4411_v29, %v3919_v6  ;;  %v4413_v59 = vpop.f32.mrb[77].mxu0 }
 0xb37   :  { %v4414_v33 = vadd.f32 %v4413_v59, %v3923_v53  ;;  %v4415_v14 = vpop.f32.mrb[78].mxu0  ;;  %4596 = vmatprep.subr.bf16.mxu0 %v4589_v23 }
 0xb38   :  { %v4576_v45 = vadd.f32 %v4412_v32, %v9261_v51  ;;  %v4416_v26 = vadd.f32 %v4415_v14, %v3919_v6  ;;  %v4417_v16 = vpop.f32.mrb[79].mxu0  ;;  %4597 = vmatpush1.bf16.xpose.msra.mxu0 %v4588_v27 }
 0xb39   :  { %v4577_v46 = vadd.f32 %v4414_v33, %v9263_v52  ;;  %v4418_v34 = vadd.f32 %v4417_v16, %v3923_v53 }
 0xb3a   :  { %v4578_v47 = vadd.f32 %v4416_v26, %v9268_v55 }
 0xb3b   :  { %v4579_v48 = vadd.f32 %v4418_v34, %v9270_v56 }
 0xb3c   :  { %v4590_v31 = vpack.c.bf16 %v4578_v47, %v4576_v45 }
 0xb3d   :  { %v4421_v37 = vpop.f32.mrb[80].mxu0  ;;  %v4591_v40 = vpack.c.bf16 %v4579_v48, %v4577_v46 }
 0xb3e   :  { %v4422_v7 = vadd.f32 %v4421_v37, %v3919_v6  ;;  %v4423_v50 = vpop.f32.mrb[81].mxu0 }
 0xb3f   :  { %v4424_v9 = vadd.f32 %v4423_v50, %v3923_v53  ;;  %v4425_v49 = vpop.f32.mrb[82].mxu0  ;;  %4598 = vmatprep.subr.bf16.mxu0 %v4591_v40 }
 0xb40   :  { %v4580_v51 = vadd.f32 %v4422_v7, %v9274_v62  ;;  %v4426_v61 = vadd.f32 %v4425_v49, %v3919_v6  ;;  %v4427_v12 = vpop.f32.mrb[83].mxu0  ;;  %4599 = vmatpush1.bf16.xpose.msra.mxu0 %v4590_v31  ;;  %v8272_v49 = vld [vmem:[%s11401_s4 + $0x14] ss:$36 sps:$4 sm:$0xff]  }
 0xb41   :  { %v4581_v52 = vadd.f32 %v4424_v9, %v9278_v15  ;;  %v4428_v21 = vadd.f32 %v4427_v12, %v3923_v53  ;;  %v3935_v15 = vrot.slane %v10497_v5, %v787_v36  ;;  %4430 = vmatprep.subr.bf16.mxu1 %v8272_v49  ;;  %v8273_v12 = vld [vmem:[%s11401_s4 + $0x58] ss:$36 sps:$4 sm:$0xff]  }
 0xb42   :  { %v4582_v55 = vadd.f32 %v4426_v61, %v9280_v18  ;;  %v8275_v61 = vld [vmem:[%s11401_s4 + $0x5c] ss:$36 sps:$4 sm:$0xff]  }
 0xb43   :  { %v4583_v56 = vadd.f32 %v4428_v21, %v9282_v4  ;;  %v8276_v21 = vld [vmem:[%s11401_s4 + $0xa0] ss:$36 sps:$4 sm:$0xff]  }
 0xb44   :  { %v4592_v13 = vpack.c.bf16 %v4582_v55, %v4580_v51  ;;  %v8270_v51 = vld [vmem:[%s11401_s4 + $0x10] ss:$36 sps:$4 sm:$0xff]  }
 0xb45   :  { %v4593_v17 = vpack.c.bf16 %v4583_v56, %v4581_v52  ;;  %4431 = vmatpush1.bf16.msra.mxu1 %v8270_v51  ;;  %v8278_v52 = vld [vmem:[%s11401_s4 + $0xa4] ss:$36 sps:$4 sm:$0xff]   ;;  %v8281_v55 = vld [vmem:[%s11401_s4 + $0xec] ss:$36 sps:$4 sm:$0xff]  }
 0xb46   :  { %4432 = vmatprep.subr.bf16.mxu1 %v8275_v61  ;;  %v8279_v56 = vld [vmem:[%s11401_s4 + $0xe8] ss:$36 sps:$4 sm:$0xff]  }
 0xb47   :  { %4600 = vmatprep.subr.bf16.mxu0 %v4593_v17  ;;  %v8282_v17 = vld [vmem:[%s11401_s4 + $0x130] ss:$36 sps:$4 sm:$0xff]  }
 0xb48   :  { %4601 = vmatpush1.bf16.xpose.msra.mxu0 %v4592_v13  ;;  %v8284_v13 = vld [vmem:[%s11401_s4 + $0x134] ss:$36 sps:$4 sm:$0xff]  }
 0xb49   :  { %4433 = vmatpush1.bf16.msra.mxu1 %v8273_v12 }
 0xb4a   :  { %4434 = vmatprep.subr.bf16.mxu1 %v8278_v52 }
 0xb4d   :  { %4435 = vmatpush1.bf16.msra.mxu1 %v8276_v21 }
 0xb4e   :  { %4436 = vmatprep.subr.bf16.mxu1 %v8281_v55 }
 0xb4f   :  { %4627 = vmatmul.mubr.bf16.vlgmr.msra.gmra.mrb[100].mxu0 %v4584_v35  ;;  %v8287_v35 = vld [vmem:[%s11401_s4 + $0x17c] ss:$36 sps:$4 sm:$0xff]  }
 0xb50   :  { %4690 = vmatprep.mubr.bf16.mxu0 %v8624_v20 }
 0xb51   :  { %4437 = vmatpush1.bf16.msra.mxu1 %v8279_v56 }
 0xb52   :  { %v7515_v62 = vpop.f32.mrb[84].mxu0  ;;  %4438 = vmatprep.subr.bf16.mxu1 %v8284_v13 }
 0xb53   :  { %v7516_v6 = vpop.f32.mrb[85].mxu0 }
 0xb54   :  { %v7517_v53 = vadd.f32 %v7516_v6, %v7515_v62  ;;  %v7518_v18 = vpop.f32.mrb[86].mxu0  ;;  %v8285_v62 = vld [vmem:[%s11401_s4 + $0x178] ss:$36 sps:$4 sm:$0xff]   ;;  %v8288_v6 = vld [vmem:[%s11401_s4 + $0x1c0] ss:$36 sps:$4 sm:$0xff]  }
 0xb55   :  { %v7519_v38 = vpop.f32.mrb[87].mxu0  ;;  %4439 = vmatpush1.bf16.msra.mxu1 %v8282_v17 }
 0xb56   :  { %v10525_v4 = vadd.f32 %v7517_v53, %v3935_v15  ;;  %v7520_v54 = vadd.f32 %v7519_v38, %v7518_v18  ;;  %4440 = vmatprep.subr.bf16.mxu1 %v8287_v35  ;;  %v8293_v53 = vld [vmem:[%s11401_s4 + $0x20c] ss:$36 sps:$4 sm:$0xff]   ;;  %v8296_v38 = vld [vmem:[%s11401_s4 + $0x254] ss:$36 sps:$4 sm:$0xff]  }
 0xb57   :  { %v8291_v18 = vld [vmem:[%s11401_s4 + $0x208] ss:$36 sps:$4 sm:$0xff]  }
 0xb58   :  { %v10527_v41 = vadd.f32 %v7520_v54, %v3935_v15  ;;  %v8294_v54 = vld [vmem:[%s11401_s4 + $0x250] ss:$36 sps:$4 sm:$0xff]  }
 0xb59   :  { %4441 = vmatpush1.bf16.msra.mxu1 %v8285_v62 }
 0xb5a   :  { %v5379_v28 = vpack.c.bf16 %v10527_v41, %v10525_v4  ;;  %v7521_v57 = vpop.f32.mrb[88].mxu0  ;;  %v8426_v4 = vld [vmem:[%s11408_s8 + $0x230] ss:$20 sps:$4 sm:$0xff]  }
 0xb5b   :  { %v7522_v42 = vpop.f32.mrb[89].mxu0  ;;  %v8427_v41 = vld [vmem:[%s11408_s8 + $0xf0] ss:$20 sps:$4 sm:$0xff]  }
 0xb5c   :  { %v7523_v20 = vadd.f32 %v7522_v42, %v7521_v57  ;;  %v7524_v11 = vpop.f32.mrb[90].mxu0  ;;  %v8299_v57 = vld [vmem:[%s11401_s4 + $0x29c] ss:$36 sps:$4 sm:$0xff]  }
 0xb5d   :  { %v7525_v43 = vpop.f32.mrb[91].mxu0  ;;  %v8297_v42 = vld [vmem:[%s11401_s4 + $0x298] ss:$36 sps:$4 sm:$0xff]  }
 0xb5e   :  { %v10531_v44 = vadd.f32 %v7523_v20, %v3935_v15  ;;  %v7526_v36 = vadd.f32 %v7525_v43, %v7524_v11  ;;  %v8302_v20 = vld [vmem:[%s11401_s4 + $0x2e4] ss:$36 sps:$4 sm:$0xff]   ;;  %v8305_v43 = vld [vmem:[%s11401_s4 + $0x32c] ss:$36 sps:$4 sm:$0xff]  }
 0xb5f   :  { %v8300_v11 = vld [vmem:[%s11401_s4 + $0x2e0] ss:$36 sps:$4 sm:$0xff]  }
 0xb60   :  { %v10533_v27 = vadd.f32 %v7526_v36, %v3935_v15  ;;  %v8303_v36 = vld [vmem:[%s11401_s4 + $0x328] ss:$36 sps:$4 sm:$0xff]  }
 0xb62   :  { %v5380_v29 = vpack.c.bf16 %v10533_v27, %v10531_v44  ;;  %v7527_v23 = vpop.f32.mrb[92].mxu0  ;;  %v8429_v44 = vld [vmem:[%s11408_s8 + $0x118] ss:$20 sps:$4 sm:$0xff]  }
 0xb63   :  { %v7528_v32 = vpop.f32.mrb[93].mxu0  ;;  %v8432_v27 = vld [vmem:[%s11407_s6 + $0xc] ss:$24 sps:$4 sm:$0xff]  }
 0xb64   :  { %v7529_v59 = vadd.f32 %v7528_v32, %v7527_v23  ;;  %v7530_v33 = vpop.f32.mrb[94].mxu0  ;;  %v8308_v23 = vld [vmem:[%s11401_s4 + $0x374] ss:$36 sps:$4 sm:$0xff]  }
 0xb65   :  { %v7531_v14 = vpop.f32.mrb[95].mxu0  ;;  %v8306_v32 = vld [vmem:[%s11401_s4 + $0x370] ss:$36 sps:$4 sm:$0xff]  }
 0xb66   :  { %v10537_v45 = vadd.f32 %v7529_v59, %v3935_v15  ;;  %v7532_v26 = vadd.f32 %v7531_v14, %v7530_v33  ;;  %v8311_v59 = vld [vmem:[%s11401_s4 + $0x3bc] ss:$36 sps:$4 sm:$0xff]   ;;  %v8314_v14 = vld [vmem:[%s11401_s4 + $0x404] ss:$36 sps:$4 sm:$0xff]  }
 0xb67   :  { %v8309_v33 = vld [vmem:[%s11401_s4 + $0x3b8] ss:$36 sps:$4 sm:$0xff]  }
 0xb68   :  { %v10539_v16 = vadd.f32 %v7532_v26, %v3935_v15  ;;  %v8312_v26 = vld [vmem:[%s11401_s4 + $0x400] ss:$36 sps:$4 sm:$0xff]  }
 0xb6a   :  { %v5381_v46 = vpack.c.bf16 %v10539_v16, %v10537_v45  ;;  %v7533_v34 = vpop.f32.mrb[96].mxu0 }
 0xb6b   :  { %v7534_v47 = vpop.f32.mrb[97].mxu0 }
 0xb6c   :  { %v7535_v48 = vadd.f32 %v7534_v47, %v7533_v34  ;;  %v7536_v31 = vpop.f32.mrb[98].mxu0  ;;  %v8317_v34 = vld [vmem:[%s11401_s4 + $0x44c] ss:$36 sps:$4 sm:$0xff]  }
 0xb6d   :  { %v7537_v37 = vpop.f32.mrb[99].mxu0  ;;  %v8315_v47 = vld [vmem:[%s11401_s4 + $0x448] ss:$36 sps:$4 sm:$0xff]  }
 0xb6e   :  { %v10543_v40 = vadd.f32 %v7535_v48, %v3935_v15  ;;  %v7538_v7 = vadd.f32 %v7537_v37, %v7536_v31 }
 0xb70   :  { %v10545_v50 = vadd.f32 %v7538_v7, %v3935_v15  ;;  %v8290_v15 = vld [vmem:[%s11401_s4 + $0x1c4] ss:$36 sps:$4 sm:$0xff]  }
 0xb71   :  { %4442 = vmatprep.subr.bf16.mxu1 %v8290_v15 }
 0xb72   :  { %v5382_v9 = vpack.c.bf16 %v10545_v50, %v10543_v40  ;;  %4443 = vmatpush1.bf16.msra.mxu1 %v8288_v6 }
 0xb73   :  { %4444 = vmatprep.subr.bf16.mxu1 %v8293_v53 }
 0xb76   :  { %4445 = vmatpush1.bf16.msra.mxu1 %v8291_v18 }
 0xb77   :  { %4446 = vmatprep.subr.bf16.mxu1 %v8296_v38 }
 0xb7a   :  { %4447 = vmatpush1.bf16.msra.mxu1 %v8294_v54 }
 0xb7b   :  { %4448 = vmatprep.subr.bf16.mxu1 %v8299_v57 }
 0xb7e   :  { %4449 = vmatpush1.bf16.msra.mxu1 %v8297_v42 }
 0xb7f   :  { %4450 = vmatprep.subr.bf16.mxu1 %v8302_v20 }
 0xb82   :  { %4451 = vmatpush1.bf16.msra.mxu1 %v8300_v11 }
 0xb83   :  { %4452 = vmatprep.subr.bf16.mxu1 %v8305_v43 }
 0xb86   :  { %4453 = vmatpush1.bf16.msra.mxu1 %v8303_v36 }
 0xb87   :  { %4454 = vmatprep.subr.bf16.mxu1 %v8308_v23 }
 0xb8a   :  { %4455 = vmatpush1.bf16.msra.mxu1 %v8306_v32 }
 0xb8b   :  { %4456 = vmatprep.subr.bf16.mxu1 %v8311_v59 }
 0xb8e   :  { %4457 = vmatpush1.bf16.msra.mxu1 %v8309_v33 }
 0xb8f   :  { %4458 = vmatprep.subr.bf16.mxu1 %v8314_v14 }
 0xb92   :  { %4459 = vmatpush1.bf16.msra.mxu1 %v8312_v26 }
 0xb93   :  { %4460 = vmatprep.subr.bf16.mxu1 %v8317_v34 }
 0xb96   :  { %4461 = vmatpush1.bf16.msra.mxu1 %v8315_v47 }
 0xb99   :  { %4463 = vmatmul.mubr.bf16.vlgmr.msra.gmra.mrb[52].mxu1 %v10211_v30 }
 0xb9a   :  { %4472 = vmatprep.mubr.bf16.mxu1 %v10389_v8 }
 0xba1   :  { %4473 = vmatmul.mubr.bf16.gmra.mrb[56].mxu1 %v10403_v1  ;;  %v3927_v1 = vrot.slane %v10497_v5, %v779_v58 }
 0xba2   :  { %4482 = vmatprep.mubr.bf16.mxu1 %v10405_v22  ;;  %v3931_v22 = vrot.slane %v10497_v5, %v783_v25 }
 0xba9   :  { %4483 = vmatmul.mubr.bf16.gmra.mrb[60].mxu1 %v10413_v63 }
 0xbaa   :  { %4492 = vmatprep.mubr.bf16.mxu1 %v10415_v24 }
 0xbb1   :  { %4493 = vmatmul.mubr.bf16.gmra.mrb[64].mxu1 %v10421_v2 }
 0xc22   :  { %v4628_v48 = vpop.f32.mrb[100].mxu0 }
 0xc23   :  { %v4634_v31 = vmul.f32 0.0625, %v4628_v48  ;;  %v4630_v37 = vpop.f32.mrb[101].mxu0 }
 0xc24   :  { %v4631_v7 = vpop.f32.mrb[102].mxu0 }
 0xc25   :  { %v4632_v49 = vpop.f32.mrb[103].mxu0  ;;  %v4635_v51 = vsel %vm1488_vm0, %v4634_v31, -inf }
 0xc26   :  { %4636 = vmax.xlane.f32.xlu1 %v4635_v51 }
 0xc6c   :  { %v4464_v63 = vpop.f32.mrb[52].mxu1 }
 0xc6d   :  { %v4465_v24 = vadd.f32 %v4464_v63, %v3927_v1  ;;  %v4466_v2 = vpop.f32.mrb[53].mxu1  ;;  %v8324_v63 = vld [vmem:[%s11401_s4 + $0xac] ss:$36 sps:$4 sm:$0xff]  }
 0xc6e   :  { %v4467_v12 = vadd.f32 %v4466_v2, %v3931_v22  ;;  %v4468_v52 = vpop.f32.mrb[54].mxu1  ;;  %v8327_v2 = vld [vmem:[%s11401_s4 + $0xf4] ss:$36 sps:$4 sm:$0xff]  }
 0xc6f   :  { %v4469_v21 = vadd.f32 %v4468_v52, %v3927_v1  ;;  %v4470_v55 = vpop.f32.mrb[55].mxu1  ;;  %v8330_v52 = vld [vmem:[%s11401_s4 + $0x13c] ss:$36 sps:$4 sm:$0xff]  }
 0xc70   :  { %v4471_v56 = vadd.f32 %v4470_v55, %v3931_v22  ;;  %v8333_v55 = vld [vmem:[%s11401_s4 + $0x184] ss:$36 sps:$4 sm:$0xff]  }
 0xc71   :  { %v4647_v13 = vpack.c.bf16 %v4469_v21, %v4465_v24  ;;  %v8329_v24 = vld [vmem:[%s11401_s4 + $0xf8] ss:$36 sps:$4 sm:$0xff]   ;;  %v8335_v21 = vld [vmem:[%s11401_s4 + $0x188] ss:$36 sps:$4 sm:$0xff]  }
 0xc72   :  { %v4648_v17 = vpack.c.bf16 %v4471_v56, %v4467_v12  ;;  %v8332_v12 = vld [vmem:[%s11401_s4 + $0x140] ss:$36 sps:$4 sm:$0xff]   ;;  %v8338_v56 = vld [vmem:[%s11401_s4 + $0x1d0] ss:$36 sps:$4 sm:$0xff]  }
 0xc74   :  { %v4474_v35 = vpop.f32.mrb[56].mxu1  ;;  %4658 = vmatprep.subr.bf16.mxu0 %v4648_v17  ;;  %v8341_v17 = vld [vmem:[%s11401_s4 + $0x218] ss:$36 sps:$4 sm:$0xff]  }
 0xc75   :  { %v4475_v58 = vadd.f32 %v4474_v35, %v3927_v1  ;;  %v4476_v15 = vpop.f32.mrb[57].mxu1  ;;  %4659 = vmatpush1.bf16.msra.mxu0 %v4647_v13  ;;  %v8336_v13 = vld [vmem:[%s11401_s4 + $0x1cc] ss:$36 sps:$4 sm:$0xff]   ;;  %v8339_v35 = vld [vmem:[%s11401_s4 + $0x214] ss:$36 sps:$4 sm:$0xff]  }
 0xc76   :  { %v4477_v25 = vadd.f32 %v4476_v15, %v3931_v22  ;;  %v4478_v5 = vpop.f32.mrb[58].mxu1  ;;  %v8342_v15 = vld [vmem:[%s11401_s4 + $0x25c] ss:$36 sps:$4 sm:$0xff]  }
 0xc77   :  { %v4479_v6 = vadd.f32 %v4478_v5, %v3927_v1  ;;  %v4480_v53 = vpop.f32.mrb[59].mxu1  ;;  %v8350_v5 = vld [vmem:[%s11401_s4 + $0x2f0] ss:$36 sps:$4 sm:$0xff]  }
 0xc78   :  { %v4481_v18 = vadd.f32 %v4480_v53, %v3931_v22  ;;  %v8353_v53 = vld [vmem:[%s11401_s4 + $0x338] ss:$36 sps:$4 sm:$0xff]  }
 0xc79   :  { %v4649_v38 = vpack.c.bf16 %v4479_v6, %v4475_v58  ;;  %v8344_v58 = vld [vmem:[%s11401_s4 + $0x260] ss:$36 sps:$4 sm:$0xff]   ;;  %v8348_v6 = vld [vmem:[%s11401_s4 + $0x2ec] ss:$36 sps:$4 sm:$0xff]  }
 0xc7a   :  { %v4650_v54 = vpack.c.bf16 %v4481_v18, %v4477_v25  ;;  %v8345_v25 = vld [vmem:[%s11401_s4 + $0x2a4] ss:$36 sps:$4 sm:$0xff]   ;;  %v8351_v18 = vld [vmem:[%s11401_s4 + $0x334] ss:$36 sps:$4 sm:$0xff]  }
 0xc7c   :  { %v4484_v57 = vpop.f32.mrb[60].mxu1  ;;  %4660 = vmatprep.subr.bf16.mxu0 %v4650_v54  ;;  %v8354_v54 = vld [vmem:[%s11401_s4 + $0x37c] ss:$36 sps:$4 sm:$0xff]  }
 0xc7d   :  { %v4485_v42 = vadd.f32 %v4484_v57, %v3927_v1  ;;  %v4486_v20 = vpop.f32.mrb[61].mxu1  ;;  %4661 = vmatpush1.bf16.msra.mxu0 %v4649_v38  ;;  %v8356_v38 = vld [vmem:[%s11401_s4 + $0x380] ss:$36 sps:$4 sm:$0xff]   ;;  %v8359_v57 = vld [vmem:[%s11401_s4 + $0x3c8] ss:$36 sps:$4 sm:$0xff]  }
 0xc7e   :  { %v4487_v11 = vadd.f32 %v4486_v20, %v3931_v22  ;;  %v4488_v43 = vpop.f32.mrb[62].mxu1  ;;  %v8362_v20 = vld [vmem:[%s11401_s4 + $0x410] ss:$36 sps:$4 sm:$0xff]  }
 0xc7f   :  { %v4489_v36 = vadd.f32 %v4488_v43, %v3927_v1  ;;  %v4490_v23 = vpop.f32.mrb[63].mxu1 }
 0xc80   :  { %v4491_v32 = vadd.f32 %v4490_v23, %v3931_v22 }
 0xc81   :  { %v4651_v59 = vpack.c.bf16 %v4489_v36, %v4485_v42  ;;  %v8357_v42 = vld [vmem:[%s11401_s4 + $0x3c4] ss:$36 sps:$4 sm:$0xff]  }
 0xc82   :  { %v4652_v33 = vpack.c.bf16 %v4491_v32, %v4487_v11  ;;  %v8360_v11 = vld [vmem:[%s11401_s4 + $0x40c] ss:$36 sps:$4 sm:$0xff]  }
 0xc84   :  { %v4494_v14 = vpop.f32.mrb[64].mxu1  ;;  %4662 = vmatprep.subr.bf16.mxu0 %v4652_v33  ;;  %v8363_v33 = vld [vmem:[%s11401_s4 + $0x454] ss:$36 sps:$4 sm:$0xff]  }
 0xc85   :  { %v4496_v26 = vpop.f32.mrb[65].mxu1  ;;  %4663 = vmatpush1.bf16.msra.mxu0 %v4651_v59  ;;  %v4495_v37 = vadd.f32 %v4494_v14, %v3927_v1  ;;  %v8365_v59 = vld [vmem:[%s11401_s4 + $0x458] ss:$36 sps:$4 sm:$0xff]  }
 0xc86   :  { %v4498_v34 = vpop.f32.mrb[66].mxu1  ;;  %v4497_v48 = vadd.f32 %v4496_v26, %v3931_v22  ;;  %v8366_v14 = vld [vmem:[%s11407_s6] ss:$24 sps:$4 sm:$0xff]   ;;  %v8371_v26 = vld [vmem:[%s11407_s6 + $0x34] ss:$24 sps:$4 sm:$0xff]  }
 0xc87   :  { %v4500_v47 = vpop.f32.mrb[67].mxu1  ;;  %v4499_v7 = vadd.f32 %v4498_v34, %v3927_v1  ;;  %v8321_v1 = vld [vmem:[%s11401_s4 + $0x64] ss:$36 sps:$4 sm:$0xff]  }
 0xc88   :  { %v8369_v34 = vld [vmem:[%s11407_s6 + $0x30] ss:$24 sps:$4 sm:$0xff]  }
 0xc89   :  { %v4653_v51 = vpack.c.bf16 %v4499_v7, %v4495_v37  ;;  %v8375_v37 = vld [vmem:[%s11407_s6 + $0x90] ss:$24 sps:$4 sm:$0xff]   ;;  %v8380_v7 = vld [vmem:[%s11407_s6 + $0xc4] ss:$24 sps:$4 sm:$0xff]  }
 0xcb3   :  { %v4637_v30 = vpop.xlane.xlu1 %4636 }
 0xcb4   :  { %v4638_v8 = vsub.f32 %v4634_v31, %v4637_v30  ;;  %v4501_v31 = vadd.f32 %v4500_v47, %v3931_v22  ;;  %v8318_v30 = vld [vmem:[%s11401_s4 + $0x1c] ss:$36 sps:$4 sm:$0xff]   ;;  %v8326_v22 = vld [vmem:[%s11401_s4 + $0xb0] ss:$36 sps:$4 sm:$0xff]  }
 0xcb5   :  { %v8374_v47 = vld [vmem:[%s11407_s6 + $0x64] ss:$24 sps:$4 sm:$0xff]  }
 0xcb6   :  { %v4639_v61 = vmul.f32 1.442695, %v4638_v8  ;;  %v4654_v49 = vpack.c.bf16 %v4501_v31, %v4497_v48  ;;  %v8320_v8 = vld [vmem:[%s11401_s4 + $0x20] ss:$36 sps:$4 sm:$0xff]   ;;  %v8377_v31 = vld [vmem:[%s11407_s6 + $0x94] ss:$24 sps:$4 sm:$0xff]  }
 0xcb7   :  { %4905 = vmatprep.subr.bf16.mxu1 %v8320_v8  ;;  %v8372_v48 = vld [vmem:[%s11407_s6 + $0x60] ss:$24 sps:$4 sm:$0xff]   ;;  %v8386_v8 = vld [vmem:[%s11407_s6 + $0x124] ss:$24 sps:$4 sm:$0xff]  }
 0xcb8   :  { %8618 = vpow2.f32 %v4639_v61  ;;  %4664 = vmatprep.subr.bf16.mxu0 %v4654_v49  ;;  %v8323_v61 = vld [vmem:[%s11401_s4 + $0x68] ss:$36 sps:$4 sm:$0xff]   ;;  %4906 = vmatpush1.bf16.msra.mxu1 %v8318_v30  ;;  %v8378_v49 = vld [vmem:[%s11407_s6 + $0xc0] ss:$24 sps:$4 sm:$0xff]  }
 0xcb9   :  { %4665 = vmatpush1.bf16.msra.mxu0 %v4653_v51  ;;  %4907 = vmatprep.subr.bf16.mxu1 %v8323_v61  ;;  %v8383_v51 = vld [vmem:[%s11407_s6 + $0xf4] ss:$24 sps:$4 sm:$0xff]   ;;  %v8381_v30 = vld [vmem:[%s11407_s6 + $0xf0] ss:$24 sps:$4 sm:$0xff]   ;;  %v8384_v61 = vld [vmem:[%s11407_s6 + $0x120] ss:$24 sps:$4 sm:$0xff]  }
 0xcbc   :  { %4908 = vmatpush1.bf16.msra.mxu1 %v8321_v1  ;;  %v8389_v1 = vld [vmem:[%s11407_s6 + $0x154] ss:$24 sps:$4 sm:$0xff]  }
 0xcbd   :  { %4909 = vmatprep.subr.bf16.mxu1 %v8326_v22  ;;  %v8387_v22 = vld [vmem:[%s11407_s6 + $0x150] ss:$24 sps:$4 sm:$0xff]  }
 0xcc0   :  { %4910 = vmatpush1.bf16.msra.mxu1 %v8324_v63  ;;  %v8392_v63 = vld [vmem:[%s11407_s6 + $0x184] ss:$24 sps:$4 sm:$0xff]  }
 0xcc1   :  { %4911 = vmatprep.subr.bf16.mxu1 %v8329_v24  ;;  %v8390_v24 = vld [vmem:[%s11407_s6 + $0x180] ss:$24 sps:$4 sm:$0xff]  }
 0xcc2   :  { %v10659_v62 = vpop.eup %8618 }
 0xcc3   :  { %v4641_v60 = vsel %vm1488_vm0, %v10659_v62, 0.0 }
 0xcc4   :  { %4642 = vadd.xlane.f32.xlu1 %v4641_v60  ;;  %4912 = vmatpush1.bf16.msra.mxu1 %v8327_v2  ;;  %v8347_v60 = vld [vmem:[%s11401_s4 + $0x2a8] ss:$36 sps:$4 sm:$0xff]  }
 0xcc5   :  { %4913 = vmatprep.subr.bf16.mxu1 %v8332_v12  ;;  %v8395_v2 = vld [vmem:[%s11407_s6 + $0x1b4] ss:$24 sps:$4 sm:$0xff]   ;;  %v8393_v12 = vld [vmem:[%s11407_s6 + $0x1b0] ss:$24 sps:$4 sm:$0xff]  }
 0xcc8   :  { %4914 = vmatpush1.bf16.msra.mxu1 %v8330_v52  ;;  %v8398_v52 = vld [vmem:[%s11407_s6 + $0x1e4] ss:$24 sps:$4 sm:$0xff]  }
 0xcc9   :  { %4915 = vmatprep.subr.bf16.mxu1 %v8335_v21  ;;  %v8396_v21 = vld [vmem:[%s11407_s6 + $0x1e0] ss:$24 sps:$4 sm:$0xff]  }
 0xccc   :  { %4916 = vmatpush1.bf16.msra.mxu1 %v8333_v55  ;;  %v8401_v55 = vld [vmem:[%s11407_s6 + $0x214] ss:$24 sps:$4 sm:$0xff]  }
 0xccd   :  { %4917 = vmatprep.subr.bf16.mxu1 %v8338_v56  ;;  %v8399_v56 = vld [vmem:[%s11407_s6 + $0x210] ss:$24 sps:$4 sm:$0xff]  }
 0xcd0   :  { %4918 = vmatpush1.bf16.msra.mxu1 %v8336_v13  ;;  %v8404_v13 = vld [vmem:[%s11407_s6 + $0x244] ss:$24 sps:$4 sm:$0xff]  }
 0xcd1   :  { %4919 = vmatprep.subr.bf16.mxu1 %v8341_v17  ;;  %v8402_v17 = vld [vmem:[%s11407_s6 + $0x240] ss:$24 sps:$4 sm:$0xff]  }
 0xcd4   :  { %4920 = vmatpush1.bf16.msra.mxu1 %v8339_v35  ;;  %v8407_v35 = vld [vmem:[%s11407_s6 + $0x274] ss:$24 sps:$4 sm:$0xff]  }
 0xcd5   :  { %4921 = vmatprep.subr.bf16.mxu1 %v8344_v58  ;;  %v8405_v58 = vld [vmem:[%s11407_s6 + $0x270] ss:$24 sps:$4 sm:$0xff]  }
 0xcd8   :  { %4922 = vmatpush1.bf16.msra.mxu1 %v8342_v15  ;;  %v8410_v15 = vld [vmem:[%s11407_s6 + $0x2a4] ss:$24 sps:$4 sm:$0xff]  }
 0xcd9   :  { %4923 = vmatprep.subr.bf16.mxu1 %v8347_v60  ;;  %v8408_v60 = vld [vmem:[%s11407_s6 + $0x2a0] ss:$24 sps:$4 sm:$0xff]  }
 0xcdc   :  { %4924 = vmatpush1.bf16.msra.mxu1 %v8345_v25 }
 0xcdd   :  { %4925 = vmatprep.subr.bf16.mxu1 %v8350_v5 }
 0xce0   :  { %4926 = vmatpush1.bf16.msra.mxu1 %v8348_v6 }
 0xce1   :  { %4927 = vmatprep.subr.bf16.mxu1 %v8353_v53 }
 0xce4   :  { %4928 = vmatpush1.bf16.msra.mxu1 %v8351_v18 }
 0xce5   :  { %4929 = vmatprep.subr.bf16.mxu1 %v8356_v38 }
 0xce8   :  { %4930 = vmatpush1.bf16.msra.mxu1 %v8354_v54  ;;  %v8413_v54 = vld [vmem:[%s11407_s6 + $0x2d4] ss:$24 sps:$4 sm:$0xff]  }
 0xce9   :  { %4931 = vmatprep.subr.bf16.mxu1 %v8359_v57  ;;  %v8411_v57 = vld [vmem:[%s11407_s6 + $0x2d0] ss:$24 sps:$4 sm:$0xff]  }
 0xcec   :  { %4932 = vmatpush1.bf16.msra.mxu1 %v8357_v42  ;;  %v8414_v42 = vld [vmem:[%s11408_s8 + $0x140] ss:$20 sps:$4 sm:$0xff]  }
 0xced   :  { %4933 = vmatprep.subr.bf16.mxu1 %v8362_v20  ;;  %v8415_v20 = vld [vmem:[%s11408_s8] ss:$20 sps:$4 sm:$0xff]  }
 0xcf0   :  { %4934 = vmatpush1.bf16.msra.mxu1 %v8360_v11  ;;  %v8416_v11 = vld [vmem:[%s11408_s8 + $0x168] ss:$20 sps:$4 sm:$0xff]  }
 0xcf1   :  { %4935 = vmatprep.subr.bf16.mxu1 %v8365_v59  ;;  %v8421_v59 = vld [vmem:[%s11408_s8 + $0x78] ss:$20 sps:$4 sm:$0xff]  }
 0xcf4   :  { %4936 = vmatpush1.bf16.msra.mxu1 %v8363_v33  ;;  %v8422_v33 = vld [vmem:[%s11408_s8 + $0x1e0] ss:$20 sps:$4 sm:$0xff]  }
 0xcf5   :  { %7539 = vmatprep.subr.bf16.mxu1 %v8414_v42  ;;  %v8450_v42 = vld [vmem:[%s11407_s6 + $0x12c] ss:$24 sps:$4 sm:$0xff]  }
 0xd51   :  { %v4643_v43 = vpop.xlane.xlu1 %4642 }
 0xd52   :  { %8620 = vrcp.f32 %v4643_v43  ;;  %v8417_v43 = vld [vmem:[%s11408_s8 + $0x28] ss:$20 sps:$4 sm:$0xff]  }
 0xd5c   :  { %v8621_v36 = vpop.eup %8620 }
 0xd5d   :  { %v4645_v23 = vmul.f32 %v8621_v36, %v10659_v62  ;;  %v8368_v62 = vld [vmem:[%s11407_s6 + $0x4] ss:$24 sps:$4 sm:$0xff]  }
 0xd5e   :  { %5164 = vmatprep.subr.bf16.mxu0 %v8368_v62  ;;  %v8418_v36 = vld [vmem:[%s11408_s8 + $0x190] ss:$20 sps:$4 sm:$0xff]   ;;  %v8424_v62 = vld [vmem:[%s11408_s8 + $0x208] ss:$20 sps:$4 sm:$0xff]  }
 0xd5f   :  { %v4646_v32 = vpack.c.bf16 %v4645_v23, %v4645_v23  ;;  %v8419_v23 = vld [vmem:[%s11408_s8 + $0x50] ss:$20 sps:$4 sm:$0xff]  }
 0xd61   :  { %7157 = vmatmul.mubr.msk.bf16.vlgmr.msra.gmra.mrb[104].mxu0 %vm1488_vm0, %v4646_v32  ;;  %v8420_v32 = vld [vmem:[%s11408_s8 + $0x1b8] ss:$20 sps:$4 sm:$0xff]  }
 0xd62   :  { %5165 = vmatpush1.bf16.msra.mxu0 %v8366_v14  ;;  %v8423_v14 = vld [vmem:[%s11408_s8 + $0xa0] ss:$20 sps:$4 sm:$0xff]  }
 0xd63   :  { %5166 = vmatprep.subr.bf16.mxu0 %v8371_v26  ;;  %v8425_v26 = vld [vmem:[%s11408_s8 + $0xc8] ss:$20 sps:$4 sm:$0xff]  }
 0xd66   :  { %5167 = vmatpush1.bf16.msra.mxu0 %v8369_v34  ;;  %v4733_v34 = vld [vmem:[%s11406_s5 + $0x7] sm:$0x3] }
 0xd67   :  { %5168 = vmatprep.subr.bf16.mxu0 %v8374_v47  ;;  %v4738_v47 = vrot.slane %v4733_v34, %v9080_v10 }
 0xd6a   :  { %5169 = vmatpush1.bf16.msra.mxu0 %v8372_v48  ;;  %v4742_v48 = vrot.slane %v4733_v34, %v9028_v19  ;;  %v8468_v34 = vld [vmem:[%s11407_s6 + $0x24c] ss:$24 sps:$4 sm:$0xff]  }
 0xd6b   :  { %5170 = vmatprep.subr.bf16.mxu0 %v8377_v31  ;;  %v8623_v31 = vld [vmem:[%s11403_s0 + $0x8] sm:$0xff] }
 0xd6e   :  { %5171 = vmatpush1.bf16.msra.mxu0 %v8375_v37  ;;  %v4946_v37 = vunpack.c.l.bf16 %v8623_v31 }
 0xd6f   :  { %5172 = vmatprep.subr.bf16.mxu0 %v8380_v7 }
 0xd72   :  { %5173 = vmatpush1.bf16.msra.mxu0 %v8378_v49  ;;  %v4947_v49 = vunpack.c.h.bf16 %v8623_v31  ;;  %v8469_v31 = vld [vmem:[%s11407_s6 + $0x278] ss:$24 sps:$4 sm:$0xff]  }
 0xd73   :  { %5174 = vmatprep.subr.bf16.mxu0 %v8383_v51 }
 0xd76   :  { %5175 = vmatpush1.bf16.msra.mxu0 %v8381_v30 }
 0xd77   :  { %5176 = vmatprep.subr.bf16.mxu0 %v8386_v8 }
 0xd7a   :  { %5177 = vmatpush1.bf16.msra.mxu0 %v8384_v61 }
 0xd7b   :  { %5178 = vmatprep.subr.bf16.mxu0 %v8389_v1 }
 0xd7e   :  { %5179 = vmatpush1.bf16.msra.mxu0 %v8387_v22 }
 0xd7f   :  { %5180 = vmatprep.subr.bf16.mxu0 %v8392_v63 }
 0xd82   :  { %5181 = vmatpush1.bf16.msra.mxu0 %v8390_v24 }
 0xd83   :  { %5182 = vmatprep.subr.bf16.mxu0 %v8395_v2 }
 0xd86   :  { %5183 = vmatpush1.bf16.msra.mxu0 %v8393_v12 }
 0xd87   :  { %5184 = vmatprep.subr.bf16.mxu0 %v8398_v52 }
 0xd8a   :  { %5185 = vmatpush1.bf16.msra.mxu0 %v8396_v21 }
 0xd8b   :  { %5186 = vmatprep.subr.bf16.mxu0 %v8401_v55 }
 0xd8e   :  { %5187 = vmatpush1.bf16.msra.mxu0 %v8399_v56 }
 0xd8f   :  { %5188 = vmatprep.subr.bf16.mxu0 %v8404_v13 }
 0xd92   :  { %5189 = vmatpush1.bf16.msra.mxu0 %v8402_v17 }
 0xd93   :  { %5190 = vmatprep.subr.bf16.mxu0 %v8407_v35  ;;  %v8430_v35 = vld [vmem:[%s11407_s6 + $0x8] ss:$24 sps:$4 sm:$0xff]  }
 0xd96   :  { %5191 = vmatpush1.bf16.msra.mxu0 %v8405_v58 }
 0xd97   :  { %5192 = vmatprep.subr.bf16.mxu0 %v8410_v15  ;;  %v8435_v15 = vld [vmem:[%s11407_s6 + $0x3c] ss:$24 sps:$4 sm:$0xff]  }
 0xd9a   :  { %5193 = vmatpush1.bf16.msra.mxu0 %v8408_v60  ;;  %v8433_v60 = vld [vmem:[%s11407_s6 + $0x38] ss:$24 sps:$4 sm:$0xff]  }
 0xd9b   :  { %5194 = vmatprep.subr.bf16.mxu0 %v8413_v54  ;;  %v8447_v54 = vld [vmem:[%s11407_s6 + $0xfc] ss:$24 sps:$4 sm:$0xff]  }
 0xd9e   :  { %5195 = vmatpush1.bf16.msra.mxu0 %v8411_v57  ;;  %v8445_v57 = vld [vmem:[%s11407_s6 + $0xf8] ss:$24 sps:$4 sm:$0xff]  }
 0xd9f   :  { %7651 = vmatprep.subr.bf16.mxu0 %v8625_v3 }
 0xe34   :  { %v4692_v25 = vpop.f32.mrb[104].mxu0 }
 0xe35   :  { %v4694_v5 = vpop.f32.mrb[105].mxu0  ;;  %v4699_v18 = vpack.c.bf16 %v4692_v25, %v4692_v25  ;;  %v8438_v25 = vld [vmem:[%s11407_s6 + $0x6c] ss:$24 sps:$4 sm:$0xff]  }
 0xe36   :  { %v4700_v6 = vpack.c.bf16 %v4694_v5, %v4694_v5  ;;  %v4696_v53 = vpop.f32.mrb[106].mxu0  ;;  %v8436_v5 = vld [vmem:[%s11407_s6 + $0x68] ss:$24 sps:$4 sm:$0xff]  }
 0xe37   :  { %v4697_v38 = vpop.f32.mrb[107].mxu0  ;;  %v8439_v53 = vld [vmem:[%s11407_s6 + $0x98] ss:$24 sps:$4 sm:$0xff]  }
 0xe38   :  { %4937 = vmatprep.mubr.bf16.mxu1 %v4700_v6  ;;  %v8441_v6 = vld [vmem:[%s11407_s6 + $0x9c] ss:$24 sps:$4 sm:$0xff]   ;;  %v8442_v38 = vld [vmem:[%s11407_s6 + $0xc8] ss:$24 sps:$4 sm:$0xff]  }
 0xe39   :  { %4938 = vmatmul.mubr.bf16.vlgmr.msra.gmra.mrb[68].mxu1 %v4699_v18  ;;  %v8444_v18 = vld [vmem:[%s11407_s6 + $0xcc] ss:$24 sps:$4 sm:$0xff]  }
 0xe3a   :  { %7540 = vmatpush3.bf16.msra.mxu1 %v8415_v20  ;;  %v8448_v20 = vld [vmem:[%s11407_s6 + $0x128] ss:$24 sps:$4 sm:$0xff]  }
 0xe3b   :  { %7541 = vmatprep.subr.bf16.mxu1 %v8416_v11  ;;  %v8453_v11 = vld [vmem:[%s11407_s6 + $0x15c] ss:$24 sps:$4 sm:$0xff]  }
 0xe3e   :  { %7542 = vmatpush3.bf16.msra.mxu1 %v8417_v43  ;;  %v8451_v43 = vld [vmem:[%s11407_s6 + $0x158] ss:$24 sps:$4 sm:$0xff]  }
 0xe3f   :  { %7543 = vmatprep.subr.bf16.mxu1 %v8418_v36  ;;  %v8456_v36 = vld [vmem:[%s11407_s6 + $0x18c] ss:$24 sps:$4 sm:$0xff]  }
 0xe42   :  { %7544 = vmatpush3.bf16.msra.mxu1 %v8419_v23  ;;  %v8454_v23 = vld [vmem:[%s11407_s6 + $0x188] ss:$24 sps:$4 sm:$0xff]  }
 0xe43   :  { %7545 = vmatprep.subr.bf16.mxu1 %v8420_v32  ;;  %v8459_v32 = vld [vmem:[%s11407_s6 + $0x1bc] ss:$24 sps:$4 sm:$0xff]  }
 0xe46   :  { %7546 = vmatpush3.bf16.msra.mxu1 %v8421_v59  ;;  %v8457_v59 = vld [vmem:[%s11407_s6 + $0x1b8] ss:$24 sps:$4 sm:$0xff]  }
 0xe47   :  { %7547 = vmatprep.subr.bf16.mxu1 %v8422_v33  ;;  %v8462_v33 = vld [vmem:[%s11407_s6 + $0x1ec] ss:$24 sps:$4 sm:$0xff]  }
 0xe4a   :  { %7548 = vmatpush3.bf16.msra.mxu1 %v8423_v14  ;;  %v8460_v14 = vld [vmem:[%s11407_s6 + $0x1e8] ss:$24 sps:$4 sm:$0xff]  }
 0xe4b   :  { %7549 = vmatprep.subr.bf16.mxu1 %v8424_v62  ;;  %v8465_v62 = vld [vmem:[%s11407_s6 + $0x21c] ss:$24 sps:$4 sm:$0xff]  }
 0xe4e   :  { %7550 = vmatpush3.bf16.msra.mxu1 %v8425_v26  ;;  %v8463_v26 = vld [vmem:[%s11407_s6 + $0x218] ss:$24 sps:$4 sm:$0xff]  }
 0xe4f   :  { %7551 = vmatprep.subr.bf16.mxu1 %v8426_v4  ;;  %v8480_v4 = vld [vmem:[%s11408_s8 + $0x16c] ss:$20 sps:$4 sm:$0xff]  }
 0xe52   :  { %7552 = vmatpush3.bf16.msra.mxu1 %v8427_v41  ;;  %v8481_v41 = vld [vmem:[%s11408_s8 + $0x2c] ss:$20 sps:$4 sm:$0xff]  }
 0xf0c   :  { %v4939_v7 = vpop.f32.mrb[68].mxu1 }
 0xf0d   :  { %v4940_v51 = vadd.f32 %v4939_v7, %v4738_v47  ;;  %v4941_v30 = vpop.f32.mrb[69].mxu1  ;;  %v8466_v47 = vld [vmem:[%s11407_s6 + $0x248] ss:$24 sps:$4 sm:$0xff]  }
 0xf0e   :  { %v4942_v8 = vadd.f32 %v4941_v30, %v4742_v48  ;;  %v4943_v61 = vpop.f32.mrb[70].mxu1  ;;  %v8471_v48 = vld [vmem:[%s11407_s6 + $0x27c] ss:$24 sps:$4 sm:$0xff]   ;;  %v8472_v7 = vld [vmem:[%s11407_s6 + $0x2a8] ss:$24 sps:$4 sm:$0xff]  }
 0xf0f   :  { %v4948_v1 = vadd.f32 %v4946_v37, %v4940_v51  ;;  %v4944_v22 = vpop.f32.mrb[71].mxu1  ;;  %v8474_v37 = vld [vmem:[%s11407_s6 + $0x2ac] ss:$24 sps:$4 sm:$0xff]   ;;  %v8475_v51 = vld [vmem:[%s11407_s6 + $0x2d8] ss:$24 sps:$4 sm:$0xff]  }
 0xf10   :  { %v4949_v63 = vadd.f32 %v4947_v49, %v4942_v8  ;;  %v8477_v49 = vld [vmem:[%s11407_s6 + $0x2dc] ss:$24 sps:$4 sm:$0xff]   ;;  %v8478_v30 = vld [vmem:[%s11408_s8 + $0x144] ss:$20 sps:$4 sm:$0xff]   ;;  %v5241_v61 = vld [vmem:[%s11410_s9] sm:$0x1] }
 0xf11   :  { %v10902_v24 = vpack.c.bf16 %v4948_v1, %v4948_v1 }
 0xf12   :  { %v4951_v2 = vpack.c.bf16 %v4949_v63, %v4949_v63 }
 0xf13   :  { %v4986_v52 = vshrl.u32 %v10902_v24, 16 }
 0xf14   :  { %v4989_v12 = vshrl.u32 %v4951_v2, 16 }
 0xf16   :  { %5196 = vmatprep.mubr.bf16.mxu0 %v4989_v12 }
 0xf17   :  { %5197 = vmatmul.mubr.bf16.vlgmr.msra.gmra.mrb[108].mxu0 %v4986_v52  ;;  %v8479_v52 = vld [vmem:[%s11408_s8 + $0x4] ss:$20 sps:$4 sm:$0xff]  }
 0xf18   :  { %7652 = vmatpush3.bf16.xpose.msra.mxu0 %v5379_v28  ;;  %7659 = vmatprep.mubr.msk.bf16.mxu0 %vm8626_vm1, %v8625_v3  ;;  %v8428_v28 = vld [vmem:[%s11408_s8 + $0x258] ss:$20 sps:$4 sm:$0xff]  }
 0xf19   :  { %7653 = vmatprep.subr.bf16.mxu0 %v8625_v3  ;;  %7553 = vmatprep.subr.bf16.mxu1 %v8428_v28  ;;  %v8482_v28 = vld [vmem:[%s11408_s8 + $0x194] ss:$20 sps:$4 sm:$0xff]  }
 0xf1a   :  { %7554 = vmatpush3.bf16.msra.mxu1 %v8429_v44  ;;  %v8483_v44 = vld [vmem:[%s11408_s8 + $0x54] ss:$20 sps:$4 sm:$0xff]  }
 0xf1b   :  { %5629 = vmatprep.subr.bf16.mxu1 %v8432_v27  ;;  %v8484_v27 = vld [vmem:[%s11408_s8 + $0x1bc] ss:$20 sps:$4 sm:$0xff]  }
 0xf20   :  { %7654 = vmatpush3.bf16.xpose.msra.mxu0 %v5380_v29  ;;  %v4984_v29 = vld [vmem:[%s11409_s7] sm:$0x3] }
 0xf21   :  { %7655 = vmatprep.subr.bf16.mxu0 %v8625_v3  ;;  %v5157_v45 = vrot.slane %v4984_v29, %v9080_v10  ;;  %v5161_v16 = vrot.slane %v4984_v29, %v9028_v19  ;;  %v8485_v29 = vld [vmem:[%s11408_s8 + $0x7c] ss:$20 sps:$4 sm:$0xff]  }
 0xf28   :  { %7656 = vmatpush3.bf16.xpose.msra.mxu0 %v5381_v46 }
 0xf29   :  { %7657 = vmatprep.subr.bf16.mxu0 %v8625_v3 }
 0xf30   :  { %7658 = vmatpush3.bf16.xpose.msra.mxu0 %v5382_v9 }
 0xf31   :  { %7566 = vmatprep.subr.bf16.mxu0 %v8478_v30  ;;  %v8523_v30 = vld [vmem:[%s11407_s6 + $0x1c4] ss:$24 sps:$4 sm:$0xff]  }
 0xfea   :  { %v5198_v46 = vpop.f32.mrb[108].mxu0 }
 0xfeb   :  { %v5199_v40 = vadd.f32 %v5198_v46, %v5157_v45  ;;  %v5200_v50 = vpop.f32.mrb[109].mxu0  ;;  %v8486_v45 = vld [vmem:[%s11408_s8 + $0x1e4] ss:$20 sps:$4 sm:$0xff]   ;;  %v8488_v46 = vld [vmem:[%s11408_s8 + $0x20c] ss:$20 sps:$4 sm:$0xff]  }
 0xfec   :  { %v5201_v9 = vadd.f32 %v5200_v50, %v5161_v16  ;;  %v5202_v21 = vpop.f32.mrb[110].mxu0  ;;  %v8487_v16 = vld [vmem:[%s11408_s8 + $0xa4] ss:$20 sps:$4 sm:$0xff]   ;;  %v8490_v50 = vld [vmem:[%s11408_s8 + $0x234] ss:$20 sps:$4 sm:$0xff]  }
 0xfed   :  { %v5205_v55 = vmax.f32 %v5199_v40, 0.0  ;;  %v5203_v56 = vpop.f32.mrb[111].mxu0  ;;  %v8489_v40 = vld [vmem:[%s11408_s8 + $0xcc] ss:$20 sps:$4 sm:$0xff]   ;;  %v8492_v21 = vld [vmem:[%s11408_s8 + $0x25c] ss:$20 sps:$4 sm:$0xff]  }
 0xfee   :  { %v5206_v13 = vmax.f32 %v5201_v9, 0.0  ;;  %v8491_v9 = vld [vmem:[%s11408_s8 + $0xf4] ss:$20 sps:$4 sm:$0xff]  }
 0xfef   :  { %v5207_v58 = vpack.c.bf16 %v5205_v55, %v5205_v55  ;;  %v8493_v55 = vld [vmem:[%s11408_s8 + $0x11c] ss:$20 sps:$4 sm:$0xff]   ;;  %v8496_v56 = vld [vmem:[%s11407_s6 + $0x14] ss:$24 sps:$4 sm:$0xff]  }
 0xff0   :  { %v5208_v17 = vpack.c.bf16 %v5206_v13, %v5206_v13  ;;  %v5457_v13 = vld [vmem:[%s11409_s7 + $0x2] sm:$0x3] }
 0xff2   :  { %5370 = vmatprep.mubr.bf16.mxu1 %v5208_v17  ;;  %v5622_v17 = vrot.slane %v5457_v13, %v9080_v10 }
 0xff3   :  { %5371 = vmatmul.mubr.bf16.vlgmr.msra.gmra.mrb[72].mxu1 %v5207_v58  ;;  %v5898_v58 = vshrl.u32 %v10267_v39, 16 }
 0xff4   :  { %5630 = vmatpush1.bf16.msra.mxu1 %v8430_v35  ;;  %5661 = vmatprep.mubr.bf16.mxu1 %v4951_v2  ;;  %v5626_v35 = vrot.slane %v5457_v13, %v9028_v19  ;;  %v8551_v13 = vld [vmem:[%s11408_s8 + $0x80] ss:$20 sps:$4 sm:$0xff]  }
 0xff5   :  { %5631 = vmatprep.subr.bf16.mxu1 %v8435_v15  ;;  %v5901_v15 = vshll.u32 %v10267_v39, 16  ;;  %v8499_v39 = vld [vmem:[%s11407_s6 + $0x44] ss:$24 sps:$4 sm:$0xff]  }
 0xff8   :  { %5632 = vmatpush1.bf16.msra.mxu1 %v8433_v60 }
 0xff9   :  { %5633 = vmatprep.subr.bf16.mxu1 %v8438_v25 }
 0xffc   :  { %5634 = vmatpush1.bf16.msra.mxu1 %v8436_v5 }
 0xffd   :  { %5635 = vmatprep.subr.bf16.mxu1 %v8441_v6 }
0x1000   :  { %5636 = vmatpush1.bf16.msra.mxu1 %v8439_v53 }
0x1001   :  { %5637 = vmatprep.subr.bf16.mxu1 %v8444_v18  ;;  %v5900_v18 = vrot.slane %v5898_v58, 2  ;;  %v8559_v58 = vld [vmem:[%s11408_s8 + $0xd4] ss:$20 sps:$4 sm:$0xff]  }
0x1004   :  { %5638 = vmatpush1.bf16.msra.mxu1 %v8442_v38  ;;  %v5903_v38 = vrot.slane %v5901_v15, 3  ;;  %v8557_v15 = vld [vmem:[%s11408_s8 + $0xd0] ss:$20 sps:$4 sm:$0xff]  }
0x1005   :  { %5639 = vmatprep.subr.bf16.mxu1 %v8447_v54 }
0x1008   :  { %5640 = vmatpush1.bf16.msra.mxu1 %v8445_v57 }
0x1009   :  { %5641 = vmatprep.subr.bf16.mxu1 %v8450_v42 }
0x100c   :  { %5642 = vmatpush1.bf16.msra.mxu1 %v8448_v20 }
0x100d   :  { %5643 = vmatprep.subr.bf16.mxu1 %v8453_v11  ;;  %v8494_v11 = vld [vmem:[%s11407_s6 + $0x10] ss:$24 sps:$4 sm:$0xff]  }
0x1010   :  { %5644 = vmatpush1.bf16.msra.mxu1 %v8451_v43  ;;  %v5904_v43 = vor.u32 %v5903_v38, %v5900_v18  ;;  %v8566_v18 = vld [vmem:[%s11408_s8 + $0x148] ss:$20 sps:$4 sm:$0xff]  }
0x1011   :  { %5645 = vmatprep.subr.bf16.mxu1 %v8456_v36  ;;  %v8571_v38 = vld [vmem:[%s11408_s8 + $0x174] ss:$20 sps:$4 sm:$0xff]  }
0x1014   :  { %5646 = vmatpush1.bf16.msra.mxu1 %v8454_v23  ;;  %v8497_v23 = vld [vmem:[%s11407_s6 + $0x40] ss:$24 sps:$4 sm:$0xff]  }
0x1015   :  { %5647 = vmatprep.subr.bf16.mxu1 %v8459_v32  ;;  %v8502_v32 = vld [vmem:[%s11407_s6 + $0x74] ss:$24 sps:$4 sm:$0xff]  }
0x1018   :  { %5648 = vmatpush1.bf16.msra.mxu1 %v8457_v59  ;;  %v8500_v59 = vld [vmem:[%s11407_s6 + $0x70] ss:$24 sps:$4 sm:$0xff]  }
0x1019   :  { %5649 = vmatprep.subr.bf16.mxu1 %v8462_v33  ;;  %v8505_v33 = vld [vmem:[%s11407_s6 + $0xa4] ss:$24 sps:$4 sm:$0xff]  }
0x101c   :  { %5650 = vmatpush1.bf16.msra.mxu1 %v8460_v14  ;;  %v8503_v14 = vld [vmem:[%s11407_s6 + $0xa0] ss:$24 sps:$4 sm:$0xff]  }
0x101d   :  { %5651 = vmatprep.subr.bf16.mxu1 %v8465_v62  ;;  %v8508_v62 = vld [vmem:[%s11407_s6 + $0xd4] ss:$24 sps:$4 sm:$0xff]  }
0x1020   :  { %5652 = vmatpush1.bf16.msra.mxu1 %v8463_v26  ;;  %v8506_v26 = vld [vmem:[%s11407_s6 + $0xd0] ss:$24 sps:$4 sm:$0xff]  }
0x1021   :  { %5653 = vmatprep.subr.bf16.mxu1 %v8468_v34  ;;  %v8511_v34 = vld [vmem:[%s11407_s6 + $0x104] ss:$24 sps:$4 sm:$0xff]  }
0x1024   :  { %5654 = vmatpush1.bf16.msra.mxu1 %v8466_v47  ;;  %v8509_v47 = vld [vmem:[%s11407_s6 + $0x100] ss:$24 sps:$4 sm:$0xff]  }
0x1025   :  { %5655 = vmatprep.subr.bf16.mxu1 %v8471_v48  ;;  %v8514_v48 = vld [vmem:[%s11407_s6 + $0x134] ss:$24 sps:$4 sm:$0xff]  }
0x1028   :  { %5656 = vmatpush1.bf16.msra.mxu1 %v8469_v31  ;;  %v8512_v31 = vld [vmem:[%s11407_s6 + $0x130] ss:$24 sps:$4 sm:$0xff]  }
0x1029   :  { %5657 = vmatprep.subr.bf16.mxu1 %v8474_v37  ;;  %v8517_v37 = vld [vmem:[%s11407_s6 + $0x164] ss:$24 sps:$4 sm:$0xff]  }
0x102c   :  { %5658 = vmatpush1.bf16.msra.mxu1 %v8472_v7  ;;  %v8515_v7 = vld [vmem:[%s11407_s6 + $0x160] ss:$24 sps:$4 sm:$0xff]  }
0x102d   :  { %5659 = vmatprep.subr.bf16.mxu1 %v8477_v49  ;;  %v8520_v49 = vld [vmem:[%s11407_s6 + $0x194] ss:$24 sps:$4 sm:$0xff]  }
0x1030   :  { %5660 = vmatpush1.bf16.msra.mxu1 %v8475_v51  ;;  %v8518_v51 = vld [vmem:[%s11407_s6 + $0x190] ss:$24 sps:$4 sm:$0xff]  }
0x1033   :  { %5662 = vmatmul.mubr.bf16.vlgmr.msra.gmra.mrb[76].mxu1 %v10902_v24 }
0x10c6   :  { %v7555_v8 = vpop.f32.mrb[72].mxu1 }
0x10c7   :  { %v7556_v1 = vpop.f32.mrb[73].mxu1 }
0x10c8   :  { %v7557_v22 = vadd.f32 %v7556_v1, %v7555_v8  ;;  %v7558_v63 = vpop.f32.mrb[74].mxu1  ;;  %v8521_v8 = vld [vmem:[%s11407_s6 + $0x1c0] ss:$24 sps:$4 sm:$0xff]   ;;  %v8524_v1 = vld [vmem:[%s11407_s6 + $0x1f0] ss:$24 sps:$4 sm:$0xff]  }
0x10c9   :  { %v7559_v2 = vpop.f32.mrb[75].mxu1  ;;  %v8527_v63 = vld [vmem:[%s11407_s6 + $0x220] ss:$24 sps:$4 sm:$0xff]  }
0x10ca   :  { %v5373_v12 = vadd.f32 %v7557_v22, %v5241_v61  ;;  %v8526_v61 = vld [vmem:[%s11407_s6 + $0x1f4] ss:$24 sps:$4 sm:$0xff]   ;;  %v8529_v22 = vld [vmem:[%s11407_s6 + $0x224] ss:$24 sps:$4 sm:$0xff]  }
0x10cb   :  { %v8532_v2 = vld [vmem:[%s11407_s6 + $0x254] ss:$24 sps:$4 sm:$0xff]  }
0x10cc   :  { %v5378_v24 = vpack.c.bf16 %v5373_v12, %v5373_v12  ;;  %v8530_v12 = vld [vmem:[%s11407_s6 + $0x250] ss:$24 sps:$4 sm:$0xff]  }
0x10ce   :  { %7660 = vmatmul.mubr.bf16.vlgmr.msra.gmra.mrb[112].mxu0 %v5378_v24  ;;  %v8533_v24 = vld [vmem:[%s11407_s6 + $0x280] ss:$24 sps:$4 sm:$0xff]  }
0x10cf   :  { %7567 = vmatpush3.bf16.msra.mxu0 %v8479_v52  ;;  %v8535_v52 = vld [vmem:[%s11407_s6 + $0x284] ss:$24 sps:$4 sm:$0xff]  }
0x10d0   :  { %7568 = vmatprep.subr.bf16.mxu0 %v8480_v4  ;;  %v8538_v4 = vld [vmem:[%s11407_s6 + $0x2b4] ss:$24 sps:$4 sm:$0xff]  }
0x10d3   :  { %7569 = vmatpush3.bf16.msra.mxu0 %v8481_v41  ;;  %v5890_v41 = vshrl.u32 %v10272_v0, 16 }
0x10d4   :  { %7570 = vmatprep.subr.bf16.mxu0 %v8482_v28  ;;  %v5893_v28 = vshll.u32 %v10272_v0, 16  ;;  %v8542_v0 = vld [vmem:[%s11408_s8 + $0x8] ss:$20 sps:$4 sm:$0xff]  }
0x10d7   :  { %7571 = vmatpush3.bf16.msra.mxu0 %v8483_v44  ;;  %v8536_v44 = vld [vmem:[%s11407_s6 + $0x2b0] ss:$24 sps:$4 sm:$0xff]  }
0x10d8   :  { %7572 = vmatprep.subr.bf16.mxu0 %v8484_v27  ;;  %v8541_v27 = vld [vmem:[%s11407_s6 + $0x2e4] ss:$24 sps:$4 sm:$0xff]  }
0x10db   :  { %7573 = vmatpush3.bf16.msra.mxu0 %v8485_v29  ;;  %v5892_v29 = vrot.slane %v5890_v41, 2 }
0x10dc   :  { %7574 = vmatprep.subr.bf16.mxu0 %v8486_v45  ;;  %v5895_v45 = vrot.slane %v5893_v28, 3 }
0x10df   :  { %7575 = vmatpush3.bf16.msra.mxu0 %v8487_v16  ;;  %v8539_v16 = vld [vmem:[%s11407_s6 + $0x2e0] ss:$24 sps:$4 sm:$0xff]  }
0x10e0   :  { %7576 = vmatprep.subr.bf16.mxu0 %v8488_v46  ;;  %v5896_v46 = vor.u32 %v5895_v45, %v5892_v29 }
0x10e3   :  { %7577 = vmatpush3.bf16.msra.mxu0 %v8489_v40  ;;  %v8544_v40 = vld [vmem:[%s11408_s8 + $0xc] ss:$20 sps:$4 sm:$0xff]  }
0x10e4   :  { %7578 = vmatprep.subr.bf16.mxu0 %v8490_v50  ;;  %v8547_v50 = vld [vmem:[%s11408_s8 + $0x34] ss:$20 sps:$4 sm:$0xff]   ;;  %6316 = vmatprep.subr.bf16.mxu1 %v8544_v40 }
0x10e5   :  { %6317 = vmatpush1.bf16.msra.mxu1 %v8542_v0 }
0x10e6   :  { %6318 = vmatprep.subr.bf16.mxu1 %v8547_v50 }
0x10e7   :  { %7579 = vmatpush3.bf16.msra.mxu0 %v8491_v9  ;;  %v8545_v9 = vld [vmem:[%s11408_s8 + $0x30] ss:$20 sps:$4 sm:$0xff]  }
0x10e8   :  { %7580 = vmatprep.subr.bf16.mxu0 %v8492_v21  ;;  %v8550_v21 = vld [vmem:[%s11408_s8 + $0x5c] ss:$20 sps:$4 sm:$0xff]  }
0x10e9   :  { %6319 = vmatpush1.bf16.msra.mxu1 %v8545_v9 }
0x10ea   :  { %6320 = vmatprep.subr.bf16.mxu1 %v8550_v21 }
0x10eb   :  { %7581 = vmatpush3.bf16.msra.mxu0 %v8493_v55  ;;  %v8548_v55 = vld [vmem:[%s11408_s8 + $0x58] ss:$20 sps:$4 sm:$0xff]  }
0x10ec   :  { %6067 = vmatprep.subr.bf16.mxu0 %v8496_v56  ;;  %v8553_v56 = vld [vmem:[%s11408_s8 + $0x84] ss:$20 sps:$4 sm:$0xff]  }
0x10ed   :  { %6321 = vmatpush1.bf16.msra.mxu1 %v8548_v55 }
0x10ee   :  { %6322 = vmatprep.subr.bf16.mxu1 %v8553_v56 }
0x10f1   :  { %6323 = vmatpush1.bf16.msra.mxu1 %v8551_v13 }
0x1106   :  { %v5663_v60 = vpop.f32.mrb[76].mxu1 }
0x1107   :  { %v5664_v25 = vadd.f32 %v5663_v60, %v5622_v17  ;;  %v5665_v5 = vpop.f32.mrb[77].mxu1  ;;  %v8556_v17 = vld [vmem:[%s11408_s8 + $0xac] ss:$20 sps:$4 sm:$0xff]   ;;  %v8562_v60 = vld [vmem:[%s11408_s8 + $0xfc] ss:$20 sps:$4 sm:$0xff]  }
0x1108   :  { %v5666_v6 = vadd.f32 %v5665_v5, %v5626_v35  ;;  %v5667_v53 = vpop.f32.mrb[78].mxu1  ;;  %v8554_v35 = vld [vmem:[%s11408_s8 + $0xa8] ss:$20 sps:$4 sm:$0xff]   ;;  %6324 = vmatprep.subr.bf16.mxu1 %v8556_v17  ;;  %v8565_v5 = vld [vmem:[%s11408_s8 + $0x124] ss:$20 sps:$4 sm:$0xff]  }
0x1109   :  { %v5670_v54 = vmax.f32 %v5664_v25, 0.0  ;;  %v5668_v57 = vpop.f32.mrb[79].mxu1  ;;  %6325 = vmatpush1.bf16.msra.mxu1 %v8554_v35  ;;  %v8560_v25 = vld [vmem:[%s11408_s8 + $0xf8] ss:$20 sps:$4 sm:$0xff]   ;;  %v8603_v17 = vld [vmem:[%s11408_s8 + $0x100] ss:$20 sps:$4 sm:$0xff]  }
0x110a   :  { %v5671_v42 = vmax.f32 %v5666_v6, 0.0  ;;  %6326 = vmatprep.subr.bf16.mxu1 %v8559_v58  ;;  %v8563_v6 = vld [vmem:[%s11408_s8 + $0x120] ss:$20 sps:$4 sm:$0xff]   ;;  %v8574_v57 = vld [vmem:[%s11408_s8 + $0x19c] ss:$20 sps:$4 sm:$0xff]  }
0x110b   :  { %v5672_v36 = vpack.c.bf16 %v5670_v54, %v5670_v54  ;;  %v8568_v53 = vld [vmem:[%s11408_s8 + $0x14c] ss:$20 sps:$4 sm:$0xff]   ;;  %v8569_v54 = vld [vmem:[%s11408_s8 + $0x170] ss:$20 sps:$4 sm:$0xff]   ;;  %v8604_v35 = vld [vmem:[%s11408_s8 + $0x268] ss:$20 sps:$4 sm:$0xff]  }
0x110c   :  { %v5673_v20 = vpack.c.bf16 %v5671_v42, %v5671_v42  ;;  %v8572_v42 = vld [vmem:[%s11408_s8 + $0x198] ss:$20 sps:$4 sm:$0xff]   ;;  %v8605_v58 = vld [vmem:[%s11408_s8 + $0x128] ss:$20 sps:$4 sm:$0xff]  }
0x110d   :  { %6327 = vmatpush1.bf16.msra.mxu1 %v8557_v15  ;;  %v8606_v15 = vld [vmem:[%s11413_s10] sm:$0xff]  }
0x110e   :  { %5835 = vmatprep.mubr.bf16.mxu0 %v5673_v20  ;;  %6328 = vmatprep.subr.bf16.mxu1 %v8562_v60  ;;  %v8577_v20 = vld [vmem:[%s11408_s8 + $0x1c4] ss:$20 sps:$4 sm:$0xff]   ;;  %v8607_v60 = vld [vmem:[%s11413_s10 + $0x8] sm:$0xff]  }
0x110f   :  { %5836 = vmatmul.mubr.bf16.vlgmr.msra.gmra.mrb[116].mxu0 %v5672_v36  ;;  %v8578_v36 = vld [vmem:[%s11408_s8 + $0x1e8] ss:$20 sps:$4 sm:$0xff]  }
0x1110   :  { %6068 = vmatpush1.bf16.msra.mxu0 %v8494_v11  ;;  %6099 = vmatprep.mubr.bf16.mxu0 %v5904_v43  ;;  %v8575_v11 = vld [vmem:[%s11408_s8 + $0x1c0] ss:$20 sps:$4 sm:$0xff]  }
0x1111   :  { %6069 = vmatprep.subr.bf16.mxu0 %v8499_v39  ;;  %6329 = vmatpush1.bf16.msra.mxu1 %v8560_v25  ;;  %v8580_v43 = vld [vmem:[%s11408_s8 + $0x1ec] ss:$20 sps:$4 sm:$0xff]   ;;  %v8583_v39 = vld [vmem:[%s11408_s8 + $0x214] ss:$20 sps:$4 sm:$0xff]  }
0x1112   :  { %6330 = vmatprep.subr.bf16.mxu1 %v8565_v5  ;;  %v8608_v25 = vld [vmem:[%s11413_s10 + $0x10] sm:$0xff]   ;;  %v8609_v5 = vld [vmem:[%s11413_s10 + $0x18] sm:$0xff]  }
0x1114   :  { %6070 = vmatpush1.bf16.msra.mxu0 %v8497_v23  ;;  %v8581_v23 = vld [vmem:[%s11408_s8 + $0x210] ss:$20 sps:$4 sm:$0xff]  }
0x1115   :  { %6071 = vmatprep.subr.bf16.mxu0 %v8502_v32  ;;  %6331 = vmatpush1.bf16.msra.mxu1 %v8563_v6  ;;  %v8610_v6 = vld [vmem:[%s11413_s10 + $0x20] sm:$0xff]  }
0x1116   :  { %6332 = vmatprep.subr.bf16.mxu1 %v8568_v53  ;;  %v8611_v53 = vld [vmem:[%s11413_s10 + $0x28] sm:$0xff]  }
0x1118   :  { %6072 = vmatpush1.bf16.msra.mxu0 %v8500_v59  ;;  %v8586_v59 = vld [vmem:[%s11408_s8 + $0x23c] ss:$20 sps:$4 sm:$0xff]  }
0x1119   :  { %6073 = vmatprep.subr.bf16.mxu0 %v8505_v33  ;;  %6333 = vmatpush1.bf16.msra.mxu1 %v8566_v18  ;;  %v6144_v18 = vld [vmem:[%s11410_s9 + $0x2] sm:$0x3] }
0x111a   :  { %6334 = vmatprep.subr.bf16.mxu1 %v8571_v38  ;;  %v6149_v38 = vrot.slane %v6144_v18, %v9080_v10 }
0x111c   :  { %6074 = vmatpush1.bf16.msra.mxu0 %v8503_v14  ;;  %v8584_v14 = vld [vmem:[%s11408_s8 + $0x238] ss:$20 sps:$4 sm:$0xff]  }
0x111d   :  { %6075 = vmatprep.subr.bf16.mxu0 %v8508_v62  ;;  %6335 = vmatpush1.bf16.msra.mxu1 %v8569_v54  ;;  %v6153_v54 = vrot.slane %v6144_v18, %v9028_v19 }
0x111e   :  { %6336 = vmatprep.subr.bf16.mxu1 %v8574_v57 }
0x1120   :  { %6076 = vmatpush1.bf16.msra.mxu0 %v8506_v26 }
0x1121   :  { %6077 = vmatprep.subr.bf16.mxu0 %v8511_v34  ;;  %6337 = vmatpush1.bf16.msra.mxu1 %v8572_v42  ;;  %v8589_v34 = vld [vmem:[%s11408_s8 + $0x264] ss:$20 sps:$4 sm:$0xff]  }
0x1122   :  { %6338 = vmatprep.subr.bf16.mxu1 %v8577_v20 }
0x1124   :  { %6078 = vmatpush1.bf16.msra.mxu0 %v8509_v47  ;;  %v8587_v47 = vld [vmem:[%s11408_s8 + $0x260] ss:$20 sps:$4 sm:$0xff]  }
0x1125   :  { %6079 = vmatprep.subr.bf16.mxu0 %v8514_v48  ;;  %6339 = vmatpush1.bf16.msra.mxu1 %v8575_v11  ;;  %v8590_v48 = vld [vmem:[%s11408_s8 + $0x150] ss:$20 sps:$4 sm:$0xff]  }
0x1126   :  { %6340 = vmatprep.subr.bf16.mxu1 %v8580_v43 }
0x1128   :  { %6080 = vmatpush1.bf16.msra.mxu0 %v8512_v31  ;;  %v8591_v31 = vld [vmem:[%s11408_s8 + $0x10] ss:$20 sps:$4 sm:$0xff]  }
0x1129   :  { %6081 = vmatprep.subr.bf16.mxu0 %v8517_v37  ;;  %6341 = vmatpush1.bf16.msra.mxu1 %v8578_v36  ;;  %v8592_v37 = vld [vmem:[%s11408_s8 + $0x178] ss:$20 sps:$4 sm:$0xff]  }
0x112a   :  { %6342 = vmatprep.subr.bf16.mxu1 %v8583_v39 }
0x112c   :  { %6082 = vmatpush1.bf16.msra.mxu0 %v8515_v7  ;;  %v8593_v7 = vld [vmem:[%s11408_s8 + $0x38] ss:$20 sps:$4 sm:$0xff]  }
0x112d   :  { %6083 = vmatprep.subr.bf16.mxu0 %v8520_v49  ;;  %6343 = vmatpush1.bf16.msra.mxu1 %v8581_v23  ;;  %v8594_v49 = vld [vmem:[%s11408_s8 + $0x1a0] ss:$20 sps:$4 sm:$0xff]  }
0x112e   :  { %6344 = vmatprep.subr.bf16.mxu1 %v8586_v59  ;;  %v7352_v59 = vld [vmem:[%s11410_s9 + $0x4] ss:$0 sm:$0xff] }
0x1130   :  { %6084 = vmatpush1.bf16.msra.mxu0 %v8518_v51  ;;  %v8595_v51 = vld [vmem:[%s11408_s8 + $0x60] ss:$20 sps:$4 sm:$0xff]  }
0x1131   :  { %6085 = vmatprep.subr.bf16.mxu0 %v8523_v30  ;;  %6345 = vmatpush1.bf16.msra.mxu1 %v8584_v14  ;;  %v8596_v30 = vld [vmem:[%s11408_s8 + $0x1c8] ss:$20 sps:$4 sm:$0xff]  }
0x1132   :  { %6346 = vmatprep.subr.bf16.mxu1 %v8589_v34 }
0x1134   :  { %6086 = vmatpush1.bf16.msra.mxu0 %v8521_v8  ;;  %v8597_v8 = vld [vmem:[%s11408_s8 + $0x88] ss:$20 sps:$4 sm:$0xff]  }
0x1135   :  { %6087 = vmatprep.subr.bf16.mxu0 %v8526_v61  ;;  %6347 = vmatpush1.bf16.msra.mxu1 %v8587_v47  ;;  %v8598_v61 = vld [vmem:[%s11408_s8 + $0x1f0] ss:$20 sps:$4 sm:$0xff]  }
0x1136   :  { %7663 = vmatprep.subr.bf16.mxu1 %v8625_v3 }
0x1138   :  { %6088 = vmatpush1.bf16.msra.mxu0 %v8524_v1  ;;  %v8599_v1 = vld [vmem:[%s11408_s8 + $0xb0] ss:$20 sps:$4 sm:$0xff]  }
0x1139   :  { %6089 = vmatprep.subr.bf16.mxu0 %v8529_v22  ;;  %v8600_v22 = vld [vmem:[%s11408_s8 + $0x218] ss:$20 sps:$4 sm:$0xff]  }
0x113c   :  { %6090 = vmatpush1.bf16.msra.mxu0 %v8527_v63  ;;  %v8601_v63 = vld [vmem:[%s11408_s8 + $0xd8] ss:$20 sps:$4 sm:$0xff]  }
0x113d   :  { %6091 = vmatprep.subr.bf16.mxu0 %v8532_v2  ;;  %v8602_v2 = vld [vmem:[%s11408_s8 + $0x240] ss:$20 sps:$4 sm:$0xff]  }
0x1140   :  { %6092 = vmatpush1.bf16.msra.mxu0 %v8530_v12 }
0x1141   :  { %6093 = vmatprep.subr.bf16.mxu0 %v8535_v52  ;;  %v5706_v52 = vld [vmem:[%s11410_s9 + $0x1] sm:$0x1] }
0x1144   :  { %6094 = vmatpush1.bf16.msra.mxu0 %v8533_v24 }
0x1145   :  { %6095 = vmatprep.subr.bf16.mxu0 %v8538_v4 }
0x1148   :  { %6096 = vmatpush1.bf16.msra.mxu0 %v8536_v44 }
0x1149   :  { %6097 = vmatprep.subr.bf16.mxu0 %v8541_v27  ;;  %v5877_v27 = vld [vmem:[%s11409_s7 + $0x4] sm:$0x3] }
0x114a   :  { %v5882_v29 = vrot.slane %v5877_v27, %v9080_v10  ;;  %v5886_v45 = vrot.slane %v5877_v27, %v9028_v19  ;;  %v8613_v19 = vld [vmem:[%s11413_s10 + $0x38] sm:$0xff]  }
0x114c   :  { %6098 = vmatpush1.bf16.msra.mxu0 %v8539_v16 }
0x114d   :  { %7588 = vmatprep.subr.bf16.mxu0 %v8590_v48 }
0x114f   :  { %6100 = vmatmul.mubr.bf16.vlgmr.msra.gmra.mrb[120].mxu0 %v5896_v46 }
0x1150   :  { %7589 = vmatpush3.bf16.msra.mxu0 %v8591_v31 }
0x1151   :  { %7590 = vmatprep.subr.bf16.mxu0 %v8592_v37 }
0x1154   :  { %7591 = vmatpush3.bf16.msra.mxu0 %v8593_v7 }
0x1155   :  { %7592 = vmatprep.subr.bf16.mxu0 %v8594_v49 }
0x1158   :  { %7593 = vmatpush3.bf16.msra.mxu0 %v8595_v51 }
0x1159   :  { %7594 = vmatprep.subr.bf16.mxu0 %v8596_v30 }
0x115c   :  { %7595 = vmatpush3.bf16.msra.mxu0 %v8597_v8 }
0x115d   :  { %7596 = vmatprep.subr.bf16.mxu0 %v8598_v61 }
0x1160   :  { %7597 = vmatpush3.bf16.msra.mxu0 %v8599_v1 }
0x1161   :  { %7598 = vmatprep.subr.bf16.mxu0 %v8600_v22 }
0x1164   :  { %7599 = vmatpush3.bf16.msra.mxu0 %v8601_v63 }
0x1165   :  { %7600 = vmatprep.subr.bf16.mxu0 %v8602_v2 }
0x1168   :  { %7601 = vmatpush3.bf16.msra.mxu0 %v8603_v17 }
0x1169   :  { %7602 = vmatprep.subr.bf16.mxu0 %v8604_v35 }
0x116c   :  { %7603 = vmatpush3.bf16.msra.mxu0 %v8605_v58 }
0x11a1   :  { %v5417_v32 = vpop.f32.mrb[112].mxu0 }
0x11a2   :  { %7238 = vst.msk [vmem:[%s11411_s12 + $0x1] sm:$0x1] %vm2277_vm2, %v5417_v32  ;;  %v7661_v33 = vpop.f32.mrb[113].mxu0  ;;  %v8612_v32 = vld [vmem:[%s11413_s10 + $0x30] sm:$0xff]  }
0x11a3   :  { %v5420_v62 = vpop.f32.mrb[114].mxu0 }
0x11a4   :  { %v7662_v26 = vpop.f32.mrb[115].mxu0 }
0x11e2   :  { %v7582_v12 = vpop.f32.mrb[116].mxu0 }
0x11e3   :  { %v7583_v24 = vpop.f32.mrb[117].mxu0 }
0x11e4   :  { %v7584_v4 = vadd.f32 %v7583_v24, %v7582_v12  ;;  %v7585_v41 = vpop.f32.mrb[118].mxu0 }
0x11e5   :  { %v7586_v28 = vpop.f32.mrb[119].mxu0 }
0x11e6   :  { %v5838_v44 = vadd.f32 %v7584_v4, %v5706_v52 }
0x11e8   :  { %7287 = vst.msk [vmem:[%s11412_s13 + $0x1] sm:$0x1] %vm2697_vm3, %v5838_v44 }
0x1222   :  { %v6101_v16 = vpop.f32.mrb[120].mxu0 }
0x1223   :  { %v6102_v46 = vadd.f32 %v6101_v16, %v5882_v29  ;;  %v6103_v0 = vpop.f32.mrb[121].mxu0 }
0x1224   :  { %v6104_v40 = vadd.f32 %v6103_v0, %v5886_v45  ;;  %v6105_v50 = vpop.f32.mrb[122].mxu0 }
0x1225   :  { %v6108_v9 = vmax.f32 %v6102_v46, 0.0  ;;  %v6106_v21 = vpop.f32.mrb[123].mxu0 }
0x1226   :  { %v6109_v55 = vmax.f32 %v6104_v40, 0.0 }
0x1227   :  { %v6110_v13 = vpack.c.bf16 %v6108_v9, %v6108_v9 }
0x1228   :  { %v6111_v56 = vpack.c.bf16 %v6109_v55, %v6109_v55 }
0x122a   :  { %6348 = vmatprep.mubr.bf16.mxu1 %v6111_v56 }
0x122b   :  { %6349 = vmatmul.mubr.bf16.vlgmr.msra.gmra.mrb[80].mxu1 %v6110_v13 }
0x122c   :  { %7679 = vmatprep.mubr.msk.bf16.mxu1 %vm8626_vm1, %v8625_v3  ;;  %7664 = vmatpush3.bf16.msra.mxu1 %v8606_v15 }
0x122d   :  { %7665 = vmatprep.subr.bf16.mxu1 %v8625_v3 }
0x1230   :  { %7666 = vmatpush3.bf16.msra.mxu1 %v8607_v60 }
0x1231   :  { %7667 = vmatprep.subr.bf16.mxu1 %v8625_v3 }
0x1234   :  { %7668 = vmatpush3.bf16.msra.mxu1 %v8608_v25 }
0x1235   :  { %7669 = vmatprep.subr.bf16.mxu1 %v8625_v3 }
0x1238   :  { %7670 = vmatpush3.bf16.msra.mxu1 %v8609_v5 }
0x1239   :  { %7671 = vmatprep.subr.bf16.mxu1 %v8625_v3 }
0x123c   :  { %7672 = vmatpush3.bf16.msra.mxu1 %v8610_v6 }
0x123d   :  { %7673 = vmatprep.subr.bf16.mxu1 %v8625_v3 }
0x1240   :  { %7674 = vmatpush3.bf16.msra.mxu1 %v8611_v53 }
0x1241   :  { %7675 = vmatprep.subr.bf16.mxu1 %v8625_v3 }
0x1244   :  { %7676 = vmatpush3.bf16.msra.mxu1 %v8612_v32 }
0x1245   :  { %7677 = vmatprep.subr.bf16.mxu1 %v8625_v3  ;;  %v7369_v3 = vld [vmem:[%s11414_s11] ss:$0 sm:$0xff] }
0x1248   :  { %7678 = vmatpush3.bf16.msra.mxu1 %v8613_v19 }
0x12fe   :  { %v6350_v57 = vpop.f32.mrb[80].mxu1 }
0x12ff   :  { %v6351_v42 = vadd.f32 %v6350_v57, %v6149_v38  ;;  %v6352_v20 = vpop.f32.mrb[81].mxu1 }
0x1300   :  { %v6353_v11 = vadd.f32 %v6352_v20, %v6153_v54  ;;  %v6354_v43 = vpop.f32.mrb[82].mxu1 }
0x1301   :  { %v6355_v36 = vpop.f32.mrb[83].mxu1  ;;  %v6357_v23 = vpack.c.bf16 %v6351_v42, %v6351_v42 }
0x1302   :  { %v6358_v39 = vpack.c.bf16 %v6353_v11, %v6353_v11 }
0x1304   :  { %6526 = vmatprep.mubr.bf16.mxu0 %v6358_v39 }
0x1305   :  { %6527 = vmatmul.mubr.bf16.vlgmr.msra.gmra.mrb[124].mxu0 %v6357_v23 }
0x13d8   :  { %v7604_v10 = vpop.f32.mrb[124].mxu0 }
0x13d9   :  { %v7605_v33 = vpop.f32.mrb[125].mxu0 }
0x13da   :  { %v7606_v14 = vadd.f32 %v7605_v33, %v7604_v10  ;;  %v7607_v62 = vpop.f32.mrb[126].mxu0 }
0x13db   :  { %v7608_v26 = vpop.f32.mrb[127].mxu0 }
0x13dc   :  { %v6529_v34 = vadd.f32 %v7606_v14, %v7352_v59 }
0x13de   :  { %v6534_v47 = vmax.f32 %v6529_v34, 0.0 }
0x13e0   :  { %v6535_v48 = vpack.c.bf16 %v6534_v47, %v6534_v47 }
0x13e2   :  { %7680 = vmatmul.mubr.bf16.vlgmr.msra.gmra.mrb[84].mxu1 %v6535_v48 }
0x14b5   :  { %v6641_v31 = vpop.f32.mrb[84].mxu1 }
0x14b6   :  { %v6642_v37 = vadd.f32 %v7369_v3, %v6641_v31  ;;  %v7681_v7 = vpop.f32.mrb[85].mxu1 }
0x14b7   :  { %v6644_v49 = vpop.f32.mrb[86].mxu1 }
0x14b8   :  { %7378 = vst.msk [vmem:[%s11415_s14 + $0x4] sm:$0x7] %vm3501_vm4, %v6642_v37  ;;  %v7682_v51 = vpop.f32.mrb[87].mxu1 }

</bundles_post_ra>
